<compile_context>
chip_gen: v6e
topology: v6e:2x2x1
jax: 0.10.0
libtpu: 0.0.40
codegen_flags: <defaults>
</compile_context>

<pallas_src>
import jax
import jax.numpy as jnp
from jax import lax
from jax.experimental import pallas as pl
from jax.experimental.pallas import tpu as pltpu

_BN_EPS = 1e-3


# ----------------------------------------------------------------------------
# The fused Mixed_3c kernel
# ----------------------------------------------------------------------------
def _mixed3c_kernel(x_ref, wA_ref, sA_ref, bA_ref,
                    wck_ref, w3_ref, sE_ref, bE_ref,
                    o_ref,
                    acc_ref, ringz_ref, ringb0_ref, ringmx_ref,
                    cpad_ref, ppad_ref):
    H, W, Cin = x_ref.shape
    HW = H * W
    HWp = (H + 2) * W
    C0 = ringb0_ref.shape[-1]        # 128  branch0
    C12 = cpad_ref.shape[-1]         # 160  branch1a|branch2a (3x3 conv input)
    C3 = w3_ref.shape[-1]            # 64   branch3 (pooled 1x1)
    CE = acc_ref.shape[-1]           # 352 = 288 (b1b|b2b) + 64 (b3, zero-padded in wck)

    d = pl.program_id(1)
    kd = pl.program_id(2)
    num_d = pl.num_programs(1)

    # -- once per (n): persistent pad borders; interiors are overwritten below --
    @pl.when(jnp.logical_and(d == 0, kd == 0))
    def _init_pads():
        cpad_ref[...] = jnp.zeros_like(cpad_ref)
        ppad_ref[...] = jnp.full_like(ppad_ref, -jnp.inf)

    # -- once per output depth: reset the 3x3x3 conv accumulator --
    @pl.when(kd == 0)
    def _init_acc():
        acc_ref[...] = jnp.zeros_like(acc_ref)

    # -- produce: per-input-slice cached results (ring slot = slice % 3) --
    def _produce(slot):
        xs = x_ref[...]                                      # (H, W, 256) bf16
        xs2 = xs.reshape(HW, Cin)
        # fused 1x1x1 conv (branch0 | branch1a | branch2a) + BN + ReLU, 256 -> 288
        yA = jnp.dot(xs2, wA_ref[...], preferred_element_type=jnp.float32)
        yA = jnp.maximum(yA * sA_ref[...] + bA_ref[...], 0.0).astype(jnp.bfloat16)
        ringb0_ref[slot] = yA[:, :C0]                        # branch0 cache
        # zero-padded conv input -> kw-packed im2col slab (rows = (H+2)*W, K = 3*160)
        cpad_ref[1:H + 1, 1:W + 1, :] = yA[:, C0:].reshape(H, W, C12)
        cp = cpad_ref[...]                                   # (H+2, W+2, 160)
        ringz_ref[slot, :, 0 * C12:1 * C12] = cp[:, 0:W, :].reshape(HWp, C12)
        ringz_ref[slot, :, 1 * C12:2 * C12] = cp[:, 1:W + 1, :].reshape(HWp, C12)
        ringz_ref[slot, :, 2 * C12:3 * C12] = cp[:, 2:W + 2, :].reshape(HWp, C12)
        # separable 3x3 spatial max (branch3 pool) for this slice
        ppad_ref[1:H + 1, 1:W + 1, :] = xs
        v = ppad_ref[...]
        mw = jnp.maximum(jnp.maximum(v[:, 0:W, :], v[:, 1:W + 1, :]), v[:, 2:W + 2, :])
        mh = jnp.maximum(jnp.maximum(mw[0:H], mw[1:H + 1]), mw[2:H + 2])
        ringmx_ref[slot] = mh.reshape(HW, Cin)

    # new slice d+1 at the leading edge (kd==2); slice 0 warm-up at (d==0, kd==0)
    produce_now = jnp.logical_or(
        jnp.logical_and(d == 0, kd == 0),
        jnp.logical_and(kd == 2, d + 1 < num_d))

    @pl.when(produce_now)
    def _():
        _produce(jnp.where(kd == 0, 0, (d + 1) % 3))

    # -- consume: 3 kh-matmuls (kw packed into K) of depth tap kd --
    dd = d + kd - 1                                          # input slice of this tap
    valid = jnp.logical_and(dd >= 0, dd < num_d)

    @pl.when(valid)
    def _accumulate():
        slot_dd = (d + kd + 2) % 3                           # == dd % 3, non-negative
        zslab = ringz_ref[slot_dd]                           # ((H+2)*W, 480) bf16
        part = None
        for kh in range(3):
            col = zslab[kh * W:kh * W + HW]                  # (HW, 480)
            y = jnp.dot(col, wck_ref[kd * 3 + kh],
                        preferred_element_type=jnp.float32)  # (HW, 352)
            part = y if part is None else part + y
        acc_ref[...] += part

    # -- finalize: write all 480 output channels of depth d --
    @pl.when(kd == 2)
    def _finalize():
        # branch0 (channels 0:128), cached at this slice's production
        o_ref[:, 0:C0] = ringb0_ref[d % 3]
        # branch3: depth-fold the cached per-slice spatial maxes, then 1x1 conv
        neg = jnp.full((HW, Cin), -jnp.inf, jnp.bfloat16)
        m_prev = jnp.where(d >= 1, ringmx_ref[(d + 2) % 3], neg)
        m_next = jnp.where(d + 1 < num_d, ringmx_ref[(d + 1) % 3], neg)
        pooled = jnp.maximum(jnp.maximum(m_prev, ringmx_ref[d % 3]), m_next)
        y3 = jnp.dot(pooled, w3_ref[...], preferred_element_type=jnp.float32)
        acc_ref[:, CE - C3:] = y3                            # zero-padded tail of acc
        # single 128-aligned 352-wide store: (b1b|b2b|b3) scale+bias+ReLU fused
        o_ref[:, C0:] = jnp.maximum(acc_ref[...] * sE_ref[...] + bE_ref[...],
                                    0.0).astype(o_ref.dtype)


# ----------------------------------------------------------------------------
# Wrapper: NCDHW in / NCDHW out (bf16), packs fused weights and calls the kernel.
# ----------------------------------------------------------------------------
def mixed_3c(x, params):
    N, C, D, H, W = x.shape
    assert C == 256
    xl = jnp.transpose(x, (0, 2, 3, 4, 1)).astype(jnp.bfloat16)   # (N,D,H,W,256)

    w0, s0, b0 = params["b0"]
    w1a, s1a, b1a = params["b1a"]
    w1b, s1b, b1b = params["b1b"]
    w2a, s2a, b2a = params["b2a"]
    w2b, s2b, b2b = params["b2b"]
    w3, s3, b3 = params["b3"]

    # fused leading 1x1x1 conv: [branch0 | branch1a | branch2a]  (256 -> 288)
    wA = jnp.concatenate([w0, w1a, w2a], axis=1)
    sA = jnp.concatenate([s0, s1a, s2a]).reshape(1, -1)
    bA = jnp.concatenate([b0, b1a, b2a]).reshape(1, -1)

    C0 = w0.shape[1]                                  # 128
    c1i, c1o = w1b.shape[1], w1b.shape[2]             # 128 -> 192
    c2i, c2o = w2b.shape[1], w2b.shape[2]             # 32  -> 96
    C12 = c1i + c2i                                   # 160
    Cc = c1o + c2o                                    # 288
    C3 = w3.shape[1]                                  # 64
    CE = Cc + C3                                      # 352 (zero-padded conv output)
    Cout = C0 + CE                                    # 480

    # block-diagonal fusion of b1b|b2b, kw packed into K, output padded to 352
    wc = jnp.zeros((27, C12, CE), w1b.dtype)
    wc = wc.at[:, :c1i, :c1o].set(w1b)
    wc = wc.at[:, c1i:, c1o:Cc].set(w2b)
    wck = wc.reshape(9, 3 * C12, CE)                  # (kd*3+kh, 480, 352)

    # epilogue scale/bias for channels 128:480 = [b1b | b2b | b3]
    sE = jnp.concatenate([s1b, s2b, s3]).reshape(1, -1)
    bE = jnp.concatenate([b1b, b2b, b3]).reshape(1, -1)

    # each input depth slice is fetched exactly once (leading slice; d==0 warm-up)
    def x_map(n, d, k):
        lead = jnp.minimum(d + 1, D - 1)
        return (n, jnp.where(jnp.logical_and(d == 0, k == 0), 0, lead), 0, 0, 0)

    out = pl.pallas_call(
        _mixed3c_kernel,
        out_shape=jax.ShapeDtypeStruct((N, D, H * W, Cout), jnp.bfloat16),
        grid=(N, D, 3),
        in_specs=[
            pl.BlockSpec((None, None, H, W, C), x_map),
            pl.BlockSpec((C, C0 + C12), lambda n, d, k: (0, 0)),
            pl.BlockSpec((1, C0 + C12), lambda n, d, k: (0, 0)),
            pl.BlockSpec((1, C0 + C12), lambda n, d, k: (0, 0)),
            pl.BlockSpec((9, 3 * C12, CE), lambda n, d, k: (0, 0, 0)),
            pl.BlockSpec((C, C3), lambda n, d, k: (0, 0)),
            pl.BlockSpec((1, CE), lambda n, d, k: (0, 0)),
            pl.BlockSpec((1, CE), lambda n, d, k: (0, 0)),
        ],
        out_specs=pl.BlockSpec((None, None, H * W, Cout),
                               lambda n, d, k: (n, d, 0, 0)),
        scratch_shapes=[
            pltpu.VMEM((H * W, CE), jnp.float32),                 # conv accumulator
            pltpu.VMEM((3, (H + 2) * W, 3 * C12), jnp.bfloat16),  # im2col ring (conv in)
            pltpu.VMEM((3, H * W, C0), jnp.bfloat16),             # branch0 ring
            pltpu.VMEM((3, H * W, C), jnp.bfloat16),              # spatial-max ring
            pltpu.VMEM((H + 2, W + 2, C12), jnp.bfloat16),        # zero-padded conv in
            pltpu.VMEM((H + 2, W + 2, C), jnp.bfloat16),          # -inf-padded pool in
        ],
        compiler_params=pltpu.CompilerParams(
            # d carries the ring-buffer state -> must be "arbitrary"
            dimension_semantics=("parallel", "arbitrary", "arbitrary"),
            vmem_limit_bytes=32 * 1024 * 1024,
        ),
    )(xl, wA, sA, bA, wck, w3, sE, bE)

    out = out.reshape(N, D, H, W, Cout)
    return jnp.transpose(out, (0, 4, 1, 2, 3))                    # back to NCDHW (bf16)


# ----------------------------------------------------------------------------
# Parameters (deterministic, synthetic) with BN folded to scale/bias.
# ----------------------------------------------------------------------------
def _make_basic_conv_params(key, cin, cout, k):
    kw_, kg, kb = jax.random.split(key, 3)
    if k == 1:
        w = jax.random.normal(kw_, (cin, cout), jnp.float32) / jnp.sqrt(cin)
    else:
        # (27, Cin, Cout), tap index = kd*9 + kh*3 + kw
        w = jax.random.normal(kw_, (27, cin, cout), jnp.float32) / jnp.sqrt(27.0 * cin)
    w = w.astype(jnp.bfloat16)                       # MXU-native weights
    gamma = 1.0 + 0.1 * jax.random.normal(kg, (cout,), jnp.float32)
    beta = 0.1 * jax.random.normal(kb, (cout,), jnp.float32)
    scale = gamma / jnp.sqrt(1.0 + _BN_EPS)          # inference BN fold (mean=0, var=1)
    bias = beta
    return w, scale, bias


def make_mixed_3c_params(key):
    ks = jax.random.split(key, 6)
    return {
        "b0": _make_basic_conv_params(ks[0], 256, 128, 1),
        "b1a": _make_basic_conv_params(ks[1], 256, 128, 1),
        "b1b": _make_basic_conv_params(ks[2], 128, 192, 3),
        "b2a": _make_basic_conv_params(ks[3], 256, 32, 1),
        "b2b": _make_basic_conv_params(ks[4], 32, 96, 3),
        "b3": _make_basic_conv_params(ks[5], 256, 64, 1),
    }


# ----------------------------------------------------------------------------
# Pure-JAX reference (f32) for validation.
# ----------------------------------------------------------------------------
def _conv1_ref(x, w, s, b):
    y = jnp.einsum("ndhwc,co->ndhwo", x, w.astype(jnp.float32), precision="highest")
    return jnp.maximum(y * s + b, 0.0)


def _conv3_ref(x, w, s, b):
    w5 = w.astype(jnp.float32).reshape(3, 3, 3, w.shape[1], w.shape[2])
    y = lax.conv_general_dilated(
        x, w5, window_strides=(1, 1, 1),
        padding=[(1, 1), (1, 1), (1, 1)],
        dimension_numbers=("NDHWC", "DHWIO", "NDHWC"),
        precision=lax.Precision.HIGHEST)
    return jnp.maximum(y * s + b, 0.0)


def mixed_3c_reference(x, params):
    xl = jnp.transpose(x, (0, 2, 3, 4, 1)).astype(jnp.bfloat16).astype(jnp.float32)
    w0, s0, b0 = params["b0"]
    w1a, s1a, b1a = params["b1a"]
    w1b, s1b, b1b = params["b1b"]
    w2a, s2a, b2a = params["b2a"]
    w2b, s2b, b2b = params["b2b"]
    w3, s3, b3 = params["b3"]
    y0 = _conv1_ref(xl, w0, s0, b0)
    y1 = _conv3_ref(_conv1_ref(xl, w1a, s1a, b1a), w1b, s1b, b1b)
    y2 = _conv3_ref(_conv1_ref(xl, w2a, s2a, b2a), w2b, s2b, b2b)
    xp = lax.reduce_window(xl, -jnp.inf, lax.max,
                           (1, 3, 3, 3, 1), (1, 1, 1, 1, 1),
                           [(0, 0), (1, 1), (1, 1), (1, 1), (0, 0)])
    y3 = _conv1_ref(xp, w3, s3, b3)
    out = jnp.concatenate([y0, y1, y2, y3], axis=-1)
    return jnp.transpose(out, (0, 4, 1, 2, 3))


if __name__ == "__main__":
    key = jax.random.PRNGKey(0)
    kx, kp = jax.random.split(key)

    N, Cin, D, H, W = 2, 256, 4, 8, 8
    x = jax.random.normal(kx, (N, Cin, D, H, W), jnp.float32)
    params = make_mixed_3c_params(kp)

    out = jax.block_until_ready(jax.jit(mixed_3c)(x, params))

    assert out.shape == (N, 480, D, H, W), out.shape
    out_f32 = out.astype(jnp.float32)
    assert bool(jnp.all(jnp.isfinite(out_f32)))
    assert bool(jnp.all(out_f32 >= 0.0))             # ReLU output

    ref = mixed_3c_reference(x, params)
    err = float(jnp.max(jnp.abs(out_f32 - ref)) / (jnp.max(jnp.abs(ref)) + 1e-6))
    assert err < 5e-2, f"numerical mismatch vs reference: {err}"

    print("KERNEL_OK")
</pallas_src>

<mosaic_0001>
module attributes {stable_mosaic.version = 11 : i64} {
  func.func @_mixed3c_kernel(%arg0: i32, %arg1: i32, %arg2: i32, %arg3: memref<1x1x8x8x256xbf16, #tpu.memory_space<vmem>>, %arg4: memref<256x288xbf16, #tpu.memory_space<vmem>>, %arg5: memref<1x288xf32, #tpu.memory_space<vmem>>, %arg6: memref<1x288xf32, #tpu.memory_space<vmem>>, %arg7: memref<9x480x352xbf16, #tpu.memory_space<vmem>>, %arg8: memref<256x64xbf16, #tpu.memory_space<vmem>>, %arg9: memref<1x352xf32, #tpu.memory_space<vmem>>, %arg10: memref<1x352xf32, #tpu.memory_space<vmem>>, %arg11: memref<1x1x64x480xbf16, #tpu.memory_space<vmem>>, %arg12: memref<64x352xf32, #tpu.memory_space<vmem>>, %arg13: memref<3x80x480xbf16, #tpu.memory_space<vmem>>, %arg14: memref<3x64x128xbf16, #tpu.memory_space<vmem>>, %arg15: memref<3x64x256xbf16, #tpu.memory_space<vmem>>, %arg16: memref<10x10x160xbf16, #tpu.memory_space<vmem>>, %arg17: memref<10x10x256xbf16, #tpu.memory_space<vmem>>) attributes {dimension_semantics = [#tpu.dimension_semantics<parallel>, #tpu.dimension_semantics<arbitrary>, #tpu.dimension_semantics<arbitrary>], iteration_bounds = array<i64: 2, 4, 3>, scalar_prefetch = 0 : i64, scratch_operands = 6 : i64, tpu.core_type = #tpu.core_type<tc>, window_params = [{transform_indices = @transform_0, window_bounds = array<i64: 1, 1, 8, 8, 256>}, {pipeline_mode = #tpu.pipeline_mode<synchronous>, transform_indices = @transform_1, window_bounds = array<i64: 256, 288>}, {pipeline_mode = #tpu.pipeline_mode<synchronous>, transform_indices = @transform_2, window_bounds = array<i64: 1, 288>}, {pipeline_mode = #tpu.pipeline_mode<synchronous>, transform_indices = @transform_3, window_bounds = array<i64: 1, 288>}, {pipeline_mode = #tpu.pipeline_mode<synchronous>, transform_indices = @transform_4, window_bounds = array<i64: 9, 480, 352>}, {pipeline_mode = #tpu.pipeline_mode<synchronous>, transform_indices = @transform_5, window_bounds = array<i64: 256, 64>}, {pipeline_mode = #tpu.pipeline_mode<synchronous>, transform_indices = @transform_6, window_bounds = array<i64: 1, 352>}, {pipeline_mode = #tpu.pipeline_mode<synchronous>, transform_indices = @transform_7, window_bounds = array<i64: 1, 352>}, {transform_indices = @transform_8, window_bounds = array<i64: 1, 1, 64, 480>}]} {
    %c0_i32 = arith.constant 0 : i32
    %0 = arith.cmpi eq, %arg1, %c0_i32 : i32
    %c0_i32_0 = arith.constant 0 : i32
    %1 = arith.cmpi eq, %arg2, %c0_i32_0 : i32
    %2 = arith.andi %0, %1 : i1
    %3 = arith.extui %2 : i1 to i32
    %c0_i32_1 = arith.constant 0 : i32
    %4 = arith.cmpi ne, %3, %c0_i32_1 : i32
    scf.if %4 {
      %cst = arith.constant 0.000000e+00 : bf16
      %28 = vector.broadcast %cst : bf16 to vector<10x10x160xbf16>
      %c0 = arith.constant 0 : index
      %c0_13 = arith.constant 0 : index
      %c0_14 = arith.constant 0 : index
      %29 = vector.load %arg16[%c0, %c0_13, %c0_14] : memref<10x10x160xbf16, #tpu.memory_space<vmem>>, vector<10x10x160xbf16>
      tpu.vector_store %arg16[%c0, %c0_13, %c0_14], %28 {strides = array<i32>} : memref<10x10x160xbf16, #tpu.memory_space<vmem>>, vector<10x10x160xbf16>,
      %cst_15 = arith.constant 0xFF80 : bf16
      %30 = vector.broadcast %cst_15 : bf16 to vector<10x10x256xbf16>
      %c0_16 = arith.constant 0 : index
      %c0_17 = arith.constant 0 : index
      %c0_18 = arith.constant 0 : index
      %31 = vector.load %arg17[%c0_16, %c0_17, %c0_18] : memref<10x10x256xbf16, #tpu.memory_space<vmem>>, vector<10x10x256xbf16>
      tpu.vector_store %arg17[%c0_16, %c0_17, %c0_18], %30 {strides = array<i32>} : memref<10x10x256xbf16, #tpu.memory_space<vmem>>, vector<10x10x256xbf16>,
    } else {
    }
    %c0_i32_2 = arith.constant 0 : i32
    %5 = arith.cmpi eq, %arg2, %c0_i32_2 : i32
    %6 = arith.extui %5 : i1 to i32
    %c0_i32_3 = arith.constant 0 : i32
    %7 = arith.cmpi ne, %6, %c0_i32_3 : i32
    scf.if %7 {
      %cst = arith.constant 0.000000e+00 : f32
      %28 = vector.broadcast %cst : f32 to vector<64x352xf32>
      %c0 = arith.constant 0 : index
      %c0_13 = arith.constant 0 : index
      %29 = vector.load %arg12[%c0, %c0_13] : memref<64x352xf32, #tpu.memory_space<vmem>>, vector<64x352xf32>
      tpu.vector_store %arg12[%c0, %c0_13], %28 {strides = array<i32>} : memref<64x352xf32, #tpu.memory_space<vmem>>, vector<64x352xf32>,
    } else {
    }
    %c0_i32_4 = arith.constant 0 : i32
    %8 = arith.cmpi eq, %arg1, %c0_i32_4 : i32
    %c0_i32_5 = arith.constant 0 : i32
    %9 = arith.cmpi eq, %arg2, %c0_i32_5 : i32
    %10 = arith.andi %8, %9 : i1
    %c2_i32 = arith.constant 2 : i32
    %11 = arith.cmpi eq, %arg2, %c2_i32 : i32
    %c1_i32 = arith.constant 1 : i32
    %12 = arith.addi %arg1, %c1_i32 : i32
    %c4_i32 = arith.constant 4 : i32
    %13 = arith.cmpi slt, %12, %c4_i32 : i32
    %14 = arith.andi %11, %13 : i1
    %15 = arith.ori %10, %14 : i1
    %16 = arith.extui %15 : i1 to i32
    %c0_i32_6 = arith.constant 0 : i32
    %17 = arith.cmpi ne, %16, %c0_i32_6 : i32
    scf.if %17 {
      %c0_i32_13 = arith.constant 0 : i32
      %28 = arith.cmpi eq, %arg2, %c0_i32_13 : i32
      %c1_i32_14 = arith.constant 1 : i32
      %29 = arith.addi %arg1, %c1_i32_14 : i32
      %c3_i32 = arith.constant 3 : i32
      %c0_i32_15 = arith.constant 0 : i32
      %30 = arith.cmpi eq, %c3_i32, %c0_i32_15 : i32
      %c1_i32_16 = arith.constant 1 : i32
      %31 = arith.select %30, %c1_i32_16, %c3_i32 : i32
      %32 = arith.remsi %29, %31 : i32
      %c0_i32_17 = arith.constant 0 : i32
      %33 = arith.cmpi ne, %32, %c0_i32_17 : i32
      %c0_i32_18 = arith.constant 0 : i32
      %34 = arith.cmpi slt, %32, %c0_i32_18 : i32
      %c0_i32_19 = arith.constant 0 : i32
      %35 = arith.cmpi slt, %31, %c0_i32_19 : i32
      %36 = arith.xori %34, %35 : i1
      %37 = arith.andi %36, %33 : i1
      %38 = arith.addi %32, %31 : i32
      %39 = arith.select %37, %38, %32 : i32
      %c0_i32_20 = arith.constant 0 : i32
      %40 = arith.select %28, %c0_i32_20, %39 : i32
      %c0 = arith.constant 0 : index
      %c0_21 = arith.constant 0 : index
      %c0_22 = arith.constant 0 : index
      %c0_23 = arith.constant 0 : index
      %c0_24 = arith.constant 0 : index
      %41 = vector.load %arg3[%c0, %c0_21, %c0_22, %c0_23, %c0_24] : memref<1x1x8x8x256xbf16, #tpu.memory_space<vmem>>, vector<1x1x8x8x256xbf16>
      %42 = vector.shape_cast %41 : vector<1x1x8x8x256xbf16> to vector<8x8x256xbf16>
      %43 = vector.shape_cast %42 : vector<8x8x256xbf16> to vector<64x256xbf16>
      %c0_25 = arith.constant 0 : index
      %c0_26 = arith.constant 0 : index
      %44 = vector.load %arg4[%c0_25, %c0_26] : memref<256x288xbf16, #tpu.memory_space<vmem>>, vector<256x288xbf16>
      %cst = arith.constant dense<0.000000e+00> : vector<64x288xf32>
      %45 = tpu.matmul %43, %44, %cst {dimension_numbers = #tpu.dot_dimension_numbers<[1], [0], [0], [1], [0, 0, 1, 1], [], []>} : vector<64x256xbf16>, vector<256x288xbf16>, vector<64x288xf32> -> vector<64x288xf32>
      %c0_27 = arith.constant 0 : index
      %c0_28 = arith.constant 0 : index
      %46 = vector.load %arg5[%c0_27, %c0_28] : memref<1x288xf32, #tpu.memory_space<vmem>>, vector<1x288xf32>
      %47 = vector.broadcast %46 : vector<1x288xf32> to vector<64x288xf32>
      %48 = arith.mulf %45, %47 : vector<64x288xf32>
      %c0_29 = arith.constant 0 : index
      %c0_30 = arith.constant 0 : index
      %49 = vector.load %arg6[%c0_29, %c0_30] : memref<1x288xf32, #tpu.memory_space<vmem>>, vector<1x288xf32>
      %50 = vector.broadcast %49 : vector<1x288xf32> to vector<64x288xf32>
      %51 = arith.addf %48, %50 : vector<64x288xf32>
      %cst_31 = arith.constant 0.000000e+00 : f32
      %52 = vector.broadcast %cst_31 : f32 to vector<64x288xf32>
      %53 = arith.maximumf %51, %52 : vector<64x288xf32>
      %54 = arith.truncf %53 : vector<64x288xf32> to vector<64x288xbf16>
      %55 = vector.extract_strided_slice %54 {offsets = [0, 0], sizes = [64, 128], strides = [1, 1]} : vector<64x288xbf16> to vector<64x128xbf16>
      %56 = arith.index_cast %40 : i32 to index
      %c0_32 = arith.constant 0 : index
      %c0_33 = arith.constant 0 : index
      %57 = vector.load %arg14[%56, %c0_32, %c0_33] : memref<3x64x128xbf16, #tpu.memory_space<vmem>>, vector<1x64x128xbf16>
      %58 = vector.shape_cast %57 : vector<1x64x128xbf16> to vector<64x128xbf16>
      %59 = vector.shape_cast %55 : vector<64x128xbf16> to vector<1x64x128xbf16>
      tpu.vector_store %arg14[%56, %c0_32, %c0_33], %59 {strides = array<i32>} : memref<3x64x128xbf16, #tpu.memory_space<vmem>>, vector<1x64x128xbf16>,
      %60 = vector.extract_strided_slice %54 {offsets = [0, 128], sizes = [64, 160], strides = [1, 1]} : vector<64x288xbf16> to vector<64x160xbf16>
      %61 = vector.shape_cast %60 : vector<64x160xbf16> to vector<8x8x160xbf16>
      %c1 = arith.constant 1 : index
      %c1_34 = arith.constant 1 : index
      %c0_35 = arith.constant 0 : index
      %62 = vector.load %arg16[%c1, %c1_34, %c0_35] : memref<10x10x160xbf16, #tpu.memory_space<vmem>>, vector<8x8x160xbf16>
      tpu.vector_store %arg16[%c1, %c1_34, %c0_35], %61 {strides = array<i32>} : memref<10x10x160xbf16, #tpu.memory_space<vmem>>, vector<8x8x160xbf16>,
      %c0_36 = arith.constant 0 : index
      %c0_37 = arith.constant 0 : index
      %c0_38 = arith.constant 0 : index
      %63 = vector.load %arg16[%c0_36, %c0_37, %c0_38] : memref<10x10x160xbf16, #tpu.memory_space<vmem>>, vector<10x10x160xbf16>
      %64 = vector.extract_strided_slice %63 {offsets = [0, 0, 0], sizes = [10, 8, 160], strides = [1, 1, 1]} : vector<10x10x160xbf16> to vector<10x8x160xbf16>
      %65 = vector.shape_cast %64 : vector<10x8x160xbf16> to vector<80x160xbf16>
      %66 = arith.index_cast %40 : i32 to index
      %c0_39 = arith.constant 0 : index
      %c0_40 = arith.constant 0 : index
      %67 = vector.load %arg13[%66, %c0_39, %c0_40] : memref<3x80x480xbf16, #tpu.memory_space<vmem>>, vector<1x80x160xbf16>
      %68 = vector.shape_cast %67 : vector<1x80x160xbf16> to vector<80x160xbf16>
      %69 = vector.shape_cast %65 : vector<80x160xbf16> to vector<1x80x160xbf16>
      tpu.vector_store %arg13[%66, %c0_39, %c0_40], %69 {strides = array<i32>} : memref<3x80x480xbf16, #tpu.memory_space<vmem>>, vector<1x80x160xbf16>,
      %70 = vector.extract_strided_slice %63 {offsets = [0, 1, 0], sizes = [10, 8, 160], strides = [1, 1, 1]} : vector<10x10x160xbf16> to vector<10x8x160xbf16>
      %71 = vector.shape_cast %70 : vector<10x8x160xbf16> to vector<80x160xbf16>
      %72 = arith.index_cast %40 : i32 to index
      %c0_41 = arith.constant 0 : index
      %c160 = arith.constant 160 : index
      %73 = vector.load %arg13[%72, %c0_41, %c160] : memref<3x80x480xbf16, #tpu.memory_space<vmem>>, vector<1x80x160xbf16>
      %74 = vector.shape_cast %73 : vector<1x80x160xbf16> to vector<80x160xbf16>
      %75 = vector.shape_cast %71 : vector<80x160xbf16> to vector<1x80x160xbf16>
      tpu.vector_store %arg13[%72, %c0_41, %c160], %75 {strides = array<i32>} : memref<3x80x480xbf16, #tpu.memory_space<vmem>>, vector<1x80x160xbf16>,
      %76 = vector.extract_strided_slice %63 {offsets = [0, 2, 0], sizes = [10, 8, 160], strides = [1, 1, 1]} : vector<10x10x160xbf16> to vector<10x8x160xbf16>
      %77 = vector.shape_cast %76 : vector<10x8x160xbf16> to vector<80x160xbf16>
      %78 = arith.index_cast %40 : i32 to index
      %c0_42 = arith.constant 0 : index
      %c320 = arith.constant 320 : index
      %79 = vector.load %arg13[%78, %c0_42, %c320] : memref<3x80x480xbf16, #tpu.memory_space<vmem>>, vector<1x80x160xbf16>
      %80 = vector.shape_cast %79 : vector<1x80x160xbf16> to vector<80x160xbf16>
      %81 = vector.shape_cast %77 : vector<80x160xbf16> to vector<1x80x160xbf16>
      tpu.vector_store %arg13[%78, %c0_42, %c320], %81 {strides = array<i32>} : memref<3x80x480xbf16, #tpu.memory_space<vmem>>, vector<1x80x160xbf16>,
      %c1_43 = arith.constant 1 : index
      %c1_44 = arith.constant 1 : index
      %c0_45 = arith.constant 0 : index
      %82 = vector.load %arg17[%c1_43, %c1_44, %c0_45] : memref<10x10x256xbf16, #tpu.memory_space<vmem>>, vector<8x8x256xbf16>
      tpu.vector_store %arg17[%c1_43, %c1_44, %c0_45], %42 {strides = array<i32>} : memref<10x10x256xbf16, #tpu.memory_space<vmem>>, vector<8x8x256xbf16>,
      %c0_46 = arith.constant 0 : index
      %c0_47 = arith.constant 0 : index
      %c0_48 = arith.constant 0 : index
      %83 = vector.load %arg17[%c0_46, %c0_47, %c0_48] : memref<10x10x256xbf16, #tpu.memory_space<vmem>>, vector<10x10x256xbf16>
      %84 = vector.extract_strided_slice %83 {offsets = [0, 0, 0], sizes = [10, 8, 256], strides = [1, 1, 1]} : vector<10x10x256xbf16> to vector<10x8x256xbf16>
      %85 = vector.extract_strided_slice %83 {offsets = [0, 1, 0], sizes = [10, 8, 256], strides = [1, 1, 1]} : vector<10x10x256xbf16> to vector<10x8x256xbf16>
      %86 = arith.maximumf %84, %85 : vector<10x8x256xbf16>
      %87 = vector.extract_strided_slice %83 {offsets = [0, 2, 0], sizes = [10, 8, 256], strides = [1, 1, 1]} : vector<10x10x256xbf16> to vector<10x8x256xbf16>
      %88 = arith.maximumf %86, %87 : vector<10x8x256xbf16>
      %89 = vector.extract_strided_slice %88 {offsets = [0, 0, 0], sizes = [8, 8, 256], strides = [1, 1, 1]} : vector<10x8x256xbf16> to vector<8x8x256xbf16>
      %90 = vector.extract_strided_slice %88 {offsets = [1, 0, 0], sizes = [8, 8, 256], strides = [1, 1, 1]} : vector<10x8x256xbf16> to vector<8x8x256xbf16>
      %91 = arith.maximumf %89, %90 : vector<8x8x256xbf16>
      %92 = vector.extract_strided_slice %88 {offsets = [2, 0, 0], sizes = [8, 8, 256], strides = [1, 1, 1]} : vector<10x8x256xbf16> to vector<8x8x256xbf16>
      %93 = arith.maximumf %91, %92 : vector<8x8x256xbf16>
      %94 = vector.shape_cast %93 : vector<8x8x256xbf16> to vector<64x256xbf16>
      %95 = arith.index_cast %40 : i32 to index
      %c0_49 = arith.constant 0 : index
      %c0_50 = arith.constant 0 : index
      %96 = vector.load %arg15[%95, %c0_49, %c0_50] : memref<3x64x256xbf16, #tpu.memory_space<vmem>>, vector<1x64x256xbf16>
      %97 = vector.shape_cast %96 : vector<1x64x256xbf16> to vector<64x256xbf16>
      %98 = vector.shape_cast %94 : vector<64x256xbf16> to vector<1x64x256xbf16>
      tpu.vector_store %arg15[%95, %c0_49, %c0_50], %98 {strides = array<i32>} : memref<3x64x256xbf16, #tpu.memory_space<vmem>>, vector<1x64x256xbf16>,
    } else {
    }
    %18 = arith.addi %arg1, %arg2 : i32
    %c1_i32_7 = arith.constant 1 : i32
    %19 = arith.subi %18, %c1_i32_7 : i32
    %c0_i32_8 = arith.constant 0 : i32
    %20 = arith.cmpi sge, %19, %c0_i32_8 : i32
    %c4_i32_9 = arith.constant 4 : i32
    %21 = arith.cmpi slt, %19, %c4_i32_9 : i32
    %22 = arith.andi %20, %21 : i1
    %23 = arith.extui %22 : i1 to i32
    %c0_i32_10 = arith.constant 0 : i32
    %24 = arith.cmpi ne, %23, %c0_i32_10 : i32
    scf.if %24 {
      %28 = arith.addi %arg1, %arg2 : i32
      %c2_i32_13 = arith.constant 2 : i32
      %29 = arith.addi %28, %c2_i32_13 : i32
      %c3_i32 = arith.constant 3 : i32
      %c0_i32_14 = arith.constant 0 : i32
      %30 = arith.cmpi eq, %c3_i32, %c0_i32_14 : i32
      %c1_i32_15 = arith.constant 1 : i32
      %31 = arith.select %30, %c1_i32_15, %c3_i32 : i32
      %32 = arith.remsi %29, %31 : i32
      %c0_i32_16 = arith.constant 0 : i32
      %33 = arith.cmpi ne, %32, %c0_i32_16 : i32
      %c0_i32_17 = arith.constant 0 : i32
      %34 = arith.cmpi slt, %32, %c0_i32_17 : i32
      %c0_i32_18 = arith.constant 0 : i32
      %35 = arith.cmpi slt, %31, %c0_i32_18 : i32
      %36 = arith.xori %34, %35 : i1
      %37 = arith.andi %36, %33 : i1
      %38 = arith.addi %32, %31 : i32
      %39 = arith.select %37, %38, %32 : i32
      %40 = arith.index_cast %39 : i32 to index
      %c0 = arith.constant 0 : index
      %c0_19 = arith.constant 0 : index
      %41 = vector.load %arg13[%40, %c0, %c0_19] : memref<3x80x480xbf16, #tpu.memory_space<vmem>>, vector<1x80x480xbf16>
      %42 = vector.shape_cast %41 : vector<1x80x480xbf16> to vector<80x480xbf16>
      %43 = vector.extract_strided_slice %42 {offsets = [0, 0], sizes = [64, 480], strides = [1, 1]} : vector<80x480xbf16> to vector<64x480xbf16>
      %c3_i32_20 = arith.constant 3 : i32
      %44 = arith.muli %arg2, %c3_i32_20 : i32
      %c0_i32_21 = arith.constant 0 : i32
      %45 = arith.addi %44, %c0_i32_21 : i32
      %46 = arith.index_cast %45 : i32 to index
      %c0_22 = arith.constant 0 : index
      %c0_23 = arith.constant 0 : index
      %47 = vector.load %arg7[%46, %c0_22, %c0_23] : memref<9x480x352xbf16, #tpu.memory_space<vmem>>, vector<1x480x352xbf16>
      %48 = vector.shape_cast %47 : vector<1x480x352xbf16> to vector<480x352xbf16>
      %cst = arith.constant dense<0.000000e+00> : vector<64x352xf32>
      %49 = tpu.matmul %43, %48, %cst {dimension_numbers = #tpu.dot_dimension_numbers<[1], [0], [0], [1], [0, 0, 1, 1], [], []>} : vector<64x480xbf16>, vector<480x352xbf16>, vector<64x352xf32> -> vector<64x352xf32>
      %50 = vector.extract_strided_slice %42 {offsets = [8, 0], sizes = [64, 480], strides = [1, 1]} : vector<80x480xbf16> to vector<64x480xbf16>
      %c3_i32_24 = arith.constant 3 : i32
      %51 = arith.muli %arg2, %c3_i32_24 : i32
      %c1_i32_25 = arith.constant 1 : i32
      %52 = arith.addi %51, %c1_i32_25 : i32
      %53 = arith.index_cast %52 : i32 to index
      %c0_26 = arith.constant 0 : index
      %c0_27 = arith.constant 0 : index
      %54 = vector.load %arg7[%53, %c0_26, %c0_27] : memref<9x480x352xbf16, #tpu.memory_space<vmem>>, vector<1x480x352xbf16>
      %55 = vector.shape_cast %54 : vector<1x480x352xbf16> to vector<480x352xbf16>
      %cst_28 = arith.constant dense<0.000000e+00> : vector<64x352xf32>
      %56 = tpu.matmul %50, %55, %cst_28 {dimension_numbers = #tpu.dot_dimension_numbers<[1], [0], [0], [1], [0, 0, 1, 1], [], []>} : vector<64x480xbf16>, vector<480x352xbf16>, vector<64x352xf32> -> vector<64x352xf32>
      %57 = arith.addf %49, %56 : vector<64x352xf32>
      %58 = vector.extract_strided_slice %42 {offsets = [16, 0], sizes = [64, 480], strides = [1, 1]} : vector<80x480xbf16> to vector<64x480xbf16>
      %c3_i32_29 = arith.constant 3 : i32
      %59 = arith.muli %arg2, %c3_i32_29 : i32
      %c2_i32_30 = arith.constant 2 : i32
      %60 = arith.addi %59, %c2_i32_30 : i32
      %61 = arith.index_cast %60 : i32 to index
      %c0_31 = arith.constant 0 : index
      %c0_32 = arith.constant 0 : index
      %62 = vector.load %arg7[%61, %c0_31, %c0_32] : memref<9x480x352xbf16, #tpu.memory_space<vmem>>, vector<1x480x352xbf16>
      %63 = vector.shape_cast %62 : vector<1x480x352xbf16> to vector<480x352xbf16>
      %cst_33 = arith.constant dense<0.000000e+00> : vector<64x352xf32>
      %64 = tpu.matmul %58, %63, %cst_33 {dimension_numbers = #tpu.dot_dimension_numbers<[1], [0], [0], [1], [0, 0, 1, 1], [], []>} : vector<64x480xbf16>, vector<480x352xbf16>, vector<64x352xf32> -> vector<64x352xf32>
      %65 = arith.addf %57, %64 : vector<64x352xf32>
      %c0_34 = arith.constant 0 : index
      %c0_35 = arith.constant 0 : index
      %66 = vector.load %arg12[%c0_34, %c0_35] : memref<64x352xf32, #tpu.memory_space<vmem>>, vector<64x352xf32>
      %67 = arith.addf %66, %65 : vector<64x352xf32>
      %c0_36 = arith.constant 0 : index
      %c0_37 = arith.constant 0 : index
      %68 = vector.load %arg12[%c0_36, %c0_37] : memref<64x352xf32, #tpu.memory_space<vmem>>, vector<64x352xf32>
      tpu.vector_store %arg12[%c0_36, %c0_37], %67 {strides = array<i32>} : memref<64x352xf32, #tpu.memory_space<vmem>>, vector<64x352xf32>,
    } else {
    }
    %c2_i32_11 = arith.constant 2 : i32
    %25 = arith.cmpi eq, %arg2, %c2_i32_11 : i32
    %26 = arith.extui %25 : i1 to i32
    %c0_i32_12 = arith.constant 0 : i32
    %27 = arith.cmpi ne, %26, %c0_i32_12 : i32
    scf.if %27 {
      %c3_i32 = arith.constant 3 : i32
      %c0_i32_13 = arith.constant 0 : i32
      %28 = arith.cmpi eq, %c3_i32, %c0_i32_13 : i32
      %c1_i32_14 = arith.constant 1 : i32
      %29 = arith.select %28, %c1_i32_14, %c3_i32 : i32
      %30 = arith.remsi %arg1, %29 : i32
      %c0_i32_15 = arith.constant 0 : i32
      %31 = arith.cmpi ne, %30, %c0_i32_15 : i32
      %c0_i32_16 = arith.constant 0 : i32
      %32 = arith.cmpi slt, %30, %c0_i32_16 : i32
      %c0_i32_17 = arith.constant 0 : i32
      %33 = arith.cmpi slt, %29, %c0_i32_17 : i32
      %34 = arith.xori %32, %33 : i1
      %35 = arith.andi %34, %31 : i1
      %36 = arith.addi %30, %29 : i32
      %37 = arith.select %35, %36, %30 : i32
      %38 = arith.index_cast %37 : i32 to index
      %c0 = arith.constant 0 : index
      %c0_18 = arith.constant 0 : index
      %39 = vector.load %arg14[%38, %c0, %c0_18] : memref<3x64x128xbf16, #tpu.memory_space<vmem>>, vector<1x64x128xbf16>
      %40 = vector.shape_cast %39 : vector<1x64x128xbf16> to vector<64x128xbf16>
      %c0_19 = arith.constant 0 : index
      %c0_20 = arith.constant 0 : index
      %c0_21 = arith.constant 0 : index
      %c0_22 = arith.constant 0 : index
      %41 = vector.load %arg11[%c0_19, %c0_20, %c0_21, %c0_22] : memref<1x1x64x480xbf16, #tpu.memory_space<vmem>>, vector<1x1x64x128xbf16>
      %42 = vector.shape_cast %41 : vector<1x1x64x128xbf16> to vector<64x128xbf16>
      %43 = vector.shape_cast %40 : vector<64x128xbf16> to vector<1x1x64x128xbf16>
      tpu.vector_store %arg11[%c0_19, %c0_20, %c0_21, %c0_22], %43 {strides = array<i32>} : memref<1x1x64x480xbf16, #tpu.memory_space<vmem>>, vector<1x1x64x128xbf16>,
      %cst = arith.constant 0xFF80 : bf16
      %44 = vector.broadcast %cst : bf16 to vector<64x256xbf16>
      %c1_i32_23 = arith.constant 1 : i32
      %45 = arith.cmpi sge, %arg1, %c1_i32_23 : i32
      %c2_i32_24 = arith.constant 2 : i32
      %46 = arith.addi %arg1, %c2_i32_24 : i32
      %c3_i32_25 = arith.constant 3 : i32
      %c0_i32_26 = arith.constant 0 : i32
      %47 = arith.cmpi eq, %c3_i32_25, %c0_i32_26 : i32
      %c1_i32_27 = arith.constant 1 : i32
      %48 = arith.select %47, %c1_i32_27, %c3_i32_25 : i32
      %49 = arith.remsi %46, %48 : i32
      %c0_i32_28 = arith.constant 0 : i32
      %50 = arith.cmpi ne, %49, %c0_i32_28 : i32
      %c0_i32_29 = arith.constant 0 : i32
      %51 = arith.cmpi slt, %49, %c0_i32_29 : i32
      %c0_i32_30 = arith.constant 0 : i32
      %52 = arith.cmpi slt, %48, %c0_i32_30 : i32
      %53 = arith.xori %51, %52 : i1
      %54 = arith.andi %53, %50 : i1
      %55 = arith.addi %49, %48 : i32
      %56 = arith.select %54, %55, %49 : i32
      %57 = arith.index_cast %56 : i32 to index
      %c0_31 = arith.constant 0 : index
      %c0_32 = arith.constant 0 : index
      %58 = vector.load %arg15[%57, %c0_31, %c0_32] : memref<3x64x256xbf16, #tpu.memory_space<vmem>>, vector<1x64x256xbf16>
      %59 = vector.shape_cast %58 : vector<1x64x256xbf16> to vector<64x256xbf16>
      %60 = arith.select %45, %59, %44 : vector<64x256xbf16>
      %c1_i32_33 = arith.constant 1 : i32
      %61 = arith.addi %arg1, %c1_i32_33 : i32
      %c4_i32_34 = arith.constant 4 : i32
      %62 = arith.cmpi slt, %61, %c4_i32_34 : i32
      %c1_i32_35 = arith.constant 1 : i32
      %63 = arith.addi %arg1, %c1_i32_35 : i32
      %c3_i32_36 = arith.constant 3 : i32
      %c0_i32_37 = arith.constant 0 : i32
      %64 = arith.cmpi eq, %c3_i32_36, %c0_i32_37 : i32
      %c1_i32_38 = arith.constant 1 : i32
      %65 = arith.select %64, %c1_i32_38, %c3_i32_36 : i32
      %66 = arith.remsi %63, %65 : i32
      %c0_i32_39 = arith.constant 0 : i32
      %67 = arith.cmpi ne, %66, %c0_i32_39 : i32
      %c0_i32_40 = arith.constant 0 : i32
      %68 = arith.cmpi slt, %66, %c0_i32_40 : i32
      %c0_i32_41 = arith.constant 0 : i32
      %69 = arith.cmpi slt, %65, %c0_i32_41 : i32
      %70 = arith.xori %68, %69 : i1
      %71 = arith.andi %70, %67 : i1
      %72 = arith.addi %66, %65 : i32
      %73 = arith.select %71, %72, %66 : i32
      %74 = arith.index_cast %73 : i32 to index
      %c0_42 = arith.constant 0 : index
      %c0_43 = arith.constant 0 : index
      %75 = vector.load %arg15[%74, %c0_42, %c0_43] : memref<3x64x256xbf16, #tpu.memory_space<vmem>>, vector<1x64x256xbf16>
      %76 = vector.shape_cast %75 : vector<1x64x256xbf16> to vector<64x256xbf16>
      %77 = arith.select %62, %76, %44 : vector<64x256xbf16>
      %c3_i32_44 = arith.constant 3 : i32
      %c0_i32_45 = arith.constant 0 : i32
      %78 = arith.cmpi eq, %c3_i32_44, %c0_i32_45 : i32
      %c1_i32_46 = arith.constant 1 : i32
      %79 = arith.select %78, %c1_i32_46, %c3_i32_44 : i32
      %80 = arith.remsi %arg1, %79 : i32
      %c0_i32_47 = arith.constant 0 : i32
      %81 = arith.cmpi ne, %80, %c0_i32_47 : i32
      %c0_i32_48 = arith.constant 0 : i32
      %82 = arith.cmpi slt, %80, %c0_i32_48 : i32
      %c0_i32_49 = arith.constant 0 : i32
      %83 = arith.cmpi slt, %79, %c0_i32_49 : i32
      %84 = arith.xori %82, %83 : i1
      %85 = arith.andi %84, %81 : i1
      %86 = arith.addi %80, %79 : i32
      %87 = arith.select %85, %86, %80 : i32
      %88 = arith.index_cast %87 : i32 to index
      %c0_50 = arith.constant 0 : index
      %c0_51 = arith.constant 0 : index
      %89 = vector.load %arg15[%88, %c0_50, %c0_51] : memref<3x64x256xbf16, #tpu.memory_space<vmem>>, vector<1x64x256xbf16>
      %90 = vector.shape_cast %89 : vector<1x64x256xbf16> to vector<64x256xbf16>
      %91 = arith.maximumf %60, %90 : vector<64x256xbf16>
      %92 = arith.maximumf %91, %77 : vector<64x256xbf16>
      %c0_52 = arith.constant 0 : index
      %c0_53 = arith.constant 0 : index
      %93 = vector.load %arg8[%c0_52, %c0_53] : memref<256x64xbf16, #tpu.memory_space<vmem>>, vector<256x64xbf16>
      %cst_54 = arith.constant dense<0.000000e+00> : vector<64x64xf32>
      %94 = tpu.matmul %92, %93, %cst_54 {dimension_numbers = #tpu.dot_dimension_numbers<[1], [0], [0], [1], [0, 0, 1, 1], [], []>} : vector<64x256xbf16>, vector<256x64xbf16>, vector<64x64xf32> -> vector<64x64xf32>
      %c0_55 = arith.constant 0 : index
      %c288 = arith.constant 288 : index
      %95 = vector.load %arg12[%c0_55, %c288] : memref<64x352xf32, #tpu.memory_space<vmem>>, vector<64x64xf32>
      tpu.vector_store %arg12[%c0_55, %c288], %94 {strides = array<i32>} : memref<64x352xf32, #tpu.memory_space<vmem>>, vector<64x64xf32>,
      %c0_56 = arith.constant 0 : index
      %c0_57 = arith.constant 0 : index
      %96 = vector.load %arg12[%c0_56, %c0_57] : memref<64x352xf32, #tpu.memory_space<vmem>>, vector<64x352xf32>
      %c0_58 = arith.constant 0 : index
      %c0_59 = arith.constant 0 : index
      %97 = vector.load %arg9[%c0_58, %c0_59] : memref<1x352xf32, #tpu.memory_space<vmem>>, vector<1x352xf32>
      %98 = vector.broadcast %97 : vector<1x352xf32> to vector<64x352xf32>
      %99 = arith.mulf %96, %98 : vector<64x352xf32>
      %c0_60 = arith.constant 0 : index
      %c0_61 = arith.constant 0 : index
      %100 = vector.load %arg10[%c0_60, %c0_61] : memref<1x352xf32, #tpu.memory_space<vmem>>, vector<1x352xf32>
      %101 = vector.broadcast %100 : vector<1x352xf32> to vector<64x352xf32>
      %102 = arith.addf %99, %101 : vector<64x352xf32>
      %cst_62 = arith.constant 0.000000e+00 : f32
      %103 = vector.broadcast %cst_62 : f32 to vector<64x352xf32>
      %104 = arith.maximumf %102, %103 : vector<64x352xf32>
      %105 = arith.truncf %104 : vector<64x352xf32> to vector<64x352xbf16>
      %c0_63 = arith.constant 0 : index
      %c0_64 = arith.constant 0 : index
      %c0_65 = arith.constant 0 : index
      %c128 = arith.constant 128 : index
      %106 = vector.load %arg11[%c0_63, %c0_64, %c0_65, %c128] : memref<1x1x64x480xbf16, #tpu.memory_space<vmem>>, vector<1x1x64x352xbf16>
      %107 = vector.shape_cast %106 : vector<1x1x64x352xbf16> to vector<64x352xbf16>
      %108 = vector.shape_cast %105 : vector<64x352xbf16> to vector<1x1x64x352xbf16>
      tpu.vector_store %arg11[%c0_63, %c0_64, %c0_65, %c128], %108 {strides = array<i32>} : memref<1x1x64x480xbf16, #tpu.memory_space<vmem>>, vector<1x1x64x352xbf16>,
    } else {
    }
    return
  }
  func.func @transform_0(%arg0: i32, %arg1: i32, %arg2: i32) -> (i32, i32, i32, i32, i32) {
    %c1_i32 = arith.constant 1 : i32
    %0 = arith.addi %arg1, %c1_i32 : i32
    %c3_i32 = arith.constant 3 : i32
    %1 = arith.minsi %0, %c3_i32 : i32
    %c0_i32 = arith.constant 0 : i32
    %2 = arith.cmpi eq, %arg1, %c0_i32 : i32
    %c0_i32_0 = arith.constant 0 : i32
    %3 = arith.cmpi eq, %arg2, %c0_i32_0 : i32
    %4 = arith.andi %2, %3 : i1
    %c0_i32_1 = arith.constant 0 : i32
    %5 = arith.select %4, %c0_i32_1, %1 : i32
    %c0_i32_2 = arith.constant 0 : i32
    %c0_i32_3 = arith.constant 0 : i32
    %c0_i32_4 = arith.constant 0 : i32
    %c0_i32_5 = arith.constant 0 : i32
    return %arg0, %5, %c0_i32_2, %c0_i32_3, %c0_i32_4 : i32, i32, i32, i32, i32
  }
  func.func @transform_1(%arg0: i32, %arg1: i32, %arg2: i32) -> (i32, i32) {
    %c0_i32 = arith.constant 0 : i32
    %c0_i32_0 = arith.constant 0 : i32
    %c0_i32_1 = arith.constant 0 : i32
    return %c0_i32, %c0_i32_0 : i32, i32
  }
  func.func @transform_2(%arg0: i32, %arg1: i32, %arg2: i32) -> (i32, i32) {
    %c0_i32 = arith.constant 0 : i32
    %c0_i32_0 = arith.constant 0 : i32
    %c0_i32_1 = arith.constant 0 : i32
    return %c0_i32, %c0_i32_0 : i32, i32
  }
  func.func @transform_3(%arg0: i32, %arg1: i32, %arg2: i32) -> (i32, i32) {
    %c0_i32 = arith.constant 0 : i32
    %c0_i32_0 = arith.constant 0 : i32
    %c0_i32_1 = arith.constant 0 : i32
    return %c0_i32, %c0_i32_0 : i32, i32
  }
  func.func @transform_4(%arg0: i32, %arg1: i32, %arg2: i32) -> (i32, i32, i32) {
    %c0_i32 = arith.constant 0 : i32
    %c0_i32_0 = arith.constant 0 : i32
    %c0_i32_1 = arith.constant 0 : i32
    %c0_i32_2 = arith.constant 0 : i32
    return %c0_i32, %c0_i32_0, %c0_i32_1 : i32, i32, i32
  }
  func.func @transform_5(%arg0: i32, %arg1: i32, %arg2: i32) -> (i32, i32) {
    %c0_i32 = arith.constant 0 : i32
    %c0_i32_0 = arith.constant 0 : i32
    %c0_i32_1 = arith.constant 0 : i32
    return %c0_i32, %c0_i32_0 : i32, i32
  }
  func.func @transform_6(%arg0: i32, %arg1: i32, %arg2: i32) -> (i32, i32) {
    %c0_i32 = arith.constant 0 : i32
    %c0_i32_0 = arith.constant 0 : i32
    %c0_i32_1 = arith.constant 0 : i32
    return %c0_i32, %c0_i32_0 : i32, i32
  }
  func.func @transform_7(%arg0: i32, %arg1: i32, %arg2: i32) -> (i32, i32) {
    %c0_i32 = arith.constant 0 : i32
    %c0_i32_0 = arith.constant 0 : i32
    %c0_i32_1 = arith.constant 0 : i32
    return %c0_i32, %c0_i32_0 : i32, i32
  }
  func.func @transform_8(%arg0: i32, %arg1: i32, %arg2: i32) -> (i32, i32, i32, i32) {
    %c0_i32 = arith.constant 0 : i32
    %c0_i32_0 = arith.constant 0 : i32
    %c0_i32_1 = arith.constant 0 : i32
    return %arg0, %arg1, %c0_i32, %c0_i32_0 : i32, i32, i32, i32
  }
}

</mosaic_0001>

<bundles_post_ra>
// kernel: mixed_3c.1
= control target key start
LH: loop header
LB: loop body
LE: loop exit
PB: predicated region body
PF: predicated region fallthrough
CT: control target
= control target key end

     0   :  { %s9783_s0 = inlined_call_operand.vmem [shape: bf16[2,4,8,8,256], index: 0, kind: input, shape index: {}]   ;;  %s9784_s1 = inlined_call_operand.vmem [shape: bf16[256,288], index: 1, kind: input, shape index: {}]   ;;  %s9785_s2 = inlined_call_operand.vmem [shape: f32[1,288], index: 2, kind: input, shape index: {}]   ;;  %s9786_s3 = inlined_call_operand.vmem [shape: f32[1,288], index: 3, kind: input, shape index: {}]   ;;  %s9787_s4 = inlined_call_operand.vmem [shape: bf16[9,480,352], index: 4, kind: input, shape index: {}]   ;;  %s9788_s5 = inlined_call_operand.vmem [shape: bf16[256,64], index: 5, kind: input, shape index: {}]   ;;  %s9789_s6 = inlined_call_operand.vmem [shape: f32[1,352], index: 6, kind: input, shape index: {}]   ;;  %s9790_s7 = inlined_call_operand.vmem [shape: f32[1,352], index: 7, kind: input, shape index: {}]   ;;  %s9791_s8 = inlined_call_operand.hbm [shape: bf16[2,4,64,480], index: 8, kind: output, shape index: {}]  }
   0x1   :  { %9798 = sst [smem:[#allocation34_spill]] %s9783_s0 }
   0x2   :  { %9799 = sst [smem:[#allocation35_spill]] %s9784_s1 }
   0x3   :  { %9800 = sst [smem:[#allocation36_spill]] %s9785_s2 }
   0x4   :  { %13 = vsyncpa [#allocation9], 0 }
   0x5   :  { %15 = vsyncpa [#allocation9 + $0x1], 0  ;;  %s7627_s27 = smov 0   ;;  %s7629_s28 = smov 0  }
   0x6   :  { %s7631_s29 = smov 0   ;;  %s7633_s30 = smov 0  }
   0x7   :  { %s7635_s9 = smov 0   ;;  %s7637_s10 = smov 0  }
   0x8   :  { %s7639_s11 = smov 0   ;;  %s7641_s12 = smov 0  }
   0x9   :  { %s7643_s13 = smov 0   ;;  %s7645_s14 = smov 0  }
   0xa LB: > { %9801 = sst [smem:[#allocation11_spill]] %s7558_s11  ;;  %s5830_s15 = sadd.s32 4294967295, %s7570_s14   ;;  %s7570_s14 = sphi %s7645_s14, %s21_s14   ;;  %s7566_s13 = sphi %s7643_s13, %s9885_s13   ;;  %s7562_s12 = sphi %s7641_s12, %s9884_s12   ;;  %s7558_s11 = sphi %s7639_s11, %s9883_s11   ;;  %s7554_s10 = sphi %s7637_s10, %s9882_s10   ;;  %s7550_s9 = sphi %s7635_s9, %s9881_s9   ;;  %s7546_s30 = sphi %s7633_s30, %s9880_s30   ;;  %s7542_s29 = sphi %s7631_s29, %s9888_s29   ;;  %s7538_s28 = sphi %s7629_s28, %s9887_s28   ;;  %s7534_s27 = sphi %s7627_s27, %s9886_s27  }
   0xb   : > { %9802 = sst [smem:[#allocation12_spill]] %s7562_s12  ;;  %s5831_s16 = sadd.s32 4294967294, %s7570_s14  }
   0xc   : > { %9803 = sst [smem:[#allocation13_spill]] %s7566_s13  ;;  %s33_s17 = sadd.s32 1, %s7558_s11 }
   0xd   : > { %p34_p0 = scmp.ge.s32.totalorder %s33_s17, 3  ;;  %s36_s18 = sadd.s32 1, %s7562_s12 }
   0xe   : > { %s40_s19 = sadd.s32 1, %s7566_s13  ;;  %p250_p1 = scmp.ne.s32.totalorder %s7542_s29, %s7538_s28 }
   0xf   : > { %s9890_s17 = smov (%p34_p0, %s33_s17), 0  ;;  %s9892_s18 = smov (!%p34_p0, %s36_s18), %s7562_s12 }
  0x10   : > { %9804 = sst [smem:[#allocation14_spill]] %s9890_s17  ;;  %p251_p2 = scmp.eq.s32.totalorder %s5830_s15, 23 }
  0x11   : > { %p256_p3 = scmp.ne.s32.totalorder %s7538_s28, %s7534_s27  ;;  %p38_p4 = scmp.ge.s32.totalorder %s9892_s18, 4 }
  0x12   : > { %p257_p5 = scmp.eq.s32.totalorder %s5831_s16, 23  ;;  %p7689_p6 = por %p251_p2, %p250_p1 }
  0x13   : > { %s9894_s18 = smov (%p38_p4, %s9892_s18), 0  ;;  %s9896_s19 = smov (!%p38_p4, %s40_s19), %s7566_s13 }
  0x14   : > { %9806 = sst [smem:[#allocation15_spill]] %s9894_s18  ;;  %p7696_p7 = por %p257_p5, %p256_p3 }
  0x15   : > { %p5836_p8 = scmp.ge.s32.totalorder %s7570_s14, 1  ;;  %p42_p9 = scmp.ge.s32.totalorder %s9896_s19, 2 }
  0x16   : > { %p324_p10 = scmp.lt.s32.totalorder %s7570_s14, 25  ;;  %s236_s22 = ssub.s32 %s7562_s12, %s9894_s18 }
  0x17   : > { %s9898_s19 = smov (%p42_p9, %s9896_s19), 0  ;;  %s240_s25 = sadd.s32 1, %s7542_s29 }
  0x18   : > { %9808 = sst [smem:[#allocation16_spill]] %s9898_s19  ;;  %p325_p11 = pnand %p5836_p8, %p324_p10 }
  0x19   : > { %s235_s23 = ssub.s32 %s7566_s13, %s9898_s19  ;;  %s9793_s15 = sand.u32 (!%p325_p11), 1, %s7538_s28  }
  0x1a   : > { %s237_s24 = sor.u32 %s236_s22, %s235_s23  ;;  %s7714_s16 = sadd.s32 (!%p325_p11), 1, %s7550_s9 }
  0x1b   : > { %p238_p12 = scmp.eq.s32.totalorder %s237_s24, 0  ;;  %328 = sbr.rel (%p325_p11) target bundleno = 1525 (0x5f5), region = 52 }
  0x1c   : > { %s5837_s22 = sshll.u32 (!%p325_p11), %s9793_s15, 7  ;;  %p371_p13 = scmp.lt.s32.totalorder (!%p325_p11), %s7714_s16, 3 }
  0x1d   : > { %s7710_s26 = scalar_select %p238_p12, %s7542_s29, %s240_s25  }
  0x1e   : > { %p373_p0 = scmp.eq.s32.totalorder (!%p325_p11), %s7550_s9, 0  ;;  %p374_p1 = scmp.eq.s32.totalorder (!%p325_p11), %s7546_s30, 0 }
  0x1f   : > { %9809 = sst [smem:[#allocation17_spill]] %s7710_s26  ;;  %p378_p2 = scmp.lt.s32.totalorder (!%p325_p11), %s7554_s10, 1 }
  0x20   : > { %s372_s23 = scalar_select %p371_p13, %s7714_s16, 3 }
  0x21   : > { %p7725_p3 = pnand %p374_p1, %p373_p0  ;;  %s9811_s0 = sld [smem:[#allocation34_spill]] }
  0x22   : > { %s379_s25 = scalar_select %p378_p2, %s7554_s10, 1 }
  0x23   : > { %s9900_s23 = smov (!%p7725_p3, %s372_s23), 0  ;;  %p400_p4 = pneg %p7725_p3 }
  0x24   : > { %p380_p5 = scmp.lt.s32.totalorder %s9900_s23, 3  ;;  %s5840_s19 = sshll.u32 %s379_s25, 6 }
  0x25   : > { %s7739_s26 = scalar_lea.vmem [#allocation8], %s5837_s22 }
  0x26   : > { %s9902_s23 = smov (!%p380_p5, %s9900_s23), 3  ;;  %402 = sbr.rel (%p7725_p3) target bundleno = 66 (0x42), region = 56 }
  0x27   : > { %s5839_s15 = sshll.u32 %s9902_s23, 4 }
  0x28   : > { %s384_s18 = sadd.s32 %s5840_s19, %s5839_s15 }
  0x29   : > { %s5841_s17 = sshll.u32 %s384_s18, 2 }
  0x2a   : > { %s7737_s11 = scalar_lea.vmem %s9811_s0, %s5841_s17 }
  0x2b   : > { %vm403_vm0 = vcmask 1043456   ;;  %vm404_vm1 = vcmask 261124   ;;  %vm407_vm2 = vcmask 1040384   ;;  %vm408_vm4 = vcmask 258052  }
  0x2c   : > { %vm405_vm3 = vmor %vm404_vm1, %vm403_vm0  ;;  %v7572_v0 = vmov 0   ;;  %v7573_v2 = vmov 4286644096  }
  0x2d   : > { %406 = vst.msk [vmem:[#allocation6] sm:$0xff] %vm405_vm3, %v7572_v0  ;;  %411 = vst.msk [vmem:[#allocation6 + $0x10] sm:$0xff] %vm405_vm3, %v7572_v0 }
  0x2e   : > { %413 = vst.msk [vmem:[#allocation6 + $0x20] sm:$0xff] %vm405_vm3, %v7572_v0  ;;  %415 = vst.msk [vmem:[#allocation6 + $0x30] sm:$0xff] %vm405_vm3, %v7572_v0 }
  0x2f   : > { %417 = vst.msk [vmem:[#allocation6 + $0x40] sm:$0xff] %vm405_vm3, %v7572_v0  ;;  %419 = vst.msk [vmem:[#allocation6 + $0x50] sm:$0xff] %vm405_vm3, %v7572_v0 }
  0x30   : > { %421 = vst.msk [vmem:[#allocation6 + $0x60] sm:$0xff] %vm405_vm3, %v7572_v0  ;;  %423 = vst.msk [vmem:[#allocation6 + $0x70] sm:$0xff] %vm405_vm3, %v7572_v0 }
  0x31   : > { %425 = vst.msk [vmem:[#allocation6 + $0x80] sm:$0xff] %vm405_vm3, %v7572_v0  ;;  %427 = vst.msk [vmem:[#allocation6 + $0x90] sm:$0xff] %vm405_vm3, %v7572_v0 }
  0x32   : > { %vm7743_vm5 = vmor %vm408_vm4, %vm407_vm2  ;;  %429 = vst [vmem:[#allocation7] sm:$0xff] %v7573_v2 }
  0x33   : > { %430 = vst [vmem:[#allocation7 + $0x38] sm:$0x11] %v7573_v2  ;;  %431 = vst [vmem:[#allocation7 + $0x50] sm:$0xff] %v7573_v2 }
  0x34   : > { %432 = vst [vmem:[#allocation7 + $0x18] sm:$0x11] %v7573_v2  ;;  %433 = vst [vmem:[#allocation7 + $0x30] sm:$0xff] %v7573_v2 }
  0x35   : > { %434 = vst [vmem:[#allocation7 + $0x68] sm:$0x11] %v7573_v2  ;;  %435 = vst [vmem:[#allocation7 + $0x78] sm:$0xff] %v7573_v2 }
  0x36   : > { %436 = vst [vmem:[#allocation7 + $0x80] sm:$0x11] %v7573_v2  ;;  %437 = vst [vmem:[#allocation7 + $0x8] sm:$0xff] %v7573_v2 }
  0x37   : > { %438 = vst [vmem:[#allocation7 + $0x88] sm:$0x11] %v7573_v2  ;;  %439 = vst [vmem:[#allocation7 + $0x28] sm:$0xff] %v7573_v2 }
  0x38   : > { %440 = vst [vmem:[#allocation7 + $0x40] sm:$0x11] %v7573_v2  ;;  %441 = vst [vmem:[#allocation7 + $0x58] sm:$0xff] %v7573_v2 }
  0x39   : > { %442 = vst [vmem:[#allocation7 + $0x10] sm:$0x11] %v7573_v2  ;;  %443 = vst [vmem:[#allocation7 + $0x98] sm:$0xff] %v7573_v2 }
  0x3a   : > { %444 = vst [vmem:[#allocation7 + $0x60] sm:$0x11] %v7573_v2  ;;  %445 = vst [vmem:[#allocation7 + $0x20] sm:$0xff] %v7573_v2 }
  0x3b   : > { %446 = vst [vmem:[#allocation7 + $0x48] sm:$0x11] %v7573_v2  ;;  %447 = vst [vmem:[#allocation7 + $0x70] sm:$0xff] %v7573_v2 }
  0x3c   : > { %448 = vst [vmem:[#allocation7 + $0x90] sm:$0x11] %v7573_v2  ;;  %410 = vst.msk [vmem:[#allocation6 + $0x8] sm:$0x11] %vm7743_vm5, %v7572_v0 }
  0x3d   : > { %412 = vst.msk [vmem:[#allocation6 + $0x18] sm:$0x11] %vm7743_vm5, %v7572_v0  ;;  %414 = vst.msk [vmem:[#allocation6 + $0x28] sm:$0x11] %vm7743_vm5, %v7572_v0 }
  0x3e   : > { %416 = vst.msk [vmem:[#allocation6 + $0x38] sm:$0x11] %vm7743_vm5, %v7572_v0  ;;  %418 = vst.msk [vmem:[#allocation6 + $0x48] sm:$0x11] %vm7743_vm5, %v7572_v0 }
  0x3f   : > { %420 = vst.msk [vmem:[#allocation6 + $0x58] sm:$0x11] %vm7743_vm5, %v7572_v0  ;;  %422 = vst.msk [vmem:[#allocation6 + $0x68] sm:$0x11] %vm7743_vm5, %v7572_v0 }
  0x40   : > { %424 = vst.msk [vmem:[#allocation6 + $0x78] sm:$0x11] %vm7743_vm5, %v7572_v0  ;;  %426 = vst.msk [vmem:[#allocation6 + $0x88] sm:$0x11] %vm7743_vm5, %v7572_v0 }
  0x41   : > { %428 = vst.msk [vmem:[#allocation6 + $0x98] sm:$0x11] %vm7743_vm5, %v7572_v0 }
  0x42 PF: > { %p5842_p8 = scmp.ne.s32.totalorder %s7546_s30, 0 }
  0x44   : > { %451 = sbr.rel (%p5842_p8) target bundleno = 86 (0x56), region = 60 }
  0x49   : > { %vm454_vm6 = vcmask 785408   ;;  %v7574_v3 = vmov 0.0  }
  0x4a   : > { %452 = vst [vmem:[#allocation2] sm:$0xff] %v7574_v3  ;;  %453 = vst [vmem:[#allocation2 + $0x8] sm:$0xff] %v7574_v3 }
  0x4b   : > { %456 = vst [vmem:[#allocation2 + $0x18] sm:$0xff] %v7574_v3  ;;  %457 = vst [vmem:[#allocation2 + $0x20] sm:$0xff] %v7574_v3 }
  0x4c   : > { %459 = vst [vmem:[#allocation2 + $0x30] sm:$0xff] %v7574_v3  ;;  %460 = vst [vmem:[#allocation2 + $0x38] sm:$0xff] %v7574_v3 }
  0x4d   : > { %462 = vst [vmem:[#allocation2 + $0x48] sm:$0xff] %v7574_v3  ;;  %463 = vst [vmem:[#allocation2 + $0x50] sm:$0xff] %v7574_v3 }
  0x4e   : > { %465 = vst [vmem:[#allocation2 + $0x60] sm:$0xff] %v7574_v3  ;;  %466 = vst [vmem:[#allocation2 + $0x68] sm:$0xff] %v7574_v3 }
  0x4f   : > { %468 = vst [vmem:[#allocation2 + $0x78] sm:$0xff] %v7574_v3  ;;  %469 = vst [vmem:[#allocation2 + $0x80] sm:$0xff] %v7574_v3 }
  0x50   : > { %471 = vst [vmem:[#allocation2 + $0x90] sm:$0xff] %v7574_v3  ;;  %472 = vst [vmem:[#allocation2 + $0x98] sm:$0xff] %v7574_v3 }
  0x51   : > { %474 = vst [vmem:[#allocation2 + $0xa8] sm:$0xff] %v7574_v3  ;;  %475 = vst [vmem:[#allocation2 + $0xb0] sm:$0xff] %v7574_v3 }
  0x52   : > { %455 = vst.msk [vmem:[#allocation2 + $0x10] sm:$0xff] %vm454_vm6, %v7574_v3  ;;  %458 = vst.msk [vmem:[#allocation2 + $0x28] sm:$0xff] %vm454_vm6, %v7574_v3 }
  0x53   : > { %461 = vst.msk [vmem:[#allocation2 + $0x40] sm:$0xff] %vm454_vm6, %v7574_v3  ;;  %464 = vst.msk [vmem:[#allocation2 + $0x58] sm:$0xff] %vm454_vm6, %v7574_v3 }
  0x54   : > { %467 = vst.msk [vmem:[#allocation2 + $0x70] sm:$0xff] %vm454_vm6, %v7574_v3  ;;  %470 = vst.msk [vmem:[#allocation2 + $0x88] sm:$0xff] %vm454_vm6, %v7574_v3 }
  0x55   : > { %473 = vst.msk [vmem:[#allocation2 + $0xa0] sm:$0xff] %vm454_vm6, %v7574_v3  ;;  %476 = vst.msk [vmem:[#allocation2 + $0xb8] sm:$0xff] %vm454_vm6, %v7574_v3 }
  0x56 PF: > { %p477_p9 = scmp.eq.s32.totalorder %s7546_s30, 2  ;;  %p479_p10 = scmp.lt.s32.totalorder %s7714_s16, 4 }
  0x58   : > { %p480_p11 = pnand %p479_p10, %p477_p9 }
  0x5a   : > { %p481_p12 = pneg %p480_p11 }
  0x5c   : > { %p482_p13 = por %p481_p12, %p400_p4 }
  0x5d   : > { %s9814_s1 = sld [smem:[#allocation35_spill]] (%p482_p13)  ;;  %vm1276_vm7 = vcmask (%p482_p13), 1043456   ;;  %vm1286_vm8 = vcmask (%p482_p13), 1040384   ;;  %vm1277_vm9 = vsmask.f32 (%p482_p13), 7938  ;;  %v500_v39 = vld [vmem:[%s7737_s11] sm:$0xff] (%p482_p13) }
  0x5e   : > { %485 = sbr.rel (!%p482_p13) target bundleno = 548 (0x224), region = 64  ;;  %vm1280_vm10 = vsmask.f32 (%p482_p13), 7954  ;;  %vm1287_vm11 = vsmask.f32 (%p482_p13), 256  ;;  %vm1789_vm12 = vcmask (%p482_p13), 1047556   ;;  %vm7895_vm13 = vmand (%p482_p13), %vm1276_vm7, %vm1277_vm9 }
  0x5f   : > { %v501_v41 = vld [vmem:[%s7737_s11 + $0x8] sm:$0xff] (%p482_p13)  ;;  %v1709_v43 = vshrl.u32 (%p482_p13), %v500_v39, 16  ;;  %v1712_v44 = vshll.u32 (%p482_p13), %v500_v39, 16  ;;  %vm7904_vm14 = vmand (%p482_p13), %vm1286_vm8, %vm1287_vm11  ;;  %v1792_v50 = vld [vmem:[#allocation7 + $0x50] sm:$0xff] (%p482_p13)  ;;  %vm1795_vm15 = vcmask (%p482_p13), 1044484   ;;  %s487_s15 = ssub.s32 (%p482_p13), 0, %s7714_s16 }
  0x60   : > { %v5847_v46 = vcombine.high (%p482_p13), %v500_v39, %v501_v41  ;;  %v1717_v48 = vshrl.u32 (%p482_p13), %v501_v41, 16  ;;  %v1720_v49 = vshll.u32 (%p482_p13), %v501_v41, 16  ;;  %vm1790_vm0 = vmand (%p482_p13), %vm1789_vm12, %vm1280_vm10  ;;  %v1798_v53 = vld [vmem:[#allocation7 + $0x18] sm:$0x11] (%p482_p13)  ;;  %vm1290_vm1 = vsmask.f32 (%p482_p13), 4352  ;;  %s5843_s22 = smin.u32 (%p482_p13), %s487_s15, %s7714_s16 }
  0x61   : > { %v1711_v52 = vrot.slane (%p482_p13), %v1709_v43, 7  ;;  %vm7915_vm2 = vmor (%p482_p13), %vm1790_vm0, %vm7895_vm13  ;;  %v1801_v56 = vld [vmem:[#allocation7 + $0x30] sm:$0xff] (%p482_p13)  ;;  %v1804_v59 = vld [vmem:[#allocation7 + $0x68] sm:$0x11] (%p482_p13)  ;;  %v7930_v0 = vcombine.low (%p482_p13), %v500_v39, %v501_v41  ;;  %7037 = sdivrem.u32 (%p482_p13), %s5843_s22, 3  ;;  %p486_p0 = scmp.lt.s32.totalorder (%p482_p13), %s7714_s16, 0 }
  0x62   : > { %973 = vmatprep.mubr.bf16.mxu1 (%p482_p13), %v5847_v46  ;;  %v1719_v54 = vrot.slane (%p482_p13), %v1717_v48, 7  ;;  %vm1796_vm3 = vmand (%p482_p13), %vm1795_vm15, %vm1290_vm1  ;;  %900 = vmatprep.mubr.bf16.mxu0 (%p482_p13), %v5847_v46  ;;  %v502_v3 = vld [vmem:[%s7737_s11 + $0x10] sm:$0xff] (%p482_p13)  ;;  %v1825_v43 = vld [vmem:[#allocation7 + $0x58] sm:$0xff] (%p482_p13)  ;;  %vm1279_vm5 = vcmask (%p482_p13), 261124   ;;  %vm1375_vm8 = vsmask.f32 (%p482_p13), 7440 }
  0x63   : > { %v6965_v4 = vld [vmem:[%s9814_s1 + $0xac] ss:$12 sps:$4 sm:$0xff]   ;;  %v6967_v5 = vld [vmem:[%s9814_s1 + $0xa8] ss:$12 sps:$4 sm:$0xff]   ;;  %v6970_v7 = vld [vmem:[%s9814_s1 + $0x90] ss:$12 sps:$4 sm:$0xff]   ;;  %v1714_v57 = vor.u32 %v1712_v44, %v1711_v52 }
  0x64   : > { %868 = vmatprep.subr.bf16.mxu0 %v6965_v4  ;;  %v6968_v6 = vld [vmem:[%s9814_s1 + $0x94] ss:$12 sps:$4 sm:$0xff]   ;;  %v6971_v8 = vld [vmem:[%s9814_s1 + $0x7c] ss:$12 sps:$4 sm:$0xff]   ;;  %v6973_v9 = vld [vmem:[%s9814_s1 + $0x78] ss:$12 sps:$4 sm:$0xff]   ;;  %v1722_v61 = vor.u32 %v1720_v49, %v1719_v54 }
  0x65   : > { %869 = vmatpush1.bf16.msra.mxu0 %v6967_v5  ;;  %v6974_v10 = vld [vmem:[%s9814_s1 + $0x64] ss:$12 sps:$4 sm:$0xff]   ;;  %v6976_v12 = vld [vmem:[%s9814_s1 + $0x60] ss:$12 sps:$4 sm:$0xff]   ;;  %v6979_v17 = vld [vmem:[%s9814_s1 + $0x48] ss:$12 sps:$4 sm:$0xff]   ;;  %v7934_v1 = vsel %vm7915_vm2, %v1714_v57, %v1792_v50 }
  0x66   : > { %870 = vmatprep.subr.bf16.mxu0 %v6968_v6  ;;  %v6985_v11 = vld [vmem:[%s9814_s1 + $0x170] ss:$12 sps:$4 sm:$0xff]   ;;  %v6977_v14 = vld [vmem:[%s9814_s1 + $0x4c] ss:$12 sps:$4 sm:$0xff]   ;;  %v6980_v18 = vld [vmem:[%s9814_s1 + $0x34] ss:$12 sps:$4 sm:$0xff]   ;;  %v7943_v5 = vsel %vm7915_vm2, %v1722_v61, %v1801_v56 }
  0x67   : > { %6650 = vmatprep.subr.bf16.mxu1 %v6985_v11  ;;  %v6987_v13 = vld [vmem:[%s9814_s1 + $0xb0] ss:$12 sps:$4 sm:$0xff]   ;;  %v6990_v15 = vld [vmem:[%s9814_s1 + $0x158] ss:$12 sps:$4 sm:$0xff]   ;;  %v6995_v19 = vld [vmem:[%s9814_s1 + $0x140] ss:$12 sps:$4 sm:$0xff]  }
  0x68   : > { %6651 = vmatpush3.bf16.msra.mxu1 %v6987_v13  ;;  %v6992_v16 = vld [vmem:[%s9814_s1 + $0x98] ss:$12 sps:$4 sm:$0xff]   ;;  %v6997_v20 = vld [vmem:[%s9814_s1 + $0x80] ss:$12 sps:$4 sm:$0xff]   ;;  %v6982_v21 = vld [vmem:[%s9814_s1 + $0x30] ss:$12 sps:$4 sm:$0xff]  }
  0x69   : > { %871 = vmatpush1.bf16.msra.mxu0 %v6970_v7  ;;  %6652 = vmatprep.subr.bf16.mxu1 %v6990_v15  ;;  %v7000_v22 = vld [vmem:[%s9814_s1 + $0x128] ss:$12 sps:$4 sm:$0xff]   ;;  %v6986_v25 = vld [vmem:[%s9814_s1 + $0x18] ss:$12 sps:$4 sm:$0xff]   ;;  %v7005_v26 = vld [vmem:[%s9814_s1 + $0x110] ss:$12 sps:$4 sm:$0xff]  }
  0x6a   : > { %872 = vmatprep.subr.bf16.mxu0 %v6971_v8  ;;  %v6983_v23 = vld [vmem:[%s9814_s1 + $0x1c] ss:$12 sps:$4 sm:$0xff]   ;;  %v6988_v27 = vld [vmem:[%s9814_s1 + $0x4] ss:$12 sps:$4 sm:$0xff]   ;;  %v6991_v30 = vld [vmem:[%s9814_s1] ss:$12 sps:$4 sm:$0xff]   ;;  %s7038_s23 = spop.drf %7037 }
  0x6b   : > { %v7002_v24 = vld [vmem:[%s9814_s1 + $0x68] ss:$12 sps:$4 sm:$0xff]   ;;  %v7007_v28 = vld [vmem:[%s9814_s1 + $0x50] ss:$12 sps:$4 sm:$0xff]   ;;  %v7010_v29 = vld [vmem:[%s9814_s1 + $0xf8] ss:$12 sps:$4 sm:$0xff]  }
  0x6c   : > { %6653 = vmatpush3.bf16.msra.mxu1 %v6992_v16  ;;  %v6993_v31 = vld [vmem:[%s9814_s1 + $0x16c] ss:$12 sps:$4 sm:$0xff]   ;;  %v6996_v34 = vld [vmem:[%s9814_s1 + $0x168] ss:$12 sps:$4 sm:$0xff]   ;;  %v7001_v36 = vld [vmem:[%s9814_s1 + $0x150] ss:$12 sps:$4 sm:$0xff]  }
  0x6d   : > { %873 = vmatpush1.bf16.msra.mxu0 %v6973_v9  ;;  %6654 = vmatprep.subr.bf16.mxu1 %v6995_v19  ;;  %v7012_v32 = vld [vmem:[%s9814_s1 + $0x38] ss:$12 sps:$4 sm:$0xff]   ;;  %v7015_v33 = vld [vmem:[%s9814_s1 + $0xe0] ss:$12 sps:$4 sm:$0xff]   ;;  %v7020_v38 = vld [vmem:[%s9814_s1 + $0xc8] ss:$12 sps:$4 sm:$0xff]  }
  0x6e   : > { %874 = vmatprep.subr.bf16.mxu0 %v6974_v10  ;;  %v6998_v35 = vld [vmem:[%s9814_s1 + $0x154] ss:$12 sps:$4 sm:$0xff]   ;;  %v7003_v40 = vld [vmem:[%s9814_s1 + $0x13c] ss:$12 sps:$4 sm:$0xff]   ;;  %v7006_v51 = vld [vmem:[%s9814_s1 + $0x138] ss:$12 sps:$4 sm:$0xff]  }
  0x6f   : > { %v7017_v37 = vld [vmem:[%s9814_s1 + $0x20] ss:$12 sps:$4 sm:$0xff]   ;;  %v7022_v45 = vld [vmem:[%s9814_s1 + $0x8] ss:$12 sps:$4 sm:$0xff]   ;;  %v1715_v58 = vrot.slane %v1711_v52, 4  ;;  %v1723_v62 = vrot.slane %v1719_v54, 4  ;;  %vm7926_vm4 = vmor %vm1796_vm3, %vm7904_vm14 }
  0x70   : > { %6655 = vmatpush3.bf16.msra.mxu1 %v6997_v20  ;;  %v7008_v60 = vld [vmem:[%s9814_s1 + $0x124] ss:$12 sps:$4 sm:$0xff]   ;;  %v503_v4 = vld [vmem:[%s7737_s11 + $0x18] sm:$0xff]  ;;  %1794 = vst [vmem:[#allocation7 + $0x50] sm:$0xff] %v7934_v1  ;;  %v1725_v8 = vshrl.u32 %v502_v3, 16  ;;  %1803 = vst [vmem:[#allocation7 + $0x30] sm:$0xff] %v7943_v5 }
  0x71   : > { %875 = vmatpush1.bf16.msra.mxu0 %v6976_v12  ;;  %6656 = vmatprep.subr.bf16.mxu1 %v7000_v22  ;;  %v1799_v2 = vsel %vm7926_vm4, %v1715_v58, %v1798_v53  ;;  %v1805_v6 = vsel %vm7926_vm4, %v1723_v62, %v1804_v59  ;;  %v7947_v7 = vcombine.high %v502_v3, %v503_v4  ;;  %v7011_v9 = vld [vmem:[%s9814_s1 + $0x120] ss:$12 sps:$4 sm:$0xff]   ;;  %v1728_v10 = vshll.u32 %v502_v3, 16  ;;  %v7016_v19 = vld [vmem:[%s9814_s1 + $0x108] ss:$12 sps:$4 sm:$0xff]   ;;  %v507_v53 = vld [vmem:[%s7737_s11 + $0x38] sm:$0xff] }
  0x72   : > { %876 = vmatprep.subr.bf16.mxu0 %v6977_v14  ;;  %1800 = vst [vmem:[#allocation7 + $0x18] sm:$0x11] %v1799_v2  ;;  %1806 = vst [vmem:[#allocation7 + $0x68] sm:$0x11] %v1805_v6  ;;  %v1733_v11 = vshrl.u32 %v503_v4, 16  ;;  %v1736_v12 = vshll.u32 %v503_v4, 16 }
  0x73   : > { %v7954_v13 = vld [vmem:[%s7737_s11 + $0x20] sm:$0xff]  ;;  %v7013_v14 = vld [vmem:[%s9814_s1 + $0x10c] ss:$12 sps:$4 sm:$0xff]   ;;  %v1727_v15 = vrot.slane %v1725_v8, 7  ;;  %v1828_v44 = vld [vmem:[#allocation7 + $0x10] sm:$0x11] }
  0x74   : > { %6657 = vmatpush3.bf16.msra.mxu1 %v7002_v24  ;;  %v7961_v16 = vld [vmem:[%s7737_s11 + $0x28] sm:$0xff]  ;;  %v1735_v20 = vrot.slane %v1733_v11, 7  ;;  %v1810_v22 = vld [vmem:[#allocation7 + $0x80] sm:$0x11]  ;;  %v506_v50 = vld [vmem:[%s7737_s11 + $0x30] sm:$0xff]  ;;  %v1768_v61 = vshll.u32 %v507_v53, 16 }
  0x75   : > { %877 = vmatpush1.bf16.msra.mxu0 %v6979_v17  ;;  %6658 = vmatprep.subr.bf16.mxu1 %v7005_v26  ;;  %v1741_v17 = vshrl.u32 %v7954_v13, 16  ;;  %v1752_v24 = vshll.u32 %v7961_v16, 16  ;;  %v1731_v26 = vrot.slane %v1727_v15, 4  ;;  %v1757_v54 = vshrl.u32 %v506_v50, 16  ;;  %v7021_v57 = vld [vmem:[%s9814_s1 + $0xf0] ss:$12 sps:$4 sm:$0xff]   ;;  %vm8059_vm6 = vmor %vm1279_vm5, %vm1276_vm7 }
  0x76   : > { %878 = vmatprep.subr.bf16.mxu0 %v6980_v18  ;;  %v1744_v18 = vshll.u32 %v7954_v13, 16  ;;  %v1760_v56 = vshll.u32 %v506_v50, 16  ;;  %v7024_v62 = vld [vmem:[%s9814_s1 + $0xdc] ss:$12 sps:$4 sm:$0xff]   ;;  %v1834_v6 = vld [vmem:[#allocation7 + $0x60] sm:$0x11]  ;;  %v5852_v55 = vcombine.low %v506_v50, %v507_v53 }
  0x77   : > { %v1811_v39 = vsel %vm7926_vm4, %v1731_v26, %v1810_v22  ;;  %v1759_v2 = vrot.slane %v1757_v54, 7  ;;  %v1840_v11 = vld [vmem:[#allocation7 + $0x48] sm:$0x11]  ;;  %s491_s11 = ssub.s32 0, %s7038_s23  ;;  %v8055_v63 = vld [vmem:[#allocation6 + $0x90] sm:$0xff]  ;;  %vm1601_vm11 = vcmask 1042432  }
  0x78   : > { %6659 = vmatpush3.bf16.msra.mxu1 %v7007_v28  ;;  %v1816_v28 = vld [vmem:[#allocation7 + $0x88] sm:$0x11]  ;;  %1812 = vst [vmem:[#allocation7 + $0x80] sm:$0x11] %v1811_v39  ;;  %s9904_s11 = smov (!%p486_p0, %s491_s11), %s7038_s23  ;;  %vm1374_vm7 = vsmask.f32 3328 }
  0x79   : > { %879 = vmatpush1.bf16.msra.mxu0 %v6982_v21  ;;  %6660 = vmatprep.subr.bf16.mxu1 %v7010_v29  ;;  %v1807_v21 = vld [vmem:[#allocation7 + $0x78] sm:$0xff]  ;;  %v7971_v29 = vcombine.low %v502_v3, %v503_v4  ;;  %v1762_v8 = vor.u32 %v1760_v56, %v1759_v2  ;;  %p5845_p2 = scmp.lt.s32.totalorder %s9904_s11, 0  ;;  %s497_s24 = sadd.s32 3, %s9904_s11  ;;  %vm8112_vm9 = vmor %vm1374_vm7, %vm1375_vm8  ;;  %vm1602_vm12 = vcmask 1046532   ;;  %vm1289_vm0 = vcmask 258052  }
  0x7a   : > { %880 = vmatprep.subr.bf16.mxu0 %v6983_v23  ;;  %v1749_v23 = vshrl.u32 %v7961_v16, 16  ;;  %v1831_v4 = vld [vmem:[#allocation7 + $0x98] sm:$0xff]  ;;  %vm8183_vm15 = vmor %vm1601_vm11, %vm1602_vm12  ;;  %s7575_s18 = smov 64   ;;  %s7576_s19 = smov 32   ;;  %vm1696_vm7 = vcmask 785412  }
  0x7b   : > { %s9906_s24 = smov (!%p5845_p2, %s497_s24), %s9904_s11  ;;  %s9829_s2 = sld [smem:[#allocation36_spill]]  ;;  %vm8311_vm3 = vmand %vm1289_vm0, %vm1290_vm1 }
  0x7c   : > { %6661 = vmatpush3.bf16.msra.mxu1 %v7012_v32  ;;  %v1739_v32 = vrot.slane %v1735_v20, 4  ;;  %s9908_s24 = smov (%p374_p1, %s9906_s24), 0  ;;  %vm8338_vm1 = vmor %vm8311_vm3, %vm7904_vm14  ;;  %vm1674_vm14 = vcmask 523264  }
  0x7d   : > { %881 = vmatpush1.bf16.msra.mxu0 %v6986_v25  ;;  %6662 = vmatprep.subr.bf16.mxu1 %v7015_v33  ;;  %v1730_v25 = vor.u32 %v1728_v10, %v1727_v15  ;;  %v7975_v33 = vcombine.high %v7954_v13, %v7961_v16  ;;  %v1837_v10 = vld [vmem:[#allocation7 + $0x20] sm:$0xff]  ;;  %s6603_s25 = smul.u32 160, %s9908_s24  ;;  %s6604_s13 = sshll.u32 %s9908_s24, 6 }
  0x7e   : > { %882 = vmatprep.subr.bf16.mxu0 %v6988_v27  ;;  %v1813_v27 = vld [vmem:[#allocation7 + $0x8] sm:$0xff]  ;;  %v1817_v46 = vsel %vm7926_vm4, %v1739_v32, %v1816_v28  ;;  %v8077_v28 = vld [vmem:[#allocation7 + $0x18] sm:$0x11]  ;;  %s2121_s17 = scalar_lea.vmem [#allocation5], %s6604_s13 }
  0x7f   : > { %1818 = vst [vmem:[#allocation7 + $0x88] sm:$0x11] %v1817_v46  ;;  %s8071_s12 = scalar_lea.vmem [#allocation3], %s6603_s25  ;;  %v1887_v39 = vshll.u32 %v8077_v28, 16  ;;  %s6594_s25 = sshll.u32 %s9908_s24, 5 }
  0x80   : > { %6663 = vmatpush3.bf16.msra.mxu1 %v7017_v37  ;;  %v7018_v37 = vld [vmem:[%s9814_s1 + $0xf4] ss:$12 sps:$4 sm:$0xff]   ;;  %1373 = vst.msk [vmem:[%s8071_s12 + $0x90] sm:$0xff] %vm8059_vm6, %v8055_v63  ;;  %s8330_s13 = scalar_lea.vmem [#allocation4], %s6594_s25 }
  0x81   : > { %883 = vmatpush1.bf16.msra.mxu0 %v6991_v30  ;;  %6664 = vmatprep.subr.bf16.mxu1 %v7020_v38  ;;  %v1743_v30 = vrot.slane %v1741_v17, 7  ;;  %v7982_v38 = vsel %vm7915_vm2, %v1730_v25, %v1807_v21  ;;  %v7028_v17 = vld [vmem:[%s9814_s1 + $0xc4] ss:$12 sps:$4 sm:$0xff]   ;;  %v5853_v21 = vcombine.high %v506_v50, %v507_v53  ;;  %v8093_v50 = vrot.slane %v1887_v39, 5 }
  0x82   : > { %884 = vmatprep.subr.bf16.mxu0 %v6993_v31  ;;  %v1738_v31 = vor.u32 %v1736_v12, %v1735_v20  ;;  %1809 = vst [vmem:[#allocation7 + $0x78] sm:$0xff] %v7982_v38  ;;  %v7027_v12 = vld [vmem:[%s9814_s1 + $0xd8] ss:$12 sps:$4 sm:$0xff]  }
  0x83   : > { %v1747_v41 = vrot.slane %v1743_v30, 4 }
  0x84   : > { %6665 = vmatpush3.bf16.msra.mxu1 %v7022_v45  ;;  %v7989_v45 = vsel %vm7915_vm2, %v1738_v31, %v1813_v27  ;;  %v1881_v27 = vshll.u32 %v7934_v1, 16  ;;  %v8081_v31 = vld [vmem:[#allocation7 + $0x68] sm:$0x11] }
  0x85   : > { %885 = vmatpush2.bf16.msra.mxu0 %v6996_v34  ;;  %v1751_v34 = vrot.slane %v1749_v23, 7  ;;  %1815 = vst [vmem:[#allocation7 + $0x8] sm:$0xff] %v7989_v45 }
  0x86   : > { %886 = vmatprep.subr.bf16.mxu0 %v6998_v35  ;;  %v1819_v35 = vld [vmem:[#allocation7 + $0x28] sm:$0xff] }
  0x87   : > { %974 = vmatmul.mubr.bf16.vlgmr.msra.gmra.mxu1 %v7930_v0  ;;  %v1754_v48 = vor.u32 %v1752_v24, %v1751_v34  ;;  %v1755_v49 = vrot.slane %v1751_v34, 4  ;;  %v1878_v24 = vshrl.u32 %v7934_v1, 16  ;;  %v8083_v34 = vld [vmem:[#allocation7 + $0x80] sm:$0x11]  ;;  %v8091_v46 = vld [vmem:[#allocation7 + $0x88] sm:$0x11] }
  0x88   : > { %981 = vmatprep.mubr.bf16.mxu1 %v7947_v7 }
  0x89   : > { %887 = vmatpush2.bf16.msra.mxu0 %v7001_v36  ;;  %v1822_v36 = vld [vmem:[#allocation7 + $0x40] sm:$0x11]  ;;  %v8008_v58 = vsel %vm7915_vm2, %v1754_v48, %v1825_v43  ;;  %v1829_v59 = vsel %vm7926_vm4, %v1755_v49, %v1828_v44  ;;  %v1880_v32 = vrot.slane %v1878_v24, 4  ;;  %v1901_v43 = vshll.u32 %v8081_v31, 16 }
  0x8a   : > { %888 = vmatprep.subr.bf16.mxu0 %v7003_v40  ;;  %v1746_v40 = vor.u32 %v1744_v18, %v1743_v30  ;;  %v1823_v52 = vsel %vm7926_vm4, %v1747_v41, %v1822_v36  ;;  %1827 = vst [vmem:[#allocation7 + $0x58] sm:$0xff] %v8008_v58  ;;  %1830 = vst [vmem:[#allocation7 + $0x10] sm:$0x11] %v1829_v59  ;;  %v5850_v18 = vcombine.low %v7954_v13, %v7961_v16  ;;  %v7030_v13 = vld [vmem:[%s9814_s1 + $0xc0] ss:$12 sps:$4 sm:$0xff]  }
  0x8b   : > { %1824 = vst [vmem:[#allocation7 + $0x40] sm:$0x11] %v1823_v52  ;;  %v8065_v16 = vld [vmem:[#allocation7 + $0x38] sm:$0x11]  ;;  %v1892_v30 = vshrl.u32 %v7943_v5, 16  ;;  %v1895_v41 = vshll.u32 %v7943_v5, 16 }
  0x8c   : > { %v1906_v44 = vshrl.u32 %v7982_v38, 16  ;;  %v1909_v52 = vshll.u32 %v7982_v38, 16  ;;  %v8096_v54 = vrot.slane %v1901_v43, 5  ;;  %v8099_v59 = vld [vmem:[#allocation6] sm:$0xff] }
  0x8d   : > { %889 = vmatpush2.bf16.msra.mxu0 %v7006_v51  ;;  %v7997_v51 = vsel %vm7915_vm2, %v1746_v40, %v1819_v35  ;;  %v1894_v40 = vrot.slane %v1892_v30, 4  ;;  %1364 = vst.msk [vmem:[%s8071_s12] sm:$0xff] %vm8059_vm6, %v8099_v59 }
  0x8e   : > { %890 = vmatprep.subr.bf16.mxu0 %v7008_v60  ;;  %1821 = vst [vmem:[#allocation7 + $0x28] sm:$0xff] %v7997_v51  ;;  %v1765_v60 = vshrl.u32 %v507_v53, 16  ;;  %v1897_v53 = vrot.slane %v1895_v41, 5  ;;  %v1908_v56 = vrot.slane %v1906_v44, 4 }
  0x8f   : > { %982 = vmatmul.mubr.bf16.gmra.mxu1 %v7971_v29 }
  0x90   : > { %989 = vmatprep.mubr.bf16.mxu1 %v7975_v33  ;;  %v1767_v3 = vrot.slane %v1765_v60, 7 }
  0x91   : > { %891 = vmatpush2.bf16.msra.mxu0 %v7011_v9  ;;  %v1763_v9 = vrot.slane %v1759_v2, 4  ;;  %v1920_v2 = vshrl.u32 %v7989_v45, 16 }
  0x92   : > { %892 = vmatprep.subr.bf16.mxu0 %v7013_v14  ;;  %v1770_v14 = vor.u32 %v1768_v61, %v1767_v3  ;;  %v1771_v15 = vrot.slane %v1767_v3, 4 }
  0x93   : > { %v1835_v20 = vsel %vm7926_vm4, %v1763_v9, %v1834_v6  ;;  %v1898_v6 = vor.u32 %v1897_v53, %v1894_v40  ;;  %v1923_v9 = vshll.u32 %v7989_v45, 16 }
  0x94   : > { %1836 = vst [vmem:[#allocation7 + $0x60] sm:$0x11] %v1835_v20  ;;  %v8035_v22 = vsel %vm7915_vm2, %v1770_v14, %v1837_v10  ;;  %v1841_v23 = vsel %vm7926_vm4, %v1771_v15, %v1840_v11  ;;  %v1929_v10 = vshll.u32 %v8091_v46, 16  ;;  %v1922_v15 = vrot.slane %v1920_v2, 4 }
  0x95   : > { %893 = vmatpush2.bf16.msra.mxu0 %v7016_v19  ;;  %v8028_v19 = vsel %vm7915_vm2, %v1762_v8, %v1831_v4  ;;  %1839 = vst [vmem:[#allocation7 + $0x20] sm:$0xff] %v8035_v22  ;;  %1842 = vst [vmem:[#allocation7 + $0x48] sm:$0x11] %v1841_v23  ;;  %v8116_v4 = vld [vmem:[#allocation7 + $0x40] sm:$0x11]  ;;  %v1976_v53 = vshrl.u32 %v8035_v22, 16 }
  0x96   : > { %894 = vmatprep.subr.bf16.mxu0 %v7018_v37  ;;  %1833 = vst [vmem:[#allocation7 + $0x98] sm:$0xff] %v8028_v19  ;;  %v1883_v37 = vrot.slane %v1881_v27, 5  ;;  %v1931_v20 = vrot.slane %v1929_v10, 5  ;;  %v8131_v23 = vld [vmem:[#allocation7 + $0x10] sm:$0x11]  ;;  %v1943_v24 = vshll.u32 %v8116_v4, 16  ;;  %vm8300_vm2 = vmand %vm1279_vm5, %vm1280_vm10 }
  0x97   : > { %990 = vmatmul.mubr.bf16.gmra.mxu1 %v5850_v18  ;;  %v1957_v41 = vshll.u32 %v8131_v23, 16  ;;  %v1962_v43 = vshrl.u32 %v8028_v19, 16  ;;  %v1979_v10 = vshll.u32 %v8035_v22, 16  ;;  %vm8324_vm10 = vmor %vm8300_vm2, %vm7895_vm13  ;;  %vm1568_vm13 = vcmask 1043712  }
  0x98   : > { %997 = vmatprep.mubr.bf16.mxu1 %v5853_v21  ;;  %v1884_v49 = vor.u32 %v1883_v37, %v1880_v32  ;;  %v1951_v32 = vshll.u32 %v8008_v58, 16  ;;  %vm1547_vm4 = vcmask 261120   ;;  %vm1569_vm5 = vcmask 523268  }
  0x99   : > { %895 = vmatpush2.bf16.msra.mxu0 %v7021_v57  ;;  %v1915_v57 = vshll.u32 %v8083_v34, 16  ;;  %vm8545_vm8 = vmor %vm1569_vm5, %vm1568_vm13 }
  0x9a   : > { %896 = vmatprep.subr.bf16.mxu0 %v7024_v62  ;;  %v8103_v61 = vrot.slane %v1884_v49, 4  ;;  %v1911_v62 = vrot.slane %v1909_v52, 5  ;;  %v1953_v40 = vrot.slane %v1951_v32, 5 }
  0x9b   : > { %v8118_v8 = vrot.slane %v1915_v57, 5 }
  0x9c   : > { %v1912_v14 = vor.u32 %v1911_v62, %v1908_v56  ;;  %v8147_v44 = vld [vmem:[#allocation7 + $0x48] sm:$0x11] }
  0x9d   : > { %897 = vmatpush2.bf16.msra.mxu0 %v7027_v12  ;;  %v1890_v12 = vsel %vm8112_vm9, %v8103_v61, %v8093_v50  ;;  %v1965_v50 = vshll.u32 %v8028_v19, 16  ;;  %v1964_v61 = vrot.slane %v1962_v43, 4 }
  0x9e   : > { %898 = vmatprep.subr.bf16.mxu0 %v7028_v17  ;;  %v1899_v17 = vrot.slane %v1898_v6, 4 }
  0x9f   : > { %998 = vmatmul.mubr.bf16.gmra.mxu1 %v5852_v55  ;;  %v1967_v2 = vrot.slane %v1965_v50, 5 }
  0xa0   : > { %v1904_v27 = vsel %vm8112_vm9, %v1899_v17, %v8096_v54  ;;  %v8154_v54 = vld [vmem:[#allocation7 + $0x90] sm:$0x11] }
  0xa1   : > { %899 = vmatpush2.bf16.msra.mxu0 %v7030_v13  ;;  %v1913_v13 = vrot.slane %v1912_v14, 4  ;;  %v1985_v14 = vshll.u32 %v8147_v44, 16 }
  0xa4   : > { %901 = vmatmul.mubr.bf16.vlgmr.msra.gmra.mxu0 %v7930_v0 }
  0xa5   : > { %910 = vmatprep.mubr.bf16.mxu0 %v7947_v7  ;;  %v8063_v7 = vld [vmem:[#allocation7] sm:$0xff] }
  0xa6   : > { %v1864_v25 = vshrl.u32 %v8063_v7, 16  ;;  %v1867_v26 = vshll.u32 %v8063_v7, 16 }
  0xa8   : > { %v1869_v35 = vrot.slane %v1867_v26, 5  ;;  %v8136_v26 = vld [vmem:[#allocation7 + $0x60] sm:$0x11] }
  0xa9   : > { %v1971_v52 = vshll.u32 %v8136_v26, 16 }
  0xab   : > { %v1973_v6 = vrot.slane %v1971_v52, 5 }
  0xac   : > { %911 = vmatmul.mubr.bf16.gmra.mxu0 %v7971_v29  ;;  %v1873_v29 = vshll.u32 %v8065_v16, 16 }
  0xad   : > { %920 = vmatprep.mubr.bf16.mxu0 %v7975_v33  ;;  %v1866_v33 = vrot.slane %v1864_v25, 4  ;;  %v1948_v25 = vshrl.u32 %v8008_v58, 16 }
  0xae   : > { %v8085_v36 = vrot.slane %v1873_v29, 5 }
  0xaf   : > { %v1870_v48 = vor.u32 %v1869_v35, %v1866_v33  ;;  %v1918_v33 = vsel %vm8112_vm9, %v1913_v13, %v8118_v8  ;;  %v1950_v37 = vrot.slane %v1948_v25, 4  ;;  %v1978_v8 = vrot.slane %v1976_v53, 4 }
  0xb1   : > { %v8101_v60 = vrot.slane %v1870_v48, 4  ;;  %v8149_v48 = vld [vmem:[#allocation7 + $0x70] sm:$0xff]  ;;  %v1954_v57 = vor.u32 %v1953_v40, %v1950_v37  ;;  %v2016_v40 = vmax.bf16 %v1918_v33, %v7982_v38  ;;  %v5932_v33 = vrot.slane %v7934_v1, 9 }
  0xb3   : > { %v1876_v11 = vsel %vm8112_vm9, %v8101_v60, %v8085_v36  ;;  %v1945_v36 = vrot.slane %v1943_v24, 5  ;;  %v1959_v60 = vrot.slane %v1957_v41, 5  ;;  %v1987_v24 = vrot.slane %v1985_v14, 5 }
  0xb4   : > { %921 = vmatmul.mubr.bf16.gmra.mxu0 %v5850_v18  ;;  %v1925_v18 = vrot.slane %v1923_v9, 5  ;;  %v1955_v9 = vrot.slane %v1954_v57, 4  ;;  %v5931_v57 = vrot.slane %v8063_v7, 9  ;;  %v2065_v14 = vrot.slane %v8116_v4, 5 }
  0xb5   : > { %930 = vmatprep.mubr.bf16.mxu0 %v5853_v21  ;;  %v1934_v21 = vshrl.u32 %v7997_v51, 16 }
  0xb6   : > { %v1926_v29 = vor.u32 %v1925_v18, %v1922_v15  ;;  %v1990_v15 = vshrl.u32 %v8149_v48, 16  ;;  %v1968_v18 = vor.u32 %v1967_v2, %v1964_v61  ;;  %v1960_v13 = vsel %vm8112_vm9, %v1955_v9, %v1959_v60 }
  0xb7   : > { %v1936_v30 = vrot.slane %v1934_v21, 4  ;;  %v1999_v21 = vshll.u32 %v8154_v54, 16  ;;  %v2019_v53 = vmax.bf16 %v1960_v13, %v8008_v58  ;;  %v2049_v60 = vrot.slane %v8077_v28, 5 }
  0xb8   : > { %v1927_v39 = vrot.slane %v1926_v29, 4  ;;  %v1992_v25 = vrot.slane %v1990_v15, 4  ;;  %v1969_v29 = vrot.slane %v1968_v18, 4  ;;  %v5934_v2 = vrot.slane %v7982_v38, 9 }
  0xb9   : > { %v2001_v32 = vrot.slane %v1999_v21, 5  ;;  %v5935_v38 = vrot.slane %v7989_v45, 9  ;;  %v2061_v9 = vrot.slane %v8091_v46, 5  ;;  %v5937_v15 = vrot.slane %v8008_v58, 9 }
  0xba   : > { %v1932_v56 = vsel %vm8112_vm9, %v1927_v39, %v1931_v20  ;;  %v1993_v20 = vshll.u32 %v8149_v48, 16  ;;  %v2014_v39 = vmax.bf16 %v1890_v12, %v7934_v1  ;;  %v1974_v41 = vsel %vm8112_vm9, %v1969_v29, %v1973_v6 }
  0xbb   : > { %v2050_v6 = vsel %vm8183_vm15, %v5932_v33, %v2049_v60  ;;  %v2069_v18 = vrot.slane %v8131_v23, 5  ;;  %v2073_v21 = vrot.slane %v8136_v26, 5  ;;  %v2077_v58 = vrot.slane %v8147_v44, 5 }
  0xbc   : > { %931 = vmatmul.mubr.bf16.gmra.mxu0 %v5852_v55  ;;  %v1937_v55 = vshll.u32 %v7997_v51, 16  ;;  %v2081_v23 = vrot.slane %v8154_v54, 5 }
  0xbd   : > { %v2070_v46 = vsel %vm8183_vm15, %v5937_v15, %v2069_v18 }
  0xbe   : > { %v1939_v35 = vrot.slane %v1937_v55, 5  ;;  %v1981_v55 = vrot.slane %v1979_v10, 5  ;;  %v5936_v10 = vrot.slane %v7997_v51, 9 }
  0xc0   : > { %v1940_v49 = vor.u32 %v1939_v35, %v1936_v30  ;;  %v1995_v30 = vrot.slane %v1993_v20, 5  ;;  %v2013_v35 = vmax.bf16 %v1876_v11, %v8063_v7  ;;  %v1982_v37 = vor.u32 %v1981_v55, %v1978_v8 }
  0xc1   : > { %v2020_v11 = vmax.bf16 %v1974_v41, %v8028_v19  ;;  %v2053_v7 = vrot.slane %v8081_v31, 5  ;;  %v2057_v31 = vrot.slane %v8083_v34, 5  ;;  %v5938_v20 = vrot.slane %v8028_v19, 9 }
  0xc2   : > { %v1941_v62 = vrot.slane %v1940_v49, 4  ;;  %v1996_v43 = vor.u32 %v1995_v30, %v1992_v25  ;;  %v2017_v49 = vmax.bf16 %v1932_v56, %v7989_v45  ;;  %v1983_v52 = vrot.slane %v1982_v37, 4 }
  0xc3   : > { %v2062_v45 = vsel %vm8183_vm15, %v5935_v38, %v2061_v9  ;;  %v5939_v34 = vrot.slane %v8035_v22, 9  ;;  %v2074_v4 = vsel %vm8183_vm15, %v5938_v20, %v2073_v21  ;;  %v5940_v19 = vrot.slane %v8149_v48, 9 }
  0xc4   : > { %v1946_v17 = vsel %vm8112_vm9, %v1941_v62, %v1945_v36  ;;  %v2015_v36 = vmax.bf16 %v1904_v27, %v7943_v5  ;;  %v1997_v12 = vrot.slane %v1996_v43, 4  ;;  %v2045_v27 = vrot.slane %v8065_v16, 5 }
  0xc5   : > { %v2018_v50 = vmax.bf16 %v1946_v17, %v7997_v51  ;;  %v1988_v61 = vsel %vm8112_vm9, %v1983_v52, %v1987_v24  ;;  %v5933_v62 = vrot.slane %v7943_v5, 9  ;;  %v2058_v17 = vsel %vm8183_vm15, %v5934_v2, %v2057_v31 }
  0xc6   : > { %v2002_v1 = vsel %vm8112_vm9, %v1997_v12, %v2001_v32  ;;  %v2021_v16 = vmax.bf16 %v1988_v61, %v8035_v22  ;;  %v2046_v28 = vsel %vm8183_vm15, %v5931_v57, %v2045_v27  ;;  %v2066_v51 = vsel %vm8183_vm15, %v5936_v10, %v2065_v14 }
  0xc7   : > { %v2022_v8 = vmax.bf16 %v2002_v1, %v8149_v48  ;;  %v2054_v5 = vsel %vm8183_vm15, %v5933_v62, %v2053_v7  ;;  %v2078_v26 = vsel %vm8183_vm15, %v5939_v34, %v2077_v58  ;;  %v2093_v13 = vmax.bf16 %v2046_v28, %v2013_v35 }
  0xc8   : > { %v2094_v55 = vmax.bf16 %v2050_v6, %v2014_v39  ;;  %v2095_v24 = vmax.bf16 %v2054_v5, %v2015_v36  ;;  %v2082_v22 = vsel %vm8183_vm15, %v5940_v19, %v2081_v23  ;;  %v2096_v44 = vmax.bf16 %v2058_v17, %v2016_v40  ;;  %v1339_v36 = vld [vmem:[#allocation6 + $0x8] sm:$0x11] }
  0xc9   : > { %v2097_v25 = vmax.bf16 %v2062_v45, %v2017_v49  ;;  %v2098_v29 = vmax.bf16 %v2066_v51, %v2018_v50  ;;  %v2099_v30 = vmax.bf16 %v2070_v46, %v2019_v53  ;;  %v2100_v32 = vmax.bf16 %v2074_v4, %v2020_v11  ;;  %v1357_v49 = vld [vmem:[#allocation6 + $0x98] sm:$0x11] }
  0xca   : > { %v2101_v37 = vmax.bf16 %v2078_v26, %v2021_v16  ;;  %v2102_v41 = vmax.bf16 %v2082_v22, %v2022_v8  ;;  %v2103_v48 = vmax.bf16 %v2094_v55, %v2093_v13  ;;  %v2104_v43 = vmax.bf16 %v2095_v24, %v2094_v55 }
  0xcb   : > { %v2105_v54 = vmax.bf16 %v2096_v44, %v2095_v24  ;;  %v2106_v52 = vmax.bf16 %v2097_v25, %v2096_v44  ;;  %v2107_v57 = vmax.bf16 %v2098_v29, %v2097_v25  ;;  %v2108_v12 = vmax.bf16 %v2099_v30, %v2098_v29 }
  0xcc   : > { %v2109_v35 = vmax.bf16 %v2100_v32, %v2099_v30  ;;  %v2110_v39 = vmax.bf16 %v2101_v37, %v2100_v32  ;;  %v2111_v27 = vmax.bf16 %v2103_v48, %v2095_v24  ;;  %v2112_v33 = vmax.bf16 %v2104_v43, %v2096_v44  ;;  %v1006_v44 = vld [vmem:[%s9829_s2] sm:$0x7] }
  0xcd   : > { %v2113_v60 = vmax.bf16 %v2105_v54, %v2097_v25  ;;  %v2114_v40 = vmax.bf16 %v2106_v52, %v2098_v29  ;;  %v2115_v50 = vmax.bf16 %v2107_v57, %v2099_v30  ;;  %v2116_v61 = vmax.bf16 %v2108_v12, %v2100_v32 }
  0xce   : > { %v2117_v53 = vmax.bf16 %v2109_v35, %v2101_v37  ;;  %v2118_v11 = vmax.bf16 %v2110_v39, %v2102_v41  ;;  %2122 = vst [vmem:[%s2121_s17] sm:$0xff] %v2111_v27  ;;  %2123 = vst [vmem:[%s2121_s17 + $0x8] sm:$0xff] %v2112_v33  ;;  %v5921_v62 = vrot.slane %v8099_v59, 9  ;;  %v1606_v7 = vrot.slane %v1339_v36, 5  ;;  %v1047_v41 = vld [vmem:[%s9786_s3] sm:$0x7] }
  0xcf   : > { %2124 = vst [vmem:[%s2121_s17 + $0x10] sm:$0xff] %v2113_v60  ;;  %2125 = vst [vmem:[%s2121_s17 + $0x18] sm:$0xff] %v2114_v40  ;;  %v1504_v2 = vshrl.u32 %v8055_v63, 16  ;;  %v1507_v1 = vshll.u32 %v8055_v63, 16  ;;  %v1513_v16 = vshll.u32 %v1357_v49, 16  ;;  %v1378_v28 = vshrl.u32 %v8099_v59, 16 }
  0xd0   : > { %2126 = vst [vmem:[%s2121_s17 + $0x20] sm:$0xff] %v2115_v50  ;;  %2127 = vst [vmem:[%s2121_s17 + $0x28] sm:$0xff] %v2116_v61  ;;  %v1381_v6 = vshll.u32 %v8099_v59, 16  ;;  %v1387_v8 = vshll.u32 %v1339_v36, 16  ;;  %v1607_v5 = vsel %vm8183_vm15, %v5921_v62, %v1606_v7  ;;  %v5930_v45 = vrot.slane %v8055_v63, 9 }
  0xd1   : > { %2128 = vst [vmem:[%s2121_s17 + $0x30] sm:$0xff] %v2117_v53  ;;  %2129 = vst [vmem:[%s2121_s17 + $0x38] sm:$0xff] %v2118_v11  ;;  %v1506_v31 = vrot.slane %v1504_v2, 4  ;;  %v1509_v38 = vrot.slane %v1507_v1, 5  ;;  %1644 = vrot.lane.b32.xlu0 %v1607_v5, %s7575_s18  ;;  %v1380_v9 = vrot.slane %v1378_v28, 4  ;;  %v1515_v15 = vrot.slane %v1513_v16, 5 }
  0xd2   : > { %v1383_v10 = vrot.slane %v1381_v6, 5  ;;  %v1389_v18 = vrot.slane %v1387_v8, 5  ;;  %v1642_v51 = vrot.slane %v1357_v49, 5  ;;  %v1008_v19 = vlaneseq }
  0xd3   : > { %v1510_v14 = vor.u32 %v1509_v38, %v1506_v31 }
  0xd4   : > { %v1384_v17 = vor.u32 %v1383_v10, %v1380_v9  ;;  %v8247_v58 = vsel %vm8183_vm15, %v5930_v45, %v1642_v51  ;;  %v1009_v13 = vshrl.u32 %v1008_v19, 7 }
  0xd5   : > { %v1511_v20 = vrot.slane %v1510_v14, 4 }
  0xd6   : > { %v1385_v21 = vrot.slane %v1384_v17, 4  ;;  %v1018_v24 = vsub.s32 2, %v1009_v13  ;;  %v1010_v29 = vsub.s32 0, %v1009_v13  ;;  %v1014_v48 = vsub.s32 1, %v1009_v13 }
  0xd7   : > { %v1516_v59 = vsel %vm8112_vm9, %v1511_v20, %v1515_v15 }
  0xd8   : > { %1535 = vrot.lane.b32.xlu1 %v1516_v59, %s7576_s19  ;;  %v1390_v34 = vsel %vm8112_vm9, %v1385_v21, %v1389_v18  ;;  %v8252_v32 = vrot.slane %v1006_v44, %v1018_v24  ;;  %v8257_v52 = vrot.slane %v1006_v44, %v1010_v29  ;;  %v8260_v12 = vrot.slane %v1047_v41, %v1018_v24 }
  0xd9   : > { %1517 = vrot.lane.b32.xlu0 %v1390_v34, %s7576_s19  ;;  %v8262_v27 = vrot.slane %v1006_v44, %v1014_v48  ;;  %v8265_v49 = vrot.slane %v1047_v41, %v1010_v29  ;;  %v8268_v53 = vrot.slane %v1047_v41, %v1014_v48 }
 0x147   : > { %v6666_v46 = vpop.f32.mrf.mxu1 }
 0x149   : > { %v6667_v4 = vpop.f32.mrf.mxu1 }
 0x14a   : > { %v6668_v30 = vadd.f32 %v6667_v4, %v6666_v46 }
 0x14b   : > { %v6669_v23 = vpop.f32.mrf.mxu1 }
 0x14c   : > { %v1025_v57 = vmul.f32 %v6668_v30, %v8252_v32 }
 0x14d   : > { %v6670_v26 = vpop.f32.mrf.mxu1 }
 0x14e   : > { %v6671_v43 = vadd.f32 %v6670_v26, %v6669_v23  ;;  %v1066_v62 = vadd.f32 %v8260_v12, %v1025_v57 }
 0x14f   : > { %v6672_v63 = vpop.f32.mrf.mxu1 }
 0x150   : > { %v1028_v60 = vmul.f32 %v6671_v43, %v8252_v32  ;;  %v1090_v15 = vmax.f32 %v1066_v62, 0.0 }
 0x151   : > { %v6673_v55 = vpop.f32.mrf.mxu1 }
 0x152   : > { %v6674_v35 = vadd.f32 %v6673_v55, %v6672_v63  ;;  %v1069_v8 = vadd.f32 %v8260_v12, %v1028_v60 }
 0x153   : > { %v6675_v22 = vpop.f32.mrf.mxu1 }
 0x154   : > { %v1031_v2 = vmul.f32 %v6674_v35, %v8252_v32  ;;  %v1093_v4 = vmax.f32 %v1069_v8, 0.0 }
 0x155   : > { %v6676_v25 = vpop.f32.mrf.mxu1 }
 0x156   : > { %v6677_v39 = vadd.f32 %v6676_v25, %v6675_v22  ;;  %v8281_v17 = vadd.f32 %v8260_v12, %v1031_v2 }
 0x157   : > { %v6678_v37 = vpop.f32.mrf.mxu1 }
 0x158   : > { %v1034_v1 = vmul.f32 %v6677_v39, %v8252_v32  ;;  %v1096_v29 = vmax.f32 %v8281_v17, 0.0 }
 0x159   : > { %v6679_v54 = vpop.f32.mrf.mxu1 }
 0x15a   : > { %v6680_v33 = vadd.f32 %v6679_v54, %v6678_v37  ;;  %v8284_v20 = vadd.f32 %v8260_v12, %v1034_v1  ;;  %v1283_v1 = vld [vmem:[#allocation6 + $0x10] sm:$0xff] }
 0x15b   : > { %v6681_v36 = vpop.f32.mrf.mxu1 }
 0x15c   : > { %v1037_v6 = vmul.f32 %v6680_v33, %v8252_v32  ;;  %v1099_v30 = vmax.f32 %v8284_v20, 0.0 }
 0x15d   : > { %v6682_v50 = vpop.f32.mrf.mxu1 }
 0x15e   : > { %v6683_v11 = vadd.f32 %v6682_v50, %v6681_v36  ;;  %v8290_v46 = vadd.f32 %v8260_v12, %v1037_v6 }
 0x15f   : > { %v6684_v16 = vpop.f32.mrf.mxu1 }
 0x160   : > { %v1040_v38 = vmul.f32 %v6683_v11, %v8252_v32  ;;  %v1102_v39 = vmax.f32 %v8290_v46, 0.0 }
 0x161   : > { %v6685_v9 = vpop.f32.mrf.mxu1 }
 0x162   : > { %v6686_v21 = vadd.f32 %v6685_v9, %v6684_v16  ;;  %v8293_v26 = vadd.f32 %v8260_v12, %v1040_v38 }
 0x163   : > { %v6687_v59 = vpop.f32.mrf.mxu1 }
 0x164   : > { %v902_v40 = vpop.f32.mrf.mxu0  ;;  %v1043_v13 = vmul.f32 %v6686_v21, %v8252_v32 }
 0x165   : > { %v1023_v61 = vmul.f32 %v8257_v52, %v902_v40  ;;  %v6688_v63 = vpop.f32.mrf.mxu1  ;;  %v1105_v40 = vmax.f32 %v8293_v26, 0.0 }
 0x166   : > { %v904_v7 = vpop.f32.mrf.mxu0  ;;  %v8307_v41 = vadd.f32 %v8260_v12, %v1043_v13  ;;  %v6689_v48 = vadd.f32 %v6688_v63, %v6687_v59 }
 0x167   : > { %v1024_v28 = vmul.f32 %v8262_v27, %v904_v7  ;;  %v1064_v5 = vadd.f32 %v8265_v49, %v1023_v61 }
 0x168   : > { %v906_v31 = vpop.f32.mrf.mxu0  ;;  %v1046_v50 = vmul.f32 %v6689_v48, %v8252_v32  ;;  %v1293_v32 = vld [vmem:[#allocation6 + $0x18] sm:$0x11]  ;;  %v1108_v8 = vmax.f32 %v8307_v41, 0.0 }
 0x169   : > { %v1065_v10 = vadd.f32 %v8268_v53, %v1024_v28  ;;  %v1026_v14 = vmul.f32 %v8257_v52, %v906_v31  ;;  %v1088_v19 = vmax.f32 %v1064_v5, 0.0 }
 0x16a   : > { %v908_v18 = vpop.f32.mrf.mxu0  ;;  %v8345_v5 = vadd.f32 %v8260_v12, %v1046_v50 }
 0x16b   : > { %v1089_v45 = vmax.f32 %v1065_v10, 0.0  ;;  %v1067_v51 = vadd.f32 %v8265_v49, %v1026_v14  ;;  %v1027_v34 = vmul.f32 %v8262_v27, %v908_v18 }
 0x16c   : > { %v912_v23 = vpop.f32.mrf.mxu0  ;;  %v1111_v18 = vmax.f32 %v8345_v5, 0.0 }
 0x16d   : > { %v6595_v55 = vpack.c.bf16 %v1090_v15, %v1089_v45  ;;  %v1091_v24 = vmax.f32 %v1067_v51, 0.0  ;;  %v1068_v22 = vadd.f32 %v8268_v53, %v1027_v34  ;;  %v1029_v44 = vmul.f32 %v8257_v52, %v912_v23  ;;  %v1296_v51 = vld [vmem:[#allocation6 + $0x20] sm:$0xff]  ;;  %v1299_v34 = vld [vmem:[#allocation6 + $0x28] sm:$0x11] }
 0x16e   : > { %v914_v37 = vpop.f32.mrf.mxu0 }
 0x16f   : > { %v1196_v43 = vshrl.u32 %v6595_v55, 16  ;;  %v6630_v57 = vpack.c.bf16 %v1091_v24, %v1088_v19  ;;  %v1092_v35 = vmax.f32 %v1068_v22, 0.0  ;;  %v1070_v36 = vadd.f32 %v8265_v49, %v1029_v44 }
 0x170   : > { %v1030_v33 = vmul.f32 %v8262_v27, %v914_v37  ;;  %v916_v60 = vpop.f32.mrf.mxu0  ;;  %v1199_v11 = vshll.u32 %v6595_v55, 16 }
 0x171   : > { %v1198_v61 = vrot.slane %v1196_v43, 7  ;;  %6631 = vst [vmem:[%s8330_s13] sm:$0xff] %v6630_v57   ;;  %v6596_v7 = vpack.c.bf16 %v1093_v4, %v1092_v35  ;;  %v1032_v2 = vmul.f32 %v8257_v52, %v916_v60  ;;  %v1094_v16 = vmax.f32 %v1070_v36, 0.0 }
 0x172   : > { %v1071_v28 = vadd.f32 %v8268_v53, %v1030_v33  ;;  %v918_v6 = vpop.f32.mrf.mxu0 }
 0x173   : > { %v1201_v31 = vor.u32 %v1199_v11, %v1198_v61  ;;  %v1202_v38 = vrot.slane %v1198_v61, 4  ;;  %v1204_v9 = vshrl.u32 %v6596_v7, 16  ;;  %v1207_v47 = vshll.u32 %v6596_v7, 16  ;;  %v1302_v7 = vld [vmem:[#allocation6 + $0x30] sm:$0xff] }
 0x174   : > { %v1095_v10 = vmax.f32 %v1071_v28, 0.0  ;;  %v1073_v14 = vadd.f32 %v8265_v49, %v1032_v2  ;;  %v1033_v15 = vmul.f32 %v8262_v27, %v918_v6  ;;  %v922_v17 = vpop.f32.mrf.mxu0  ;;  %v1305_v2 = vld [vmem:[#allocation6 + $0x38] sm:$0x11] }
 0x175   : > { %v8352_v21 = vsel %vm8324_vm10, %v1201_v31, %v1283_v1  ;;  %v1294_v12 = vsel %vm8338_vm1, %v1202_v38, %v1293_v32  ;;  %v1206_v59 = vrot.slane %v1204_v9, 7  ;;  %v1035_v45 = vmul.f32 %v8257_v52, %v922_v17 }
 0x176   : > { %1285 = vst [vmem:[#allocation6 + $0x10] sm:$0xff] %v8352_v21  ;;  %1295 = vst [vmem:[#allocation6 + $0x18] sm:$0x11] %v1294_v12  ;;  %v6597_v4 = vpack.c.bf16 %v1096_v29, %v1095_v10  ;;  %v1097_v19 = vmax.f32 %v1073_v14, 0.0  ;;  %v1074_v23 = vadd.f32 %v8268_v53, %v1033_v15  ;;  %v924_v13 = vpop.f32.mrf.mxu0  ;;  %v5922_v63 = vrot.slane %v8352_v21, 9 }
 0x177   : > { %1365 = vst.msk [vmem:[%s8071_s12 + $0x10] sm:$0xff] %vm8059_vm6, %v8352_v21  ;;  %v1209_v55 = vor.u32 %v1207_v47, %v1206_v59  ;;  %v1210_v24 = vrot.slane %v1206_v59, 4  ;;  %v1076_v22 = vadd.f32 %v8265_v49, %v1035_v45  ;;  %v1036_v44 = vmul.f32 %v8262_v27, %v924_v13  ;;  %v1308_v45 = vld [vmem:[#allocation6 + $0x40] sm:$0xff] }
 0x178   : > { %v1212_v25 = vshrl.u32 %v6597_v4, 16  ;;  %v1215_v37 = vshll.u32 %v6597_v4, 16  ;;  %v6635_v29 = vpack.c.bf16 %v1097_v19, %v1094_v16  ;;  %v1098_v48 = vmax.f32 %v1074_v23, 0.0  ;;  %v926_v43 = vpop.f32.mrf.mxu0 }
 0x179   : > { %v8368_v54 = vsel %vm8324_vm10, %v1209_v55, %v1296_v51  ;;  %v1300_v57 = vsel %vm8338_vm1, %v1210_v24, %v1299_v34  ;;  %v1100_v35 = vmax.f32 %v1076_v22, 0.0  ;;  %v1077_v36 = vadd.f32 %v8268_v53, %v1036_v44  ;;  %v1311_v51 = vld [vmem:[#allocation6 + $0x48] sm:$0x11] }
 0x17a   : > { %1298 = vst [vmem:[#allocation6 + $0x20] sm:$0xff] %v8368_v54  ;;  %1301 = vst [vmem:[#allocation6 + $0x28] sm:$0x11] %v1300_v57  ;;  %v1214_v33 = vrot.slane %v1212_v25, 7  ;;  %v6598_v60 = vpack.c.bf16 %v1099_v30, %v1098_v48  ;;  %v1038_v50 = vmul.f32 %v8257_v52, %v926_v43  ;;  %v928_v61 = vpop.f32.mrf.mxu0  ;;  %v5923_v11 = vrot.slane %v8368_v54, 9 }
 0x17b   : > { %6647 = vst [vmem:[%s8330_s13 + $0x8] sm:$0xff] %v6635_v29   ;;  %1366 = vst.msk [vmem:[%s8071_s12 + $0x20] sm:$0xff] %vm8059_vm6, %v8368_v54  ;;  %v1101_v1 = vmax.f32 %v1077_v36, 0.0  ;;  %v1039_v32 = vmul.f32 %v8262_v27, %v928_v61  ;;  %v1392_v16 = vshrl.u32 %v8352_v21, 16  ;;  %v1395_v28 = vshll.u32 %v8352_v21, 16  ;;  %v1314_v36 = vld [vmem:[#allocation6 + $0x50] sm:$0xff] }
 0x17c   : > { %v1217_v20 = vor.u32 %v1215_v37, %v1214_v33  ;;  %v1218_v30 = vrot.slane %v1214_v33, 4  ;;  %v1220_v6 = vshrl.u32 %v6598_v60, 16  ;;  %v1223_v31 = vshll.u32 %v6598_v60, 16  ;;  %v932_v38 = vpop.f32.mrf.mxu0  ;;  %v1317_v33 = vld [vmem:[#allocation6 + $0x58] sm:$0x11] }
 0x17d   : > { %v6599_v9 = vpack.c.bf16 %v1102_v39, %v1101_v1  ;;  %v1079_v47 = vadd.f32 %v8265_v49, %v1038_v50  ;;  %v1080_v10 = vadd.f32 %v8268_v53, %v1039_v32  ;;  %v1041_v14 = vmul.f32 %v8257_v52, %v932_v38  ;;  %v8391_v15 = vld [vmem:[#allocation6 + $0x18] sm:$0x11]  ;;  %v1320_v38 = vld [vmem:[#allocation6 + $0x60] sm:$0xff] }
 0x17e   : > { %v8395_v17 = vsel %vm8324_vm10, %v1217_v20, %v1302_v7  ;;  %v1306_v12 = vsel %vm8338_vm1, %v1218_v30, %v1305_v2  ;;  %v1222_v59 = vrot.slane %v1220_v6, 7  ;;  %v934_v46 = vpop.f32.mrf.mxu0  ;;  %v1610_v39 = vrot.slane %v8391_v15, 5 }
 0x17f   : > { %1304 = vst [vmem:[#allocation6 + $0x30] sm:$0xff] %v8395_v17  ;;  %1307 = vst [vmem:[#allocation6 + $0x38] sm:$0x11] %v1306_v12  ;;  %v1228_v34 = vshrl.u32 %v6599_v9, 16  ;;  %v1231_v4 = vshll.u32 %v6599_v9, 16  ;;  %v1103_v19 = vmax.f32 %v1079_v47, 0.0  ;;  %v1082_v24 = vadd.f32 %v8265_v49, %v1041_v14 }
 0x180   : > { %v1104_v23 = vmax.f32 %v1080_v10, 0.0  ;;  %1367 = vst.msk [vmem:[%s8071_s12 + $0x30] sm:$0xff] %vm8059_vm6, %v8395_v17  ;;  %v1225_v13 = vor.u32 %v1223_v31, %v1222_v59  ;;  %v1226_v55 = vrot.slane %v1222_v59, 4  ;;  %v1042_v22 = vmul.f32 %v8262_v27, %v934_v46  ;;  %v936_v44 = vpop.f32.mrf.mxu0  ;;  %v1323_v9 = vld [vmem:[#allocation6 + $0x68] sm:$0x11] }
 0x181   : > { %v1230_v25 = vrot.slane %v1228_v34, 7  ;;  %v6640_v37 = vpack.c.bf16 %v1103_v19, %v1100_v35  ;;  %v1044_v48 = vmul.f32 %v8257_v52, %v936_v44  ;;  %v1106_v60 = vmax.f32 %v1082_v24, 0.0  ;;  %v8417_v35 = vld [vmem:[#allocation6 + $0x28] sm:$0x11]  ;;  %v1326_v34 = vld [vmem:[#allocation6 + $0x70] sm:$0xff] }
 0x182   : > { %v6600_v29 = vpack.c.bf16 %v1105_v40, %v1104_v23  ;;  %v8412_v43 = vsel %vm8324_vm10, %v1225_v13, %v1308_v45  ;;  %v1312_v57 = vsel %vm8338_vm1, %v1226_v55, %v1311_v51  ;;  %v1083_v50 = vadd.f32 %v8268_v53, %v1042_v22  ;;  %v938_v61 = vpop.f32.mrf.mxu0  ;;  %v1329_v13 = vld [vmem:[#allocation6 + $0x78] sm:$0x11] }
 0x183   : > { %1310 = vst [vmem:[#allocation6 + $0x40] sm:$0xff] %v8412_v43  ;;  %1313 = vst [vmem:[#allocation6 + $0x48] sm:$0x11] %v1312_v57  ;;  %v1233_v52 = vor.u32 %v1231_v4, %v1230_v25  ;;  %v1234_v26 = vrot.slane %v1230_v25, 4  ;;  %v1085_v1 = vadd.f32 %v8265_v49, %v1044_v48  ;;  %v1611_v32 = vsel %vm8183_vm15, %v5922_v63, %v1610_v39 }
 0x184   : > { %6648 = vst [vmem:[%s8330_s13 + $0x10] sm:$0xff] %v6640_v37   ;;  %v1236_v40 = vshrl.u32 %v6600_v29, 16  ;;  %v1239_v7 = vshll.u32 %v6600_v29, 16  ;;  %1368 = vst.msk [vmem:[%s8071_s12 + $0x40] sm:$0xff] %vm8059_vm6, %v8412_v43  ;;  %v1107_v2 = vmax.f32 %v1083_v50, 0.0  ;;  %v1045_v20 = vmul.f32 %v8262_v27, %v938_v61  ;;  %1646 = vrot.lane.b32.xlu1 %v1611_v32, %s7575_s18  ;;  %v1332_v61 = vld [vmem:[#allocation6 + $0x80] sm:$0xff] }
 0x185   : > { %v8433_v30 = vsel %vm8324_vm10, %v1233_v52, %v1314_v36  ;;  %v1318_v6 = vsel %vm8338_vm1, %v1234_v26, %v1317_v33  ;;  %v1614_v49 = vrot.slane %v8417_v35, 5  ;;  %v1109_v63 = vmax.f32 %v1085_v1, 0.0  ;;  %v1335_v52 = vld [vmem:[#allocation6 + $0x88] sm:$0x11] }
 0x186   : > { %v1238_v31 = vrot.slane %v1236_v40, 7  ;;  %1316 = vst [vmem:[#allocation6 + $0x50] sm:$0xff] %v8433_v30  ;;  %1319 = vst [vmem:[#allocation6 + $0x58] sm:$0x11] %v1318_v6  ;;  %v6601_v27 = vpack.c.bf16 %v1108_v8, %v1107_v2  ;;  %v1086_v47 = vadd.f32 %v8268_v53, %v1045_v20  ;;  %v1394_v10 = vrot.slane %v1392_v16, 4 }
 0x187   : > { %1369 = vst.msk [vmem:[%s8071_s12 + $0x50] sm:$0xff] %vm8059_vm6, %v8433_v30  ;;  %v1615_v59 = vsel %vm8183_vm15, %v5923_v11, %v1614_v49  ;;  %v1397_v41 = vrot.slane %v1395_v28, 5  ;;  %v8455_v8 = vld [vmem:[#allocation6 + $0x38] sm:$0x11]  ;;  %v6645_v16 = vpack.c.bf16 %v1109_v63, %v1106_v60  ;;  %v1401_v21 = vshll.u32 %v8391_v15, 16 }
 0x188   : > { %v1241_v14 = vor.u32 %v1239_v7, %v1238_v31  ;;  %v1242_v12 = vrot.slane %v1238_v31, 4  ;;  %v1244_v53 = vshrl.u32 %v6601_v27, 16  ;;  %v1247_v45 = vshll.u32 %v6601_v27, 16  ;;  %1648 = vrot.lane.b32.xlu0 %v1615_v59, %s7575_s18 }
 0x189   : > { %v1110_v46 = vmax.f32 %v1086_v47, 0.0  ;;  %v1398_v51 = vor.u32 %v1397_v41, %v1394_v10  ;;  %6649 = vst [vmem:[%s8330_s13 + $0x18] sm:$0xff] %v6645_v16   ;;  %v5924_v19 = vrot.slane %v8395_v17, 9  ;;  %v1618_v23 = vrot.slane %v8455_v8, 5 }
 0x18a   : > { %v8460_v39 = vsel %vm8324_vm10, %v1241_v14, %v1320_v38  ;;  %v1324_v11 = vsel %vm8338_vm1, %v1242_v12, %v1323_v9  ;;  %v1246_v28 = vrot.slane %v1244_v53, 7  ;;  %v1403_v15 = vrot.slane %v1401_v21, 5 }
 0x18b   : > { %1322 = vst [vmem:[#allocation6 + $0x60] sm:$0xff] %v8460_v39  ;;  %1325 = vst [vmem:[#allocation6 + $0x68] sm:$0x11] %v1324_v11  ;;  %v6602_v4 = vpack.c.bf16 %v1111_v18, %v1110_v46  ;;  %v1399_v55 = vrot.slane %v1398_v51, 4  ;;  %v1406_v24 = vshrl.u32 %v8368_v54, 16  ;;  %v1409_v22 = vshll.u32 %v8368_v54, 16 }
 0x18c   : > { %1370 = vst.msk [vmem:[%s8071_s12 + $0x60] sm:$0xff] %vm8059_vm6, %v8460_v39  ;;  %v1249_v44 = vor.u32 %v1247_v45, %v1246_v28  ;;  %v1250_v25 = vrot.slane %v1246_v28, 4  ;;  %v1347_v18 = vld [vmem:[#allocation6 + $0x48] sm:$0x11]  ;;  %v1619_v48 = vsel %vm8183_vm15, %v5924_v19, %v1618_v23  ;;  %v1415_v50 = vshll.u32 %v8417_v35, 16  ;;  %v1645_v19 = vpop.permute.xlu0 %1644 }
 0x18d   : > { %v1252_v37 = vshrl.u32 %v6602_v4, 16  ;;  %v1255_v5 = vshll.u32 %v6602_v4, 16  ;;  %v1404_v29 = vsel %vm8112_vm9, %v1399_v55, %v1403_v15  ;;  %v1408_v57 = vrot.slane %v1406_v24, 4  ;;  %1650 = vrot.lane.b32.xlu1 %v1619_v48, %s7575_s18  ;;  %v1349_v62 = vld [vmem:[#allocation6 + $0x58] sm:$0x11] }
 0x18e   : > { %v1411_v36 = vrot.slane %v1409_v22, 5  ;;  %v8483_v33 = vsel %vm8324_vm10, %v1249_v44, %v1326_v34  ;;  %v1330_v54 = vsel %vm8338_vm1, %v1250_v25, %v1329_v13  ;;  %1519 = vrot.lane.b32.xlu0 %v1404_v29, %s7576_s19  ;;  %v5925_v40 = vrot.slane %v8412_v43, 9 }
 0x18f   : > { %v1254_v60 = vrot.slane %v1252_v37, 7  ;;  %1328 = vst [vmem:[#allocation6 + $0x70] sm:$0xff] %v8483_v33  ;;  %1331 = vst [vmem:[#allocation6 + $0x78] sm:$0x11] %v1330_v54  ;;  %v1622_v7 = vrot.slane %v1347_v18, 5  ;;  %v1420_v2 = vshrl.u32 %v8395_v17, 16 }
 0x190   : > { %v1412_v26 = vor.u32 %v1411_v36, %v1408_v57  ;;  %1371 = vst.msk [vmem:[%s8071_s12 + $0x70] sm:$0xff] %vm8059_vm6, %v8483_v33  ;;  %v1417_v20 = vrot.slane %v1415_v50, 5  ;;  %v1423_v35 = vshll.u32 %v8395_v17, 16  ;;  %v1429_v38 = vshll.u32 %v8455_v8, 16 }
 0x191   : > { %v1257_v1 = vor.u32 %v1255_v5, %v1254_v60  ;;  %v1258_v32 = vrot.slane %v1254_v60, 4  ;;  %v1623_v31 = vsel %vm8183_vm15, %v5925_v40, %v1622_v7  ;;  %v1422_v49 = vrot.slane %v1420_v2, 4  ;;  %v1518_v40 = vpop.permute.xlu0 %1517 }
 0x192   : > { %v1413_v6 = vrot.slane %v1412_v26, 4  ;;  %1652 = vrot.lane.b32.xlu0 %v1623_v31, %s7575_s18  ;;  %v1425_v63 = vrot.slane %v1423_v35, 5  ;;  %v1434_v17 = vshrl.u32 %v8412_v43, 16  ;;  %v1437_v10 = vshll.u32 %v8412_v43, 16  ;;  %v1351_v45 = vld [vmem:[#allocation6 + $0x68] sm:$0x11] }
 0x193   : > { %v8503_v9 = vsel %vm8324_vm10, %v1257_v1, %v1332_v61  ;;  %v1336_v27 = vsel %vm8338_vm1, %v1258_v32, %v1335_v52  ;;  %v1443_v14 = vshll.u32 %v1347_v18, 16  ;;  %v1431_v12 = vrot.slane %v1429_v38, 5 }
 0x194   : > { %1334 = vst [vmem:[#allocation6 + $0x80] sm:$0xff] %v8503_v9  ;;  %1337 = vst [vmem:[#allocation6 + $0x88] sm:$0x11] %v1336_v27  ;;  %v1418_v47 = vsel %vm8112_vm9, %v1413_v6, %v1417_v20  ;;  %v1426_v42 = vor.u32 %v1425_v63, %v1422_v49  ;;  %v1436_v59 = vrot.slane %v1434_v17, 4  ;;  %v1439_v41 = vrot.slane %v1437_v10, 5  ;;  %v1536_v49 = vpop.permute.xlu1 %1535 }
 0x195   : > { %1372 = vst.msk [vmem:[%s8071_s12 + $0x80] sm:$0xff] %vm8059_vm6, %v8503_v9  ;;  %1521 = vrot.lane.b32.xlu1 %v1418_v47, %s7576_s19  ;;  %v1626_v53 = vrot.slane %v1349_v62, 5  ;;  %v1448_v16 = vshrl.u32 %v8433_v30, 16  ;;  %v1451_v46 = vshll.u32 %v8433_v30, 16  ;;  %v1445_v11 = vrot.slane %v1443_v14, 5 }
 0x196   : > { %v1427_v8 = vrot.slane %v1426_v42, 4  ;;  %v1440_v43 = vor.u32 %v1439_v41, %v1436_v59  ;;  %v1457_v51 = vshll.u32 %v1349_v62, 16  ;;  %v1462_v0 = vshrl.u32 %v8460_v39, 16  ;;  %v1353_v36 = vld [vmem:[#allocation6 + $0x78] sm:$0x11] }
 0x197   : > { %v1450_v28 = vrot.slane %v1448_v16, 4  ;;  %v1453_v34 = vrot.slane %v1451_v46, 5  ;;  %v1465_v4 = vshll.u32 %v8460_v39, 16  ;;  %v1630_v13 = vrot.slane %v1351_v45, 5 }
 0x198   : > { %v1432_v21 = vsel %vm8112_vm9, %v1427_v8, %v1431_v12  ;;  %v1441_v23 = vrot.slane %v1440_v43, 4  ;;  %v1464_v55 = vrot.slane %v1462_v0, 4  ;;  %v5926_v15 = vrot.slane %v8433_v30, 9 }
 0x199   : > { %1523 = vrot.lane.b32.xlu1 %v1432_v21, %s7576_s19  ;;  %v5927_v24 = vrot.slane %v8460_v39, 9  ;;  %v1454_v22 = vor.u32 %v1453_v34, %v1450_v28  ;;  %v1467_v44 = vrot.slane %v1465_v4, 5  ;;  %v1471_v37 = vshll.u32 %v1351_v45, 16 }
 0x19a   : > { %v1446_v25 = vsel %vm8112_vm9, %v1441_v23, %v1445_v11  ;;  %v1476_v5 = vshrl.u32 %v8483_v33, 16  ;;  %v1479_v18 = vshll.u32 %v8483_v33, 16  ;;  %v1627_v48 = vsel %vm8183_vm15, %v5926_v15, %v1626_v53 }
 0x19b   : > { %v1355_v29 = vld [vmem:[#allocation6 + $0x88] sm:$0x11]  ;;  %1525 = vrot.lane.b32.xlu0 %v1446_v25, %s7576_s19  ;;  %v1459_v57 = vrot.slane %v1457_v51, 5  ;;  %v1468_v30 = vor.u32 %v1467_v44, %v1464_v55  ;;  %vm1695_vm6 = vcmask 1043968   ;;  %v1631_v39 = vsel %vm8183_vm15, %v5927_v24, %v1630_v13 }
 0x19c   : > { %v1490_v54 = vshrl.u32 %v8503_v9, 16  ;;  %v1493_v60 = vshll.u32 %v8503_v9, 16  ;;  %v1455_v50 = vrot.slane %v1454_v22, 4  ;;  %v1478_v61 = vrot.slane %v1476_v5, 4  ;;  %vm8553_vm11 = vmor %vm1696_vm7, %vm1695_vm6 }
 0x19d   : > { %1654 = vrot.lane.b32.xlu1 %v1627_v48, %s7575_s18  ;;  %v1481_v52 = vrot.slane %v1479_v18, 5  ;;  %v1499_v26 = vshll.u32 %v1355_v29, 16  ;;  %v1473_v7 = vrot.slane %v1471_v37, 5  ;;  %v1634_v2 = vrot.slane %v1353_v36, 5 }
 0x19e   : > { %v1492_v1 = vrot.slane %v1490_v54, 4  ;;  %v1495_v32 = vrot.slane %v1493_v60, 5  ;;  %v1460_v20 = vsel %vm8112_vm9, %v1455_v50, %v1459_v57  ;;  %v1469_v35 = vrot.slane %v1468_v30, 4 }
 0x19f   : > { %1656 = vrot.lane.b32.xlu0 %v1631_v39, %s7575_s18  ;;  %v1485_v6 = vshll.u32 %v1353_v36, 16  ;;  %v1664_v31 = vrot.slane %v1645_v19, 4  ;;  %v1501_v27 = vrot.slane %v1499_v26, 5  ;;  %v1546_v17 = vrot.slane %v1536_v49, 4 }
 0x1a0   : > { %v1496_v38 = vor.u32 %v1495_v32, %v1492_v1  ;;  %v1537_v47 = vrot.slane %v1518_v40, 4  ;;  %v5928_v10 = vrot.slane %v8483_v33, 9  ;;  %v1482_v14 = vor.u32 %v1481_v52, %v1478_v61 }
 0x1a1   : > { %1527 = vrot.lane.b32.xlu1 %v1460_v20, %s7576_s19  ;;  %v1675_v62 = vsel %vm1674_vm14, %v1664_v31, %v1645_v19  ;;  %v1474_v12 = vsel %vm8112_vm9, %v1469_v35, %v1473_v7  ;;  %v1557_v41 = vsel %vm1547_vm4, %v1546_v17, %v1536_v49  ;;  %v1487_v53 = vrot.slane %v1485_v6, 5 }
 0x1a2   : > { %v1497_v59 = vrot.slane %v1496_v38, 4  ;;  %v1548_v8 = vsel %vm1547_vm4, %v1537_v47, %v1518_v40  ;;  %v1635_v33 = vsel %vm8183_vm15, %v5928_v10, %v1634_v2  ;;  %1580 = vst.msk [vmem:[%s8071_s12 + $0x94] sm:$0xff] %vm8545_vm8, %v1557_v41  ;;  %v1483_v16 = vrot.slane %v1482_v14, 4 }
 0x1a3   : > { %1529 = vrot.lane.b32.xlu0 %v1474_v12, %s7576_s19  ;;  %1571 = vst.msk [vmem:[%s8071_s12 + $0x4] sm:$0xff] %vm8545_vm8, %v1548_v8  ;;  %v1638_v46 = vrot.slane %v1355_v29, 5  ;;  %v5929_v11 = vrot.slane %v8503_v9, 9 }
 0x1a4   : > { %v1502_v45 = vsel %vm8112_vm9, %v1497_v59, %v1501_v27  ;;  %1698 = vst.msk [vmem:[%s8071_s12 + $0x8] sm:$0xff] %vm8553_vm11, %v1675_v62  ;;  %v1488_v43 = vsel %vm8112_vm9, %v1483_v16, %v1487_v53 }
 0x1a5   : > { %1658 = vrot.lane.b32.xlu1 %v1635_v33, %s7575_s18  ;;  %v1639_v51 = vsel %vm8183_vm15, %v5929_v11, %v1638_v46 }
 0x1a7   : > { %1533 = vrot.lane.b32.xlu0 %v1502_v45, %s7576_s19 }
 0x1a9   : > { %1531 = vrot.lane.b32.xlu1 %v1488_v43, %s7576_s19 }
 0x1ab   : > { %1660 = vrot.lane.b32.xlu0 %v1639_v51, %s7575_s18 }
 0x1ad   : > { %1662 = vrot.lane.b32.xlu1 %v8247_v58, %s7575_s18 }
 0x1f6   : > { %v1647_v3 = vpop.permute.xlu1 %1646 }
 0x1f7   : > { %v1665_v21 = vrot.slane %v1647_v3, 4 }
 0x1f9   : > { %v1676_v9 = vsel %vm1674_vm14, %v1665_v21, %v1647_v3 }
 0x1fa   : > { %v1649_v0 = vpop.permute.xlu0 %1648 }
 0x1fb   : > { %v1666_v56 = vrot.slane %v1649_v0, 4 }
 0x1fd   : > { %v1677_v15 = vsel %vm1674_vm14, %v1666_v56, %v1649_v0 }
 0x1ff   : > { %v1651_v34 = vpop.permute.xlu1 %1650 }
 0x200   : > { %v1520_v28 = vpop.permute.xlu0 %1519  ;;  %v1667_v24 = vrot.slane %v1651_v34, 4 }
 0x201   : > { %v1538_v4 = vrot.slane %v1520_v28, 4 }
 0x202   : > { %v1678_v18 = vsel %vm1674_vm14, %v1667_v24, %v1651_v34 }
 0x203   : > { %v1549_v19 = vsel %vm1547_vm4, %v1538_v4, %v1520_v28 }
 0x204   : > { %1572 = vst.msk [vmem:[%s8071_s12 + $0x14] sm:$0xff] %vm8545_vm8, %v1549_v19  ;;  %v1653_v13 = vpop.permute.xlu0 %1652 }
 0x205   : > { %1699 = vst.msk [vmem:[%s8071_s12 + $0x18] sm:$0xff] %vm8553_vm11, %v1676_v9  ;;  %v1668_v25 = vrot.slane %v1653_v13, 4 }
 0x207   : > { %v1522_v58 = vpop.permute.xlu1 %1521  ;;  %v1679_v30 = vsel %vm1674_vm14, %v1668_v25, %v1653_v13 }
 0x208   : > { %v1539_v23 = vrot.slane %v1522_v58, 4 }
 0x20a   : > { %v1550_v55 = vsel %vm1547_vm4, %v1539_v23, %v1522_v58 }
 0x20b   : > { %1573 = vst.msk [vmem:[%s8071_s12 + $0x24] sm:$0xff] %vm8545_vm8, %v1550_v55  ;;  %v1524_v22 = vpop.permute.xlu1 %1523 }
 0x20c   : > { %1700 = vst.msk [vmem:[%s8071_s12 + $0x28] sm:$0xff] %vm8553_vm11, %v1677_v15  ;;  %v1540_v44 = vrot.slane %v1524_v22, 4 }
 0x20d   : > { %v1526_v5 = vpop.permute.xlu0 %1525 }
 0x20e   : > { %v1551_v37 = vsel %vm1547_vm4, %v1540_v44, %v1524_v22  ;;  %v1541_v29 = vrot.slane %v1526_v5, 4 }
 0x20f   : > { %1574 = vst.msk [vmem:[%s8071_s12 + $0x34] sm:$0xff] %vm8545_vm8, %v1551_v37  ;;  %v1655_v48 = vpop.permute.xlu1 %1654 }
 0x210   : > { %1701 = vst.msk [vmem:[%s8071_s12 + $0x38] sm:$0xff] %vm8553_vm11, %v1678_v18  ;;  %v1552_v57 = vsel %vm1547_vm4, %v1541_v29, %v1526_v5  ;;  %v1669_v39 = vrot.slane %v1655_v48, 4 }
 0x211   : > { %1575 = vst.msk [vmem:[%s8071_s12 + $0x44] sm:$0xff] %vm8545_vm8, %v1552_v57  ;;  %v1657_v36 = vpop.permute.xlu0 %1656 }
 0x212   : > { %1702 = vst.msk [vmem:[%s8071_s12 + $0x48] sm:$0xff] %vm8553_vm11, %v1679_v30  ;;  %v1670_v50 = vrot.slane %v1657_v36, 4  ;;  %v1680_v26 = vsel %vm1674_vm14, %v1669_v39, %v1655_v48 }
 0x213   : > { %v1528_v54 = vpop.permute.xlu1 %1527 }
 0x214   : > { %v1542_v60 = vrot.slane %v1528_v54, 4  ;;  %v1681_v1 = vsel %vm1674_vm14, %v1670_v50, %v1657_v36 }
 0x215   : > { %v1530_v52 = vpop.permute.xlu0 %1529 }
 0x216   : > { %v1553_v61 = vsel %vm1547_vm4, %v1542_v60, %v1528_v54  ;;  %v1543_v40 = vrot.slane %v1530_v52, 4 }
 0x217   : > { %1576 = vst.msk [vmem:[%s8071_s12 + $0x54] sm:$0xff] %vm8545_vm8, %v1553_v61  ;;  %v1659_v7 = vpop.permute.xlu1 %1658 }
 0x218   : > { %1703 = vst.msk [vmem:[%s8071_s12 + $0x58] sm:$0xff] %vm8553_vm11, %v1680_v26  ;;  %v1554_v2 = vsel %vm1547_vm4, %v1543_v40, %v1530_v52  ;;  %v1671_v20 = vrot.slane %v1659_v7, 4 }
 0x219   : > { %1577 = vst.msk [vmem:[%s8071_s12 + $0x64] sm:$0xff] %vm8545_vm8, %v1554_v2  ;;  %v1534_v32 = vpop.permute.xlu0 %1533 }
 0x21a   : > { %1704 = vst.msk [vmem:[%s8071_s12 + $0x68] sm:$0xff] %vm8553_vm11, %v1681_v1  ;;  %v1545_v6 = vrot.slane %v1534_v32, 4  ;;  %v1682_v17 = vsel %vm1674_vm14, %v1671_v20, %v1659_v7 }
 0x21b   : > { %v1532_v35 = vpop.permute.xlu1 %1531 }
 0x21c   : > { %v1544_v31 = vrot.slane %v1532_v35, 4  ;;  %v1556_v49 = vsel %vm1547_vm4, %v1545_v6, %v1534_v32 }
 0x21d   : > { %1579 = vst.msk [vmem:[%s8071_s12 + $0x84] sm:$0xff] %vm8545_vm8, %v1556_v49  ;;  %v1661_v27 = vpop.permute.xlu0 %1660 }
 0x21e   : > { %v1555_v38 = vsel %vm1547_vm4, %v1544_v31, %v1532_v35  ;;  %v1672_v10 = vrot.slane %v1661_v27, 4 }
 0x21f   : > { %1578 = vst.msk [vmem:[%s8071_s12 + $0x74] sm:$0xff] %vm8545_vm8, %v1555_v38  ;;  %v1663_v47 = vpop.permute.xlu1 %1662 }
 0x220   : > { %1705 = vst.msk [vmem:[%s8071_s12 + $0x78] sm:$0xff] %vm8553_vm11, %v1682_v17  ;;  %v1673_v14 = vrot.slane %v1663_v47, 4  ;;  %v1683_v62 = vsel %vm1674_vm14, %v1672_v10, %v1661_v27 }
 0x221   : > { %1706 = vst.msk [vmem:[%s8071_s12 + $0x88] sm:$0xff] %vm8553_vm11, %v1683_v62 }
 0x222   : > { %v1684_v12 = vsel %vm1674_vm14, %v1673_v14, %v1663_v47 }
 0x223   : > { %1707 = vst.msk [vmem:[%s8071_s12 + $0x98] sm:$0xff] %vm8553_vm11, %v1684_v12 }
 0x224 PF: > { %s2130_s24 = sadd.s32 %s7546_s30, %s7550_s9 }
 0x225   : > { %s5943_s17 = sadd.s32 4294967295, %s2130_s24 }
 0x226   : > { %p2132_p1 = scmp.ge.s32.totalorder %s5943_s17, 0  ;;  %p2133_p3 = scmp.lt.s32.totalorder %s5943_s17, 4 }
 0x228   : > { %p2134_p4 = pnand %p2133_p3, %p2132_p1 }
 0x22a   : > { %2137 = sbr.rel (%p2134_p4) target bundleno = 1113 (0x459), region = 68 }
 0x22f   : > { %s6606_s18 = smul.u32 2160, %s7546_s30  ;;  %s8657_s19 = sadd.s32 2, %s2130_s24  ;;  %vm2979_vm9 = vcmask 785408  }
 0x230   : > { %s2140_s15 = ssub.s32 0, %s8657_s19  ;;  %p2139_p5 = scmp.lt.s32.totalorder %s8657_s19, 0 }
 0x231   : > { %s8663_s12 = scalar_lea.vmem %s9787_s4, %s6606_s18  ;;  %s5944_s11 = smin.u32 %s2140_s15, %s8657_s19 }
 0x232   : > { %v7039_v63 = vld [vmem:[%s8663_s12 + $0x37c] ss:$12 sps:$4 sm:$0xff]   ;;  %7435 = sdivrem.u32 %s5944_s11, 3  ;;  %v7043_v59 = vld [vmem:[%s8663_s12 + $0x378] ss:$12 sps:$4 sm:$0xff]  }
 0x233   : > { %v7041_v42 = vld [vmem:[%s8663_s12 + $0x4fc] ss:$12 sps:$4 sm:$0xff]   ;;  %2992 = vmatprep.subr.bf16.mxu0 %v7039_v63  ;;  %v7044_v41 = vld [vmem:[%s8663_s12 + $0x4f8] ss:$12 sps:$4 sm:$0xff]   ;;  %v7049_v53 = vld [vmem:[%s8663_s12 + $0x360] ss:$12 sps:$4 sm:$0xff]  }
 0x234   : > { %3065 = vmatprep.subr.bf16.mxu1 %v7041_v42  ;;  %v7045_v8 = vld [vmem:[%s8663_s12 + $0x364] ss:$12 sps:$4 sm:$0xff]   ;;  %2993 = vmatpush1.bf16.msra.mxu0 %v7043_v59  ;;  %v7050_v45 = vld [vmem:[%s8663_s12 + $0x4e0] ss:$12 sps:$4 sm:$0xff]   ;;  %v7055_v43 = vld [vmem:[%s8663_s12 + $0x348] ss:$12 sps:$4 sm:$0xff]  }
 0x235   : > { %3066 = vmatpush1.bf16.msra.mxu1 %v7044_v41  ;;  %v7047_v33 = vld [vmem:[%s8663_s12 + $0x4e4] ss:$12 sps:$4 sm:$0xff]   ;;  %2994 = vmatprep.subr.bf16.mxu0 %v7045_v8  ;;  %v7051_v16 = vld [vmem:[%s8663_s12 + $0x34c] ss:$12 sps:$4 sm:$0xff]   ;;  %v7056_v11 = vld [vmem:[%s8663_s12 + $0x4c8] ss:$12 sps:$4 sm:$0xff]  }
 0x236   : > { %3067 = vmatprep.subr.bf16.mxu1 %v7047_v33  ;;  %v7053_v46 = vld [vmem:[%s8663_s12 + $0x4cc] ss:$12 sps:$4 sm:$0xff]   ;;  %v7057_v51 = vld [vmem:[%s8663_s12 + $0x334] ss:$12 sps:$4 sm:$0xff]   ;;  %v7061_v3 = vld [vmem:[%s8663_s12 + $0x330] ss:$12 sps:$4 sm:$0xff]  }
 0x237   : > { %v7059_v0 = vld [vmem:[%s8663_s12 + $0x4b4] ss:$12 sps:$4 sm:$0xff]   ;;  %v7062_v21 = vld [vmem:[%s8663_s12 + $0x4b0] ss:$12 sps:$4 sm:$0xff]   ;;  %v7067_v4 = vld [vmem:[%s8663_s12 + $0x318] ss:$12 sps:$4 sm:$0xff]  }
 0x238   : > { %2995 = vmatpush1.bf16.msra.mxu0 %v7049_v53  ;;  %v7063_v28 = vld [vmem:[%s8663_s12 + $0x31c] ss:$12 sps:$4 sm:$0xff]   ;;  %v7068_v19 = vld [vmem:[%s8663_s12 + $0x498] ss:$12 sps:$4 sm:$0xff]   ;;  %v7073_v58 = vld [vmem:[%s8663_s12 + $0x300] ss:$12 sps:$4 sm:$0xff]  }
 0x239   : > { %3068 = vmatpush1.bf16.msra.mxu1 %v7050_v45  ;;  %2996 = vmatprep.subr.bf16.mxu0 %v7051_v16  ;;  %v7065_v34 = vld [vmem:[%s8663_s12 + $0x49c] ss:$12 sps:$4 sm:$0xff]   ;;  %v7069_v9 = vld [vmem:[%s8663_s12 + $0x304] ss:$12 sps:$4 sm:$0xff]   ;;  %v7074_v23 = vld [vmem:[%s8663_s12 + $0x480] ss:$12 sps:$4 sm:$0xff]  }
 0x23a   : > { %3069 = vmatprep.subr.bf16.mxu1 %v7053_v46  ;;  %v7071_v56 = vld [vmem:[%s8663_s12 + $0x484] ss:$12 sps:$4 sm:$0xff]   ;;  %v7075_v13 = vld [vmem:[%s8663_s12 + $0x2ec] ss:$12 sps:$4 sm:$0xff]   ;;  %v7079_v15 = vld [vmem:[%s8663_s12 + $0x2e8] ss:$12 sps:$4 sm:$0xff]  }
 0x23b   : > { %s7436_s25 = spop.drf %7435  ;;  %v7077_v55 = vld [vmem:[%s8663_s12 + $0x46c] ss:$12 sps:$4 sm:$0xff]   ;;  %v7080_v24 = vld [vmem:[%s8663_s12 + $0x468] ss:$12 sps:$4 sm:$0xff]   ;;  %v7085_v25 = vld [vmem:[%s8663_s12 + $0x2d0] ss:$12 sps:$4 sm:$0xff]  }
 0x23c   : > { %2997 = vmatpush1.bf16.msra.mxu0 %v7055_v43  ;;  %s2144_s13 = ssub.s32 0, %s7436_s25  ;;  %v7081_v22 = vld [vmem:[%s8663_s12 + $0x2d4] ss:$12 sps:$4 sm:$0xff]   ;;  %v7086_v37 = vld [vmem:[%s8663_s12 + $0x450] ss:$12 sps:$4 sm:$0xff]  }
 0x23d   : > { %3070 = vmatpush1.bf16.msra.mxu1 %v7056_v11  ;;  %2998 = vmatprep.subr.bf16.mxu0 %v7057_v51  ;;  %s9910_s13 = smov (!%p2139_p5, %s2144_s13), %s7436_s25  ;;  %v7083_v44 = vld [vmem:[%s8663_s12 + $0x454] ss:$12 sps:$4 sm:$0xff]   ;;  %v7087_v5 = vld [vmem:[%s8663_s12 + $0x43c] ss:$12 sps:$4 sm:$0xff]   ;;  %v7089_v18 = vld [vmem:[%s8663_s12 + $0x58c] ss:$12 sps:$4 sm:$0xff]  }
 0x23e   : > { %3071 = vmatprep.subr.bf16.mxu1 %v7059_v0  ;;  %p5946_p8 = scmp.lt.s32.totalorder %s9910_s13, 0  ;;  %s2150_s24 = sadd.s32 3, %s9910_s13  ;;  %v7091_v29 = vld [vmem:[%s8663_s12 + $0x438] ss:$12 sps:$4 sm:$0xff]   ;;  %v7092_v48 = vld [vmem:[%s8663_s12 + $0x588] ss:$12 sps:$4 sm:$0xff]  }
 0x23f   : > { %v7093_v57 = vld [vmem:[%s8663_s12 + $0x424] ss:$12 sps:$4 sm:$0xff]   ;;  %v7095_v30 = vld [vmem:[%s8663_s12 + $0x574] ss:$12 sps:$4 sm:$0xff]   ;;  %v7099_v54 = vld [vmem:[%s8663_s12 + $0x40c] ss:$12 sps:$4 sm:$0xff]  }
 0x240   : > { %2999 = vmatpush1.bf16.msra.mxu0 %v7061_v3  ;;  %s9912_s24 = smov (!%p5946_p8, %s2150_s24), %s9910_s13  ;;  %v7097_v36 = vld [vmem:[%s8663_s12 + $0x420] ss:$12 sps:$4 sm:$0xff]   ;;  %v7098_v39 = vld [vmem:[%s8663_s12 + $0x570] ss:$12 sps:$4 sm:$0xff]   ;;  %v7103_v52 = vld [vmem:[%s8663_s12 + $0x408] ss:$12 sps:$4 sm:$0xff]  }
 0x241   : > { %3072 = vmatpush1.bf16.msra.mxu1 %v7062_v21  ;;  %3000 = vmatprep.subr.bf16.mxu0 %v7063_v28  ;;  %s6605_s17 = smul.u32 160, %s9912_s24  ;;  %v7101_v60 = vld [vmem:[%s8663_s12 + $0x55c] ss:$12 sps:$4 sm:$0xff]   ;;  %v7104_v40 = vld [vmem:[%s8663_s12 + $0x558] ss:$12 sps:$4 sm:$0xff]  }
 0x242   : > { %3073 = vmatprep.subr.bf16.mxu1 %v7065_v34  ;;  %v7105_v7 = vld [vmem:[%s8663_s12 + $0x3f4] ss:$12 sps:$4 sm:$0xff]   ;;  %v7107_v2 = vld [vmem:[%s8663_s12 + $0x544] ss:$12 sps:$4 sm:$0xff]   ;;  %v7111_v6 = vld [vmem:[%s8663_s12 + $0x3dc] ss:$12 sps:$4 sm:$0xff]  }
 0x243   : > { %s8709_s18 = scalar_lea.vmem [#allocation3], %s6605_s17  ;;  %v7109_v1 = vld [vmem:[%s8663_s12 + $0x3f0] ss:$12 sps:$4 sm:$0xff]   ;;  %v7110_v32 = vld [vmem:[%s8663_s12 + $0x540] ss:$12 sps:$4 sm:$0xff]  }
 0x244   : > { %3001 = vmatpush1.bf16.msra.mxu0 %v7067_v4  ;;  %v2158_v50 = vld [vmem:[%s8709_s18 + $0x18] sm:$0xff]  ;;  %v2160_v61 = vld [vmem:[%s8709_s18 + $0x28] sm:$0xff]  ;;  %v8724_v20 = vld [vmem:[%s8709_s18 + $0x10] sm:$0xff] }
 0x245   : > { %3074 = vmatpush1.bf16.msra.mxu1 %v7068_v19  ;;  %3002 = vmatprep.subr.bf16.mxu0 %v7069_v9  ;;  %v8714_v26 = vcombine.high %v2158_v50, %v2160_v61  ;;  %v8727_v35 = vld [vmem:[%s8709_s18 + $0x20] sm:$0xff]  ;;  %v7113_v49 = vld [vmem:[%s8663_s12 + $0x52c] ss:$12 sps:$4 sm:$0xff]   ;;  %v7116_v27 = vld [vmem:[%s8663_s12 + $0x528] ss:$12 sps:$4 sm:$0xff]   ;;  %v8750_v8 = vcombine.low %v2158_v50, %v2160_v61 }
 0x246   : > { %3075 = vmatprep.subr.bf16.mxu1 %v7071_v56  ;;  %v8732_v31 = vcombine.high %v8724_v20, %v8727_v35  ;;  %v7115_v38 = vld [vmem:[%s8663_s12 + $0x3d8] ss:$12 sps:$4 sm:$0xff]   ;;  %v7119_v47 = vld [vmem:[%s8663_s12 + $0x514] ss:$12 sps:$4 sm:$0xff]   ;;  %v7122_v14 = vld [vmem:[%s8663_s12 + $0x510] ss:$12 sps:$4 sm:$0xff]  }
 0x247   : > { %6177 = vmatprep.mubr.msk.bf16.mxu1 %vm2979_vm9, %v8714_v26  ;;  %v7117_v17 = vld [vmem:[%s8663_s12 + $0x3c4] ss:$12 sps:$4 sm:$0xff]   ;;  %v7121_v10 = vld [vmem:[%s8663_s12 + $0x3c0] ss:$12 sps:$4 sm:$0xff]   ;;  %v2162_v62 = vld [vmem:[%s8709_s18 + $0x38] sm:$0xff] }
 0x248   : > { %3003 = vmatpush1.bf16.msra.mxu0 %v7073_v58  ;;  %3024 = vmatprep.mubr.bf16.mxu0 %v8732_v31  ;;  %v7123_v12 = vld [vmem:[%s8663_s12 + $0x3ac] ss:$12 sps:$4 sm:$0xff]   ;;  %v8745_v42 = vcombine.high %v2160_v61, %v2162_v62  ;;  %v8747_v59 = vcombine.low %v2160_v61, %v2162_v62  ;;  %v7126_v41 = vld [vmem:[%s8663_s12 + $0xa8] ss:$12 sps:$4 sm:$0xff]   ;;  %v7133_v43 = vld [vmem:[%s8663_s12 + $0x90] ss:$12 sps:$4 sm:$0xff]   ;;  %v8779_v58 = vcombine.low %v8724_v20, %v8727_v35 }
 0x249   : > { %3076 = vmatpush1.bf16.msra.mxu1 %v7074_v23  ;;  %3004 = vmatprep.subr.bf16.mxu0 %v7075_v13  ;;  %v7128_v63 = vld [vmem:[%s8663_s12 + $0xac] ss:$12 sps:$4 sm:$0xff]   ;;  %v7129_v53 = vld [vmem:[%s8663_s12 + $0x3a8] ss:$12 sps:$4 sm:$0xff]   ;;  %v7136_v11 = vld [vmem:[%s8663_s12 + $0x390] ss:$12 sps:$4 sm:$0xff]  }
 0x24a   : > { %3077 = vmatprep.subr.bf16.mxu1 %v7077_v55  ;;  %v2164_v33 = vld [vmem:[%s8709_s18 + $0x48] sm:$0xff]  ;;  %v7131_v45 = vld [vmem:[%s8663_s12 + $0x394] ss:$12 sps:$4 sm:$0xff]   ;;  %v2166_v51 = vld [vmem:[%s8709_s18 + $0x58] sm:$0xff] }
 0x24b   : > { %v7135_v16 = vld [vmem:[%s8663_s12 + $0x94] ss:$12 sps:$4 sm:$0xff]   ;;  %v8756_v46 = vcombine.high %v2162_v62, %v2164_v33  ;;  %v7142_v3 = vld [vmem:[%s8663_s12 + $0x7c] ss:$12 sps:$4 sm:$0xff]   ;;  %v8764_v21 = vcombine.high %v2164_v33, %v2166_v51  ;;  %v8766_v28 = vcombine.low %v2164_v33, %v2166_v51  ;;  %v7140_v34 = vld [vmem:[%s8663_s12 + $0x78] ss:$12 sps:$4 sm:$0xff]   ;;  %v8784_v13 = vcombine.low %v2162_v62, %v2164_v33 }
 0x24c   : > { %3005 = vmatpush1.bf16.msra.mxu0 %v7079_v15  ;;  %v7139_v0 = vld [vmem:[%s8663_s12 + $0x440] ss:$12 sps:$4 sm:$0xff]   ;;  %v7144_v19 = vld [vmem:[%s8663_s12 + $0x428] ss:$12 sps:$4 sm:$0xff]   ;;  %v7147_v9 = vld [vmem:[%s8663_s12 + $0x64] ss:$12 sps:$4 sm:$0xff]  }
 0x24d   : > { %3078 = vmatpush1.bf16.msra.mxu1 %v7080_v24  ;;  %3006 = vmatprep.subr.bf16.mxu0 %v7081_v22  ;;  %v7143_v4 = vld [vmem:[%s8663_s12 + $0x380] ss:$12 sps:$4 sm:$0xff]   ;;  %v8775_v56 = vld [vmem:[%s8709_s18 + $0x30] sm:$0xff]  ;;  %v2170_v22 = vld [vmem:[%s8709_s18 + $0x78] sm:$0xff] }
 0x24e   : > { %3079 = vmatprep.subr.bf16.mxu1 %v7083_v44  ;;  %v8782_v23 = vld [vmem:[%s8709_s18 + $0x40] sm:$0xff]  ;;  %v2168_v55 = vld [vmem:[%s8709_s18 + $0x68] sm:$0xff] }
 0x24f   : > { %v7145_v15 = vld [vmem:[%s8663_s12 + $0x60] ss:$12 sps:$4 sm:$0xff]   ;;  %v7148_v24 = vld [vmem:[%s8663_s12 + $0x368] ss:$12 sps:$4 sm:$0xff]   ;;  %v8794_v44 = vcombine.high %v8775_v56, %v8782_v23  ;;  %v8821_v50 = vcombine.low %v2166_v51, %v2168_v55 }
 0x250   : > { %3007 = vmatpush1.bf16.msra.mxu0 %v7085_v25  ;;  %v7153_v25 = vld [vmem:[%s8663_s12 + $0x410] ss:$12 sps:$4 sm:$0xff]   ;;  %v2172_v61 = vld [vmem:[%s8709_s18 + $0x88] sm:$0xff] }
 0x251   : > { %3080 = vmatpush1.bf16.msra.mxu1 %v7086_v37  ;;  %3008 = vmatprep.subr.bf16.mxu0 %v7087_v5  ;;  %v8797_v37 = vcombine.high %v2166_v51, %v2168_v55  ;;  %v7156_v5 = vld [vmem:[%s8663_s12 + $0x4c] ss:$12 sps:$4 sm:$0xff]   ;;  %v7189_v51 = vld [vmem:[%s8663_s12 + $0x154] ss:$12 sps:$4 sm:$0xff]  }
 0x252   : > { %3085 = vmatprep.subr.bf16.mxu1 %v7089_v18  ;;  %v8800_v18 = vcombine.high %v2168_v55, %v2170_v22  ;;  %v7173_v62 = vld [vmem:[%s8663_s12] ss:$12 sps:$4 sm:$0xff]  }
 0x253   : > { %v7184_v33 = vld [vmem:[%s8663_s12 + $0x16c] ss:$12 sps:$4 sm:$0xff]  }
 0x254   : > { %3009 = vmatpush2.bf16.msra.mxu0 %v7091_v29  ;;  %v8802_v29 = vcombine.low %v2168_v55, %v2170_v22  ;;  %v7577_v55 = vmov 0  }
 0x255   : > { %3086 = vmatpush2.bf16.msra.mxu1 %v7092_v48  ;;  %3010 = vmatprep.subr.bf16.mxu0 %v7093_v57  ;;  %v7154_v48 = vld [vmem:[%s8663_s12 + $0x48] ss:$12 sps:$4 sm:$0xff]   ;;  %v7157_v57 = vld [vmem:[%s8663_s12 + $0x350] ss:$12 sps:$4 sm:$0xff]  }
 0x256   : > { %3087 = vmatprep.subr.bf16.mxu1 %v7095_v30  ;;  %v7158_v30 = vld [vmem:[%s8663_s12 + $0x3f8] ss:$12 sps:$4 sm:$0xff]  }
 0x258   : > { %3011 = vmatpush2.bf16.msra.mxu0 %v7097_v36  ;;  %v7161_v36 = vld [vmem:[%s8663_s12 + $0x34] ss:$12 sps:$4 sm:$0xff]  }
 0x259   : > { %3088 = vmatpush2.bf16.msra.mxu1 %v7098_v39  ;;  %3012 = vmatprep.subr.bf16.mxu0 %v7099_v54  ;;  %v8812_v39 = vld [vmem:[%s8709_s18 + $0x50] sm:$0xff]  ;;  %v8816_v54 = vcombine.low %v8775_v56, %v8782_v23 }
 0x25a   : > { %3089 = vmatprep.subr.bf16.mxu1 %v7101_v60  ;;  %v8819_v60 = vld [vmem:[%s8709_s18 + $0x60] sm:$0xff] }
 0x25c   : > { %3013 = vmatpush2.bf16.msra.mxu0 %v7103_v52  ;;  %v7159_v52 = vld [vmem:[%s8663_s12 + $0x30] ss:$12 sps:$4 sm:$0xff]  }
 0x25d   : > { %3090 = vmatpush2.bf16.msra.mxu1 %v7104_v40  ;;  %3014 = vmatprep.subr.bf16.mxu0 %v7105_v7  ;;  %v7162_v40 = vld [vmem:[%s8663_s12 + $0x338] ss:$12 sps:$4 sm:$0xff]   ;;  %v8830_v7 = vcombine.high %v8812_v39, %v8819_v60 }
 0x25e   : > { %3091 = vmatprep.subr.bf16.mxu1 %v7107_v2  ;;  %v7167_v2 = vld [vmem:[%s8663_s12 + $0x3e0] ss:$12 sps:$4 sm:$0xff]  }
 0x260   : > { %3015 = vmatpush2.bf16.msra.mxu0 %v7109_v1  ;;  %v8833_v1 = vcombine.high %v2170_v22, %v2172_v61 }
 0x261   : > { %3092 = vmatpush2.bf16.msra.mxu1 %v7110_v32  ;;  %3016 = vmatprep.subr.bf16.mxu0 %v7111_v6  ;;  %v7170_v32 = vld [vmem:[%s8663_s12 + $0x1c] ss:$12 sps:$4 sm:$0xff]   ;;  %v7168_v6 = vld [vmem:[%s8663_s12 + $0x18] ss:$12 sps:$4 sm:$0xff]  }
 0x262   : > { %3093 = vmatprep.subr.bf16.mxu1 %v7113_v49  ;;  %v7171_v49 = vld [vmem:[%s8663_s12 + $0x320] ss:$12 sps:$4 sm:$0xff]  }
 0x264   : > { %3017 = vmatpush2.bf16.msra.mxu0 %v7115_v38  ;;  %v7172_v38 = vld [vmem:[%s8663_s12 + $0x3c8] ss:$12 sps:$4 sm:$0xff]  }
 0x265   : > { %3094 = vmatpush2.bf16.msra.mxu1 %v7116_v27  ;;  %3018 = vmatprep.subr.bf16.mxu0 %v7117_v17  ;;  %v7175_v27 = vld [vmem:[%s8663_s12 + $0x4] ss:$12 sps:$4 sm:$0xff]  }
 0x266   : > { %3095 = vmatprep.subr.bf16.mxu1 %v7119_v47  ;;  %v8844_v17 = vld [vmem:[%s8709_s18 + $0x70] sm:$0xff]  ;;  %v8848_v47 = vcombine.low %v8812_v39, %v8819_v60 }
 0x268   : > { %3019 = vmatpush2.bf16.msra.mxu0 %v7121_v10  ;;  %v2171_v10 = vld [vmem:[%s8709_s18 + $0x80] sm:$0xff] }
 0x269   : > { %3096 = vmatpush2.bf16.msra.mxu1 %v7122_v14  ;;  %3020 = vmatprep.subr.bf16.mxu0 %v7123_v12  ;;  %v8851_v14 = vcombine.low %v2170_v22, %v2172_v61  ;;  %v7176_v12 = vld [vmem:[%s8663_s12 + $0x308] ss:$12 sps:$4 sm:$0xff]   ;;  %v7201_v22 = vld [vmem:[%s8663_s12 + $0x10c] ss:$12 sps:$4 sm:$0xff]  }
 0x26a   : > { %3794 = vmatprep.subr.bf16.mxu1 %v7128_v63  ;;  %v8858_v63 = vcombine.high %v8844_v17, %v2171_v10  ;;  %v7211_v61 = vld [vmem:[%s8663_s12 + $0xc0] ss:$12 sps:$4 sm:$0xff]  }
 0x26c   : > { %3098 = vmatmul.mubr.bf16.vlgmr.msra.gmra.mxu1 %v8750_v8  ;;  %3021 = vmatpush2.bf16.msra.mxu0 %v7129_v53  ;;  %v7182_v53 = vld [vmem:[%s8663_s12 + $0x168] ss:$12 sps:$4 sm:$0xff]  }
 0x26d   : > { %3795 = vmatpush1.bf16.msra.mxu1 %v7126_v41  ;;  %3022 = vmatprep.subr.bf16.mxu0 %v7131_v45  ;;  %v7181_v41 = vld [vmem:[%s8663_s12 + $0x3b0] ss:$12 sps:$4 sm:$0xff]  }
 0x26e   : > { %3796 = vmatprep.subr.bf16.mxu1 %v7135_v16  ;;  %6178 = vmatprep.mubr.msk.bf16.mxu1 %vm2979_vm9, %v8756_v46  ;;  %v7185_v45 = vld [vmem:[%s8663_s12 + $0x2f0] ss:$12 sps:$4 sm:$0xff]   ;;  %v7186_v16 = vld [vmem:[%s8663_s12 + $0x398] ss:$12 sps:$4 sm:$0xff]  }
 0x270   : > { %3023 = vmatpush2.bf16.msra.mxu0 %v7136_v11  ;;  %v8870_v11 = vcombine.low %v8844_v17, %v2171_v10  ;;  %v7227_v10 = vld [vmem:[%s8663_s12 + $0x80] ss:$12 sps:$4 sm:$0xff]  }
 0x271   : > { %3797 = vmatpush1.bf16.msra.mxu1 %v7133_v43  ;;  %6690 = vmatprep.subr.bf16.mxu0 %v7139_v0  ;;  %v8867_v43 = vld [vmem:[%s8709_s18] sm:$0xff] }
 0x272   : > { %3798 = vmatprep.subr.bf16.mxu1 %v7142_v3  ;;  %v8875_v0 = vcombine.high %v8867_v43, %v8724_v20  ;;  %v7187_v3 = vld [vmem:[%s8663_s12 + $0x150] ss:$12 sps:$4 sm:$0xff]  }
 0x273   : > { %3025 = vmatmul.mubr.bf16.vlgmr.msra.gmra.mxu0 %v8779_v58 }
 0x274   : > { %3108 = vmatmul.mubr.bf16.gmra.mxu1 %v8784_v13  ;;  %6691 = vmatpush3.bf16.msra.mxu0 %v7143_v4  ;;  %v7193_v4 = vld [vmem:[%s8663_s12 + $0x13c] ss:$12 sps:$4 sm:$0xff]  }
 0x275   : > { %3799 = vmatpush1.bf16.msra.mxu1 %v7140_v34  ;;  %6692 = vmatprep.subr.bf16.mxu0 %v7144_v19  ;;  %v7190_v34 = vld [vmem:[%s8663_s12 + $0x2d8] ss:$12 sps:$4 sm:$0xff]  }
 0x276   : > { %3800 = vmatprep.subr.bf16.mxu1 %v7147_v9  ;;  %3034 = vmatprep.mubr.bf16.mxu0 %v8794_v44  ;;  %v7191_v19 = vld [vmem:[%s8663_s12 + $0x138] ss:$12 sps:$4 sm:$0xff]   ;;  %v7194_v9 = vld [vmem:[%s8663_s12 + $0x500] ss:$12 sps:$4 sm:$0xff]  }
 0x277   : > { %6179 = vmatprep.mubr.msk.bf16.mxu1 %vm2979_vm9, %v8797_v37 }
 0x278   : > { %6693 = vmatpush3.bf16.msra.mxu0 %v7148_v24  ;;  %v7195_v24 = vld [vmem:[%s8663_s12 + $0x120] ss:$12 sps:$4 sm:$0xff]  }
 0x279   : > { %3801 = vmatpush1.bf16.msra.mxu1 %v7145_v15  ;;  %6694 = vmatprep.subr.bf16.mxu0 %v7153_v25  ;;  %v7197_v15 = vld [vmem:[%s8663_s12 + $0x124] ss:$12 sps:$4 sm:$0xff]   ;;  %v7199_v25 = vld [vmem:[%s8663_s12 + $0x108] ss:$12 sps:$4 sm:$0xff]  }
 0x27a   : > { %3802 = vmatprep.subr.bf16.mxu1 %v7156_v5  ;;  %v7202_v5 = vld [vmem:[%s8663_s12 + $0x4d0] ss:$12 sps:$4 sm:$0xff]  }
 0x27b   : > { %3035 = vmatmul.mubr.bf16.gmra.mxu0 %v8816_v54 }
 0x27c   : > { %3118 = vmatmul.mubr.bf16.gmra.mxu1 %v8821_v50  ;;  %6695 = vmatpush3.bf16.msra.mxu0 %v7157_v57  ;;  %v7206_v57 = vld [vmem:[%s8663_s12 + $0x4b8] ss:$12 sps:$4 sm:$0xff]  }
 0x27d   : > { %3803 = vmatpush1.bf16.msra.mxu1 %v7154_v48  ;;  %6696 = vmatprep.subr.bf16.mxu0 %v7158_v30  ;;  %v7203_v48 = vld [vmem:[%s8663_s12 + $0xf0] ss:$12 sps:$4 sm:$0xff]   ;;  %v7207_v30 = vld [vmem:[%s8663_s12 + $0xd8] ss:$12 sps:$4 sm:$0xff]  }
 0x27e   : > { %3804 = vmatprep.subr.bf16.mxu1 %v7161_v36  ;;  %3044 = vmatprep.mubr.bf16.mxu0 %v8830_v7  ;;  %v7210_v36 = vld [vmem:[%s8663_s12 + $0x4a0] ss:$12 sps:$4 sm:$0xff]  }
 0x27f   : > { %6180 = vmatprep.mubr.msk.bf16.mxu1 %vm2979_vm9, %v8833_v1 }
 0x280   : > { %6697 = vmatpush3.bf16.msra.mxu0 %v7162_v40  ;;  %v7217_v40 = vld [vmem:[%s8663_s12 + $0x170] ss:$12 sps:$4 sm:$0xff]  }
 0x281   : > { %3805 = vmatpush1.bf16.msra.mxu1 %v7159_v52  ;;  %6698 = vmatprep.subr.bf16.mxu0 %v7167_v2  ;;  %v7214_v52 = vld [vmem:[%s8663_s12 + $0x488] ss:$12 sps:$4 sm:$0xff]   ;;  %v7219_v2 = vld [vmem:[%s8663_s12 + $0xb0] ss:$12 sps:$4 sm:$0xff]  }
 0x282   : > { %3806 = vmatprep.subr.bf16.mxu1 %v7170_v32  ;;  %v8917_v32 = vcombine.low %v8867_v43, %v8724_v20  ;;  %v7225_v20 = vld [vmem:[%s8663_s12 + $0x140] ss:$12 sps:$4 sm:$0xff]   ;;  %v7238_v43 = vld [vmem:[%s8663_s12 + $0x38] ss:$12 sps:$4 sm:$0xff]  }
 0x283   : > { %3045 = vmatmul.mubr.bf16.gmra.mxu0 %v8848_v47 }
 0x284   : > { %3128 = vmatmul.mubr.bf16.gmra.mxu1 %v8851_v14  ;;  %6699 = vmatpush3.bf16.msra.mxu0 %v7171_v49  ;;  %v7221_v49 = vld [vmem:[%s8663_s12 + $0x458] ss:$12 sps:$4 sm:$0xff]  }
 0x285   : > { %3807 = vmatpush1.bf16.msra.mxu1 %v7168_v6  ;;  %6700 = vmatprep.subr.bf16.mxu0 %v7172_v38  ;;  %v7220_v6 = vld [vmem:[%s8663_s12 + $0x158] ss:$12 sps:$4 sm:$0xff]  }
 0x286   : > { %3808 = vmatprep.subr.bf16.mxu1 %v7175_v27  ;;  %3054 = vmatprep.mubr.bf16.mxu0 %v8858_v63  ;;  %v7222_v38 = vld [vmem:[%s8663_s12 + $0x98] ss:$12 sps:$4 sm:$0xff]   ;;  %v8927_v27 = vcombine.high %v8727_v35, %v8775_v56 }
 0x287   : > { %3826 = vmatprep.mubr.bf16.mxu1 %v8875_v0 }
 0x288   : > { %6701 = vmatpush3.bf16.msra.mxu0 %v7176_v12  ;;  %v7228_v12 = vld [vmem:[%s8663_s12 + $0x128] ss:$12 sps:$4 sm:$0xff]  }
 0x289   : > { %3809 = vmatpush1.bf16.msra.mxu1 %v7173_v62  ;;  %6702 = vmatprep.subr.bf16.mxu0 %v7181_v41  ;;  %v8939_v62 = vcombine.low %v8727_v35, %v8775_v56  ;;  %v8947_v41 = vcombine.high %v8782_v23, %v8812_v39  ;;  %v7233_v35 = vld [vmem:[%s8663_s12 + $0x110] ss:$12 sps:$4 sm:$0xff]   ;;  %v7234_v56 = vld [vmem:[%s8663_s12 + $0x560] ss:$12 sps:$4 sm:$0xff]  }
 0x28a   : > { %3810 = vmatprep.subr.bf16.mxu1 %v7184_v33  ;;  %v7235_v33 = vld [vmem:[%s8663_s12 + $0x50] ss:$12 sps:$4 sm:$0xff]  }
 0x28b   : > { %3055 = vmatmul.mubr.bf16.gmra.mxu0 %v8870_v11 }
 0x28c   : > { %6703 = vmatpush3.bf16.msra.mxu0 %v7185_v45  ;;  %3170 = vmatprep.mubr.bf16.mxu0 %v8732_v31  ;;  %v7198_v31 = vld [vmem:[%s8663_s12 + $0x4e8] ss:$12 sps:$4 sm:$0xff]   ;;  %v7236_v45 = vld [vmem:[%s8663_s12 + $0xf8] ss:$12 sps:$4 sm:$0xff]  }
 0x28d   : > { %3811 = vmatpush2.bf16.msra.mxu1 %v7182_v53  ;;  %6704 = vmatprep.subr.bf16.mxu0 %v7186_v16  ;;  %v8957_v53 = vcombine.low %v8782_v23, %v8812_v39  ;;  %v7237_v16 = vld [vmem:[%s8663_s12 + $0x548] ss:$12 sps:$4 sm:$0xff]   ;;  %v7241_v23 = vld [vmem:[%s8663_s12 + $0xe0] ss:$12 sps:$4 sm:$0xff]   ;;  %v7242_v39 = vld [vmem:[%s8663_s12 + $0x530] ss:$12 sps:$4 sm:$0xff]  }
 0x28e   : > { %3812 = vmatprep.subr.bf16.mxu1 %v7189_v51  ;;  %v7243_v51 = vld [vmem:[%s8663_s12 + $0x20] ss:$12 sps:$4 sm:$0xff]  }
 0x290   : > { %6705 = vmatpush3.bf16.msra.mxu0 %v7190_v34  ;;  %v7244_v34 = vld [vmem:[%s8663_s12 + $0xc8] ss:$12 sps:$4 sm:$0xff]  }
 0x291   : > { %3813 = vmatpush2.bf16.msra.mxu1 %v7187_v3  ;;  %3203 = vmatprep.subr.bf16.mxu0 %v7577_v55  ;;  %v8975_v3 = vcombine.low %v8819_v60, %v8844_v17 }
 0x292   : > { %3814 = vmatprep.subr.bf16.mxu1 %v7193_v4  ;;  %v7245_v4 = vld [vmem:[%s8663_s12 + $0x518] ss:$12 sps:$4 sm:$0xff]  }
 0x293   : > { %3171 = vmatmul.mubr.bf16.vlgmr.msra.gmra.mxu0 %v8779_v58  ;;  %v7205_v58 = vld [vmem:[%s8663_s12 + $0xf4] ss:$12 sps:$4 sm:$0xff]  }
 0x294   : > { %3204 = vmatpush1.bf16.msra.mxu0 %v7194_v9  ;;  %3178 = vmatprep.mubr.bf16.mxu0 %v8794_v44  ;;  %v7209_v44 = vld [vmem:[%s8663_s12 + $0xdc] ss:$12 sps:$4 sm:$0xff]   ;;  %v7249_v9 = vld [vmem:[%s8663_s12 + $0x22c] ss:$12 sps:$4 sm:$0xff]  }
 0x295   : > { %3815 = vmatpush2.bf16.msra.mxu1 %v7191_v19  ;;  %3205 = vmatprep.subr.bf16.mxu0 %v7577_v55  ;;  %v7246_v19 = vld [vmem:[%s8663_s12 + $0x8] ss:$12 sps:$4 sm:$0xff]  }
 0x296   : > { %3816 = vmatprep.subr.bf16.mxu1 %v7197_v15  ;;  %v7252_v15 = vld [vmem:[%s8663_s12 + $0x64c] ss:$12 sps:$4 sm:$0xff]  }
 0x298   : > { %3206 = vmatpush1.bf16.msra.mxu0 %v7198_v31  ;;  %v7258_v31 = vld [vmem:[%s8663_s12 + $0x634] ss:$12 sps:$4 sm:$0xff]  }
 0x299   : > { %3817 = vmatpush2.bf16.msra.mxu1 %v7195_v24  ;;  %3207 = vmatprep.subr.bf16.mxu0 %v7577_v55  ;;  %v7255_v24 = vld [vmem:[%s8663_s12 + $0x214] ss:$12 sps:$4 sm:$0xff]  }
 0x29a   : > { %3818 = vmatprep.subr.bf16.mxu1 %v7201_v22  ;;  %v7253_v22 = vld [vmem:[%s8663_s12 + $0x210] ss:$12 sps:$4 sm:$0xff]  }
 0x29b   : > { %3179 = vmatmul.mubr.bf16.gmra.mxu0 %v8816_v54  ;;  %v7213_v54 = vld [vmem:[%s8663_s12 + $0xc4] ss:$12 sps:$4 sm:$0xff]  }
 0x29c   : > { %3208 = vmatpush1.bf16.msra.mxu0 %v7202_v5  ;;  %3186 = vmatprep.mubr.bf16.mxu0 %v8830_v7  ;;  %v7218_v7 = vld [vmem:[%s8663_s12 + $0x470] ss:$12 sps:$4 sm:$0xff]  }
 0x29d   : > { %3819 = vmatpush2.bf16.msra.mxu1 %v7199_v25  ;;  %3209 = vmatprep.subr.bf16.mxu0 %v7577_v55  ;;  %v7256_v25 = vld [vmem:[%s8663_s12 + $0x630] ss:$12 sps:$4 sm:$0xff]  }
 0x29e   : > { %3820 = vmatprep.subr.bf16.mxu1 %v7205_v58  ;;  %v7264_v5 = vld [vmem:[%s8663_s12 + $0x61c] ss:$12 sps:$4 sm:$0xff]   ;;  %v7259_v58 = vld [vmem:[%s8663_s12 + $0x1f8] ss:$12 sps:$4 sm:$0xff]  }
 0x2a0   : > { %3210 = vmatpush1.bf16.msra.mxu0 %v7206_v57  ;;  %v7270_v57 = vld [vmem:[%s8663_s12 + $0x604] ss:$12 sps:$4 sm:$0xff]  }
 0x2a1   : > { %3821 = vmatpush2.bf16.msra.mxu1 %v7203_v48  ;;  %3211 = vmatprep.subr.bf16.mxu0 %v7577_v55  ;;  %v7267_v48 = vld [vmem:[%s8663_s12 + $0x1e4] ss:$12 sps:$4 sm:$0xff]  }
 0x2a2   : > { %3822 = vmatprep.subr.bf16.mxu1 %v7209_v44  ;;  %v7265_v44 = vld [vmem:[%s8663_s12 + $0x1e0] ss:$12 sps:$4 sm:$0xff]  }
 0x2a3   : > { %3187 = vmatmul.mubr.bf16.gmra.mxu0 %v8848_v47  ;;  %v7226_v47 = vld [vmem:[%s8663_s12 + $0x590] ss:$12 sps:$4 sm:$0xff]  }
 0x2a4   : > { %3212 = vmatpush1.bf16.msra.mxu0 %v7210_v36  ;;  %3194 = vmatprep.mubr.bf16.mxu0 %v8858_v63  ;;  %v7230_v63 = vld [vmem:[%s8663_s12 + $0x68] ss:$12 sps:$4 sm:$0xff]   ;;  %v7276_v36 = vld [vmem:[%s8663_s12 + $0x5ec] ss:$12 sps:$4 sm:$0xff]  }
 0x2a5   : > { %3823 = vmatpush2.bf16.msra.mxu1 %v7207_v30  ;;  %3213 = vmatprep.subr.bf16.mxu0 %v7577_v55  ;;  %v7273_v30 = vld [vmem:[%s8663_s12 + $0x1cc] ss:$12 sps:$4 sm:$0xff]  }
 0x2a6   : > { %3824 = vmatprep.subr.bf16.mxu1 %v7213_v54  ;;  %v7271_v54 = vld [vmem:[%s8663_s12 + $0x1c8] ss:$12 sps:$4 sm:$0xff]  }
 0x2a8   : > { %3214 = vmatpush1.bf16.msra.mxu0 %v7214_v52  ;;  %v7282_v52 = vld [vmem:[%s8663_s12 + $0x5d4] ss:$12 sps:$4 sm:$0xff]  }
 0x2a9   : > { %3825 = vmatpush2.bf16.msra.mxu1 %v7211_v61  ;;  %3215 = vmatprep.subr.bf16.mxu0 %v7577_v55  ;;  %v7279_v61 = vld [vmem:[%s8663_s12 + $0x1b4] ss:$12 sps:$4 sm:$0xff]  }
 0x2aa   : > { %6730 = vmatprep.subr.bf16.mxu1 %v7217_v40  ;;  %v7280_v40 = vld [vmem:[%s8663_s12 + $0x5d0] ss:$12 sps:$4 sm:$0xff]  }
 0x2ab   : > { %3195 = vmatmul.mubr.bf16.gmra.mxu0 %v8870_v11  ;;  %v8965_v11 = vcombine.high %v8819_v60, %v8844_v17  ;;  %v7247_v60 = vld [vmem:[%s8663_s12 + $0x228] ss:$12 sps:$4 sm:$0xff]  }
 0x2ac   : > { %3827 = vmatmul.mubr.bf16.vlgmr.msra.gmra.mxu1 %v8917_v32  ;;  %3216 = vmatpush1.bf16.msra.mxu0 %v7218_v7  ;;  %v7250_v17 = vld [vmem:[%s8663_s12 + $0x648] ss:$12 sps:$4 sm:$0xff]  }
 0x2ad   : > { %6731 = vmatpush3.bf16.msra.mxu1 %v7219_v2  ;;  %3217 = vmatprep.subr.bf16.mxu0 %v7577_v55  ;;  %v7285_v7 = vld [vmem:[%s8663_s12 + $0x19c] ss:$12 sps:$4 sm:$0xff]  }
 0x2ae   : > { %6732 = vmatprep.subr.bf16.mxu1 %v7220_v6  ;;  %3836 = vmatprep.mubr.bf16.mxu1 %v8927_v27  ;;  %v7288_v2 = vld [vmem:[%s8663_s12 + $0x5bc] ss:$12 sps:$4 sm:$0xff]   ;;  %v7291_v6 = vld [vmem:[%s8663_s12 + $0x184] ss:$12 sps:$4 sm:$0xff]  }
 0x2af   : > { %6181 = vmatprep.mubr.msk.bf16.mxu0 %vm2979_vm9, %v8714_v26  ;;  %v7229_v26 = vld [vmem:[%s8663_s12 + $0x578] ss:$12 sps:$4 sm:$0xff]  }
 0x2b0   : > { %3218 = vmatpush1.bf16.msra.mxu0 %v7221_v49  ;;  %v7294_v49 = vld [vmem:[%s8663_s12 + $0x5a4] ss:$12 sps:$4 sm:$0xff]  }
 0x2b1   : > { %6733 = vmatpush3.bf16.msra.mxu1 %v7222_v38  ;;  %3223 = vmatprep.subr.bf16.mxu0 %v7577_v55  ;;  %v9029_v38 = vld [vmem:[%s8709_s18 + $0x8] sm:$0xff] }
 0x2b2   : > { %6734 = vmatprep.subr.bf16.mxu1 %v7225_v20  ;;  %v7289_v20 = vld [vmem:[%s8663_s12 + $0x180] ss:$12 sps:$4 sm:$0xff]  }
 0x2b4   : > { %3837 = vmatmul.mubr.bf16.gmra.mxu1 %v8939_v62  ;;  %3224 = vmatpush2.bf16.msra.mxu0 %v7226_v47  ;;  %v7297_v47 = vld [vmem:[%s8663_s12 + $0x2bc] ss:$12 sps:$4 sm:$0xff]  }
 0x2b5   : > { %6735 = vmatpush3.bf16.msra.mxu1 %v7227_v10  ;;  %3225 = vmatprep.subr.bf16.mxu0 %v7577_v55  ;;  %v7437_v10 = vld [vmem:[%s8709_s18 + $0x18] sm:$0xff] }
 0x2b6   : > { %6736 = vmatprep.subr.bf16.mxu1 %v7228_v12  ;;  %3846 = vmatprep.mubr.bf16.mxu1 %v8947_v41  ;;  %v9038_v12 = vcombine.high %v9029_v38, %v7437_v10 }
 0x2b8   : > { %3226 = vmatpush2.bf16.msra.mxu0 %v7229_v26  ;;  %v7300_v26 = vld [vmem:[%s8663_s12 + $0x70c] ss:$12 sps:$4 sm:$0xff]  }
 0x2b9   : > { %6737 = vmatpush3.bf16.msra.mxu1 %v7230_v63  ;;  %3227 = vmatprep.subr.bf16.mxu0 %v7577_v55  ;;  %v7295_v63 = vld [vmem:[%s8663_s12 + $0x2b8] ss:$12 sps:$4 sm:$0xff]  }
 0x2ba   : > { %6738 = vmatprep.subr.bf16.mxu1 %v7233_v35  ;;  %v7303_v35 = vld [vmem:[%s8663_s12 + $0x2a4] ss:$12 sps:$4 sm:$0xff]  }
 0x2bc   : > { %3847 = vmatmul.mubr.bf16.gmra.mxu1 %v8957_v53  ;;  %3228 = vmatpush2.bf16.msra.mxu0 %v7234_v56  ;;  %v7306_v56 = vld [vmem:[%s8663_s12 + $0x6f4] ss:$12 sps:$4 sm:$0xff]  }
 0x2bd   : > { %6739 = vmatpush3.bf16.msra.mxu1 %v7235_v33  ;;  %3229 = vmatprep.subr.bf16.mxu0 %v7577_v55  ;;  %v7301_v33 = vld [vmem:[%s8663_s12 + $0x2a0] ss:$12 sps:$4 sm:$0xff]  }
 0x2be   : > { %6740 = vmatprep.subr.bf16.mxu1 %v7236_v45  ;;  %3856 = vmatprep.mubr.bf16.mxu1 %v8965_v11  ;;  %v7304_v45 = vld [vmem:[%s8663_s12 + $0x6f0] ss:$12 sps:$4 sm:$0xff]  }
 0x2c0   : > { %3230 = vmatpush2.bf16.msra.mxu0 %v7237_v16  ;;  %v7309_v16 = vld [vmem:[%s8663_s12 + $0x28c] ss:$12 sps:$4 sm:$0xff]  }
 0x2c1   : > { %6741 = vmatpush3.bf16.msra.mxu1 %v7238_v43  ;;  %3231 = vmatprep.subr.bf16.mxu0 %v7577_v55  ;;  %v7312_v43 = vld [vmem:[%s8663_s12 + $0x6dc] ss:$12 sps:$4 sm:$0xff]  }
 0x2c2   : > { %6742 = vmatprep.subr.bf16.mxu1 %v7241_v23  ;;  %v7307_v23 = vld [vmem:[%s8663_s12 + $0x288] ss:$12 sps:$4 sm:$0xff]  }
 0x2c4   : > { %3857 = vmatmul.mubr.bf16.gmra.mxu1 %v8975_v3  ;;  %3232 = vmatpush2.bf16.msra.mxu0 %v7242_v39  ;;  %v7310_v39 = vld [vmem:[%s8663_s12 + $0x6d8] ss:$12 sps:$4 sm:$0xff]  }
 0x2c5   : > { %6743 = vmatpush3.bf16.msra.mxu1 %v7243_v51  ;;  %3233 = vmatprep.subr.bf16.mxu0 %v7577_v55  ;;  %v7315_v51 = vld [vmem:[%s8663_s12 + $0x274] ss:$12 sps:$4 sm:$0xff]  }
 0x2c6   : > { %6744 = vmatprep.subr.bf16.mxu1 %v7244_v34  ;;  %3972 = vmatprep.mubr.bf16.mxu1 %v8875_v0  ;;  %v7261_v0 = vld [vmem:[%s8663_s12 + $0x1fc] ss:$12 sps:$4 sm:$0xff]   ;;  %v7318_v34 = vld [vmem:[%s8663_s12 + $0x6c4] ss:$12 sps:$4 sm:$0xff]  }
 0x2c8   : > { %3234 = vmatpush2.bf16.msra.mxu0 %v7245_v4  ;;  %v7313_v4 = vld [vmem:[%s8663_s12 + $0x270] ss:$12 sps:$4 sm:$0xff]  }
 0x2c9   : > { %6745 = vmatpush3.bf16.msra.mxu1 %v7246_v19  ;;  %3867 = vmatprep.subr.bf16.mxu0 %v7249_v9  ;;  %v7316_v19 = vld [vmem:[%s8663_s12 + $0x6c0] ss:$12 sps:$4 sm:$0xff]   ;;  %v7321_v9 = vld [vmem:[%s8663_s12 + $0x25c] ss:$12 sps:$4 sm:$0xff]  }
 0x2ca   : > { %4690 = vmatprep.subr.bf16.mxu1 %v7252_v15  ;;  %v7324_v15 = vld [vmem:[%s8663_s12 + $0x6ac] ss:$12 sps:$4 sm:$0xff]  }
 0x2cb   : > { %3236 = vmatmul.mubr.bf16.vlgmr.msra.gmra.mxu0 %v8750_v8  ;;  %v7262_v8 = vld [vmem:[%s8663_s12 + $0x618] ss:$12 sps:$4 sm:$0xff]  }
 0x2cc   : > { %3973 = vmatmul.mubr.bf16.vlgmr.msra.gmra.mxu1 %v8917_v32  ;;  %3868 = vmatpush1.bf16.msra.mxu0 %v7247_v60  ;;  %v7286_v32 = vld [vmem:[%s8663_s12 + $0x5b8] ss:$12 sps:$4 sm:$0xff]  }
 0x2cd   : > { %4691 = vmatpush1.bf16.msra.mxu1 %v7250_v17  ;;  %3869 = vmatprep.subr.bf16.mxu0 %v7255_v24  ;;  %v7319_v60 = vld [vmem:[%s8663_s12 + $0x258] ss:$12 sps:$4 sm:$0xff]   ;;  %v7322_v17 = vld [vmem:[%s8663_s12 + $0x6a8] ss:$12 sps:$4 sm:$0xff]  }
 0x2ce   : > { %4692 = vmatprep.subr.bf16.mxu1 %v7258_v31  ;;  %6182 = vmatprep.mubr.msk.bf16.mxu0 %vm2979_vm9, %v8756_v46  ;;  %v7268_v46 = vld [vmem:[%s8663_s12 + $0x600] ss:$12 sps:$4 sm:$0xff]   ;;  %v7327_v24 = vld [vmem:[%s8663_s12 + $0x244] ss:$12 sps:$4 sm:$0xff]  }
 0x2cf   : > { %3980 = vmatprep.mubr.bf16.mxu1 %v8927_v27  ;;  %v7330_v31 = vld [vmem:[%s8663_s12 + $0x694] ss:$12 sps:$4 sm:$0xff]  }
 0x2d0   : > { %3870 = vmatpush1.bf16.msra.mxu0 %v7253_v22  ;;  %v7325_v22 = vld [vmem:[%s8663_s12 + $0x240] ss:$12 sps:$4 sm:$0xff]  }
 0x2d1   : > { %4693 = vmatpush1.bf16.msra.mxu1 %v7256_v25  ;;  %3871 = vmatprep.subr.bf16.mxu0 %v7261_v0  ;;  %v7328_v25 = vld [vmem:[%s8663_s12 + $0x690] ss:$12 sps:$4 sm:$0xff]  }
 0x2d2   : > { %4694 = vmatprep.subr.bf16.mxu1 %v7264_v5  ;;  %v7335_v0 = vld [vmem:[%s8663_s12 + $0x67c] ss:$12 sps:$4 sm:$0xff]   ;;  %v7333_v5 = vld [vmem:[%s8663_s12 + $0x678] ss:$12 sps:$4 sm:$0xff]  }
 0x2d3   : > { %3244 = vmatmul.mubr.bf16.gmra.mxu0 %v8784_v13  ;;  %v7274_v13 = vld [vmem:[%s8663_s12 + $0x5e8] ss:$12 sps:$4 sm:$0xff]  }
 0x2d4   : > { %3981 = vmatmul.mubr.bf16.gmra.mxu1 %v8939_v62  ;;  %3872 = vmatpush1.bf16.msra.mxu0 %v7259_v58  ;;  %v7336_v58 = vld [vmem:[%s8663_s12 + $0x230] ss:$12 sps:$4 sm:$0xff]  }
 0x2d5   : > { %4695 = vmatpush1.bf16.msra.mxu1 %v7262_v8  ;;  %3873 = vmatprep.subr.bf16.mxu0 %v7267_v48  ;;  %v9070_v8 = vcombine.low %v9029_v38, %v7437_v10  ;;  %v7339_v48 = vld [vmem:[%s8663_s12 + $0x664] ss:$12 sps:$4 sm:$0xff]  }
 0x2d6   : > { %4696 = vmatprep.subr.bf16.mxu1 %v7270_v57  ;;  %6183 = vmatprep.mubr.msk.bf16.mxu0 %vm2979_vm9, %v8797_v37  ;;  %v7277_v37 = vld [vmem:[%s8663_s12 + $0x1b0] ss:$12 sps:$4 sm:$0xff]   ;;  %v7337_v57 = vld [vmem:[%s8663_s12 + $0x660] ss:$12 sps:$4 sm:$0xff]   ;;  %v7362_v38 = vld [vmem:[%s8663_s12 + $0x698] ss:$12 sps:$4 sm:$0xff]  }
 0x2d7   : > { %3988 = vmatprep.mubr.bf16.mxu1 %v8947_v41  ;;  %v7438_v10 = vld [vmem:[%s8709_s18 + $0x80] sm:$0xff] }
 0x2d8   : > { %3874 = vmatpush1.bf16.msra.mxu0 %v7265_v44  ;;  %v7340_v44 = vld [vmem:[%s8663_s12 + $0x218] ss:$12 sps:$4 sm:$0xff]  }
 0x2d9   : > { %4697 = vmatpush1.bf16.msra.mxu1 %v7268_v46  ;;  %3875 = vmatprep.subr.bf16.mxu0 %v7273_v30  ;;  %v7343_v46 = vld [vmem:[%s8663_s12 + $0x710] ss:$12 sps:$4 sm:$0xff]   ;;  %v7344_v30 = vld [vmem:[%s8663_s12 + $0x200] ss:$12 sps:$4 sm:$0xff]  }
 0x2da   : > { %4698 = vmatprep.subr.bf16.mxu1 %v7276_v36  ;;  %v7345_v36 = vld [vmem:[%s8663_s12 + $0x650] ss:$12 sps:$4 sm:$0xff]  }
 0x2db   : > { %3252 = vmatmul.mubr.bf16.gmra.mxu0 %v8821_v50  ;;  %v7283_v50 = vld [vmem:[%s8663_s12 + $0x198] ss:$12 sps:$4 sm:$0xff]  }
 0x2dc   : > { %3989 = vmatmul.mubr.bf16.gmra.mxu1 %v8957_v53  ;;  %3876 = vmatpush1.bf16.msra.mxu0 %v7271_v54  ;;  %v7346_v54 = vld [vmem:[%s8663_s12 + $0x6f8] ss:$12 sps:$4 sm:$0xff]  }
 0x2dd   : > { %4699 = vmatpush1.bf16.msra.mxu1 %v7274_v13  ;;  %3877 = vmatprep.subr.bf16.mxu0 %v7279_v61  ;;  %v7347_v13 = vld [vmem:[%s8663_s12 + $0x1e8] ss:$12 sps:$4 sm:$0xff]   ;;  %v7348_v61 = vld [vmem:[%s8663_s12 + $0x638] ss:$12 sps:$4 sm:$0xff]  }
 0x2de   : > { %4700 = vmatprep.subr.bf16.mxu1 %v7282_v52  ;;  %6184 = vmatprep.mubr.msk.bf16.mxu0 %vm2979_vm9, %v8833_v1  ;;  %v7292_v1 = vld [vmem:[%s8663_s12 + $0x5a0] ss:$12 sps:$4 sm:$0xff]  }
 0x2df   : > { %3996 = vmatprep.mubr.bf16.mxu1 %v8965_v11  ;;  %v7351_v52 = vld [vmem:[%s8663_s12 + $0x6e0] ss:$12 sps:$4 sm:$0xff]  }
 0x2e0   : > { %3878 = vmatpush1.bf16.msra.mxu0 %v7277_v37  ;;  %v7352_v37 = vld [vmem:[%s8663_s12 + $0x1d0] ss:$12 sps:$4 sm:$0xff]  }
 0x2e1   : > { %4701 = vmatpush1.bf16.msra.mxu1 %v7280_v40  ;;  %3879 = vmatprep.subr.bf16.mxu0 %v7285_v7  ;;  %v7353_v40 = vld [vmem:[%s8663_s12 + $0x620] ss:$12 sps:$4 sm:$0xff]   ;;  %v7354_v7 = vld [vmem:[%s8663_s12 + $0x6c8] ss:$12 sps:$4 sm:$0xff]  }
 0x2e2   : > { %4702 = vmatprep.subr.bf16.mxu1 %v7288_v2  ;;  %v7355_v2 = vld [vmem:[%s8663_s12 + $0x1b8] ss:$12 sps:$4 sm:$0xff]  }
 0x2e3   : > { %3260 = vmatmul.mubr.bf16.gmra.mxu0 %v8851_v14  ;;  %v7298_v14 = vld [vmem:[%s8663_s12 + $0x708] ss:$12 sps:$4 sm:$0xff]  }
 0x2e4   : > { %3997 = vmatmul.mubr.bf16.gmra.mxu1 %v8975_v3  ;;  %3880 = vmatpush1.bf16.msra.mxu0 %v7283_v50  ;;  %v7356_v50 = vld [vmem:[%s8663_s12 + $0x608] ss:$12 sps:$4 sm:$0xff]  }
 0x2e5   : > { %4703 = vmatpush1.bf16.msra.mxu1 %v7286_v32  ;;  %3881 = vmatprep.subr.bf16.mxu0 %v7291_v6  ;;  %v7359_v32 = vld [vmem:[%s8663_s12 + $0x6b0] ss:$12 sps:$4 sm:$0xff]   ;;  %v7360_v6 = vld [vmem:[%s8663_s12 + $0x1a0] ss:$12 sps:$4 sm:$0xff]  }
 0x2e6   : > { %4704 = vmatprep.subr.bf16.mxu1 %v7294_v49  ;;  %6291 = vmatprep.mubr.msk.bf16.mxu0 %vm2979_vm9, %v9038_v12  ;;  %v7361_v49 = vld [vmem:[%s8663_s12 + $0x5f0] ss:$12 sps:$4 sm:$0xff]  }
 0x2e7   : > { %4722 = vmatprep.mubr.bf16.mxu1 %v8927_v27 }
 0x2e8   : > { %3882 = vmatpush1.bf16.msra.mxu0 %v7289_v20  ;;  %v2173_v20 = vld [vmem:[%s8709_s18 + $0x90] sm:$0xff] }
 0x2e9   : > { %4705 = vmatpush1.bf16.msra.mxu1 %v7292_v1  ;;  %3887 = vmatprep.subr.bf16.mxu0 %v7297_v47  ;;  %v7363_v1 = vld [vmem:[%s8663_s12 + $0x188] ss:$12 sps:$4 sm:$0xff]   ;;  %v7364_v47 = vld [vmem:[%s8663_s12 + $0x5d8] ss:$12 sps:$4 sm:$0xff]  }
 0x2ea   : > { %4706 = vmatprep.subr.bf16.mxu1 %v7300_v26  ;;  %v9117_v26 = vcombine.high %v7438_v10, %v2173_v20 }
 0x2ec   : > { %3888 = vmatpush2.bf16.msra.mxu0 %v7295_v63  ;;  %v7366_v63 = vld [vmem:[%s8663_s12 + $0x680] ss:$12 sps:$4 sm:$0xff]  }
 0x2ed   : > { %4707 = vmatpush2.bf16.msra.mxu1 %v7298_v14  ;;  %3889 = vmatprep.subr.bf16.mxu0 %v7303_v35  ;;  %v7367_v14 = vld [vmem:[%s8663_s12 + $0x2c0] ss:$12 sps:$4 sm:$0xff]  }
 0x2ee   : > { %4708 = vmatprep.subr.bf16.mxu1 %v7306_v56  ;;  %v7369_v35 = vld [vmem:[%s8663_s12 + $0x5c0] ss:$12 sps:$4 sm:$0xff]   ;;  %v9127_v56 = vcombine.low %v7438_v10, %v2173_v20 }
 0x2ef   : > { %v7393_v10 = vld [vmem:[%s8663_s12 + $0x780] ss:$12 sps:$4 sm:$0xff]  }
 0x2f0   : > { %3890 = vmatpush2.bf16.msra.mxu0 %v7301_v33  ;;  %v7370_v33 = vld [vmem:[%s8663_s12 + $0x668] ss:$12 sps:$4 sm:$0xff]  }
 0x2f1   : > { %4709 = vmatpush2.bf16.msra.mxu1 %v7304_v45  ;;  %3891 = vmatprep.subr.bf16.mxu0 %v7309_v16  ;;  %v7371_v45 = vld [vmem:[%s8663_s12 + $0x2a8] ss:$12 sps:$4 sm:$0xff]   ;;  %v7373_v16 = vld [vmem:[%s8663_s12 + $0x290] ss:$12 sps:$4 sm:$0xff]  }
 0x2f2   : > { %4710 = vmatprep.subr.bf16.mxu1 %v7312_v43  ;;  %v7374_v43 = vld [vmem:[%s8663_s12 + $0x7d0] ss:$12 sps:$4 sm:$0xff]  }
 0x2f4   : > { %3892 = vmatpush2.bf16.msra.mxu0 %v7307_v23 }
 0x2f5   : > { %4711 = vmatpush2.bf16.msra.mxu1 %v7310_v39  ;;  %3893 = vmatprep.subr.bf16.mxu0 %v7315_v51  ;;  %v7375_v39 = vld [vmem:[%s8663_s12 + $0x278] ss:$12 sps:$4 sm:$0xff]  }
 0x2f6   : > { %4712 = vmatprep.subr.bf16.mxu1 %v7318_v34  ;;  %v7376_v51 = vld [vmem:[%s8663_s12 + $0x7b8] ss:$12 sps:$4 sm:$0xff]  }
 0x2f8   : > { %3894 = vmatpush2.bf16.msra.mxu0 %v7313_v4  ;;  %v7377_v4 = vld [vmem:[%s8663_s12 + $0x260] ss:$12 sps:$4 sm:$0xff]  }
 0x2f9   : > { %4713 = vmatpush2.bf16.msra.mxu1 %v7316_v19  ;;  %3895 = vmatprep.subr.bf16.mxu0 %v7321_v9 }
 0x2fa   : > { %4714 = vmatprep.subr.bf16.mxu1 %v7324_v15 }
 0x2fc   : > { %3896 = vmatpush2.bf16.msra.mxu0 %v7319_v60 }
 0x2fd   : > { %4715 = vmatpush2.bf16.msra.mxu1 %v7322_v17  ;;  %3897 = vmatprep.subr.bf16.mxu0 %v7327_v24  ;;  %v7380_v17 = vld [vmem:[%s8663_s12 + $0x788] ss:$12 sps:$4 sm:$0xff]  }
 0x2fe   : > { %4716 = vmatprep.subr.bf16.mxu1 %v7330_v31  ;;  %v7383_v31 = vld [vmem:[%s8663_s12 + $0x7cc] ss:$12 sps:$4 sm:$0xff]  }
 0x300   : > { %3898 = vmatpush2.bf16.msra.mxu0 %v7325_v22 }
 0x301   : > { %4717 = vmatpush2.bf16.msra.mxu1 %v7328_v25  ;;  %4005 = vmatprep.subr.bf16.mxu0 %v7577_v55 }
 0x302   : > { %4718 = vmatprep.subr.bf16.mxu1 %v7335_v0 }
 0x303   : > { %3900 = vmatmul.mubr.bf16.vlgmr.msra.gmra.mxu0 %v9070_v8 }
 0x304   : > { %4006 = vmatpush1.bf16.msra.mxu0 %v7336_v58  ;;  %6292 = vmatprep.mubr.msk.bf16.mxu0 %vm2979_vm9, %v8745_v42  ;;  %v7381_v58 = vld [vmem:[%s8663_s12 + $0x7c8] ss:$12 sps:$4 sm:$0xff]  }
 0x305   : > { %4719 = vmatpush2.bf16.msra.mxu1 %v7333_v5  ;;  %4007 = vmatprep.subr.bf16.mxu0 %v7577_v55 }
 0x306   : > { %4720 = vmatprep.subr.bf16.mxu1 %v7339_v48  ;;  %v7384_v48 = vld [vmem:[%s8663_s12 + $0x770] ss:$12 sps:$4 sm:$0xff]  }
 0x308   : > { %4008 = vmatpush1.bf16.msra.mxu0 %v7340_v44  ;;  %v7387_v44 = vld [vmem:[%s8663_s12 + $0x7b4] ss:$12 sps:$4 sm:$0xff]  }
 0x309   : > { %4721 = vmatpush2.bf16.msra.mxu1 %v7337_v57  ;;  %4009 = vmatprep.subr.bf16.mxu0 %v7577_v55 }
 0x30a   : > { %6770 = vmatprep.subr.bf16.mxu1 %v7343_v46 }
 0x30b   : > { %3910 = vmatmul.mubr.bf16.gmra.mxu0 %v8747_v59 }
 0x30c   : > { %4723 = vmatmul.mubr.bf16.vlgmr.msra.gmra.mxu1 %v8939_v62  ;;  %4010 = vmatpush1.bf16.msra.mxu0 %v7344_v30 }
 0x30d   : > { %6771 = vmatpush3.bf16.msra.mxu1 %v7345_v36  ;;  %4011 = vmatprep.subr.bf16.mxu0 %v7577_v55 }
 0x30e   : > { %6772 = vmatprep.subr.bf16.mxu1 %v7346_v54  ;;  %6293 = vmatprep.mubr.msk.bf16.mxu0 %vm2979_vm9, %v8764_v21 }
 0x30f   : > { %4732 = vmatprep.mubr.bf16.mxu1 %v8947_v41 }
 0x310   : > { %4012 = vmatpush1.bf16.msra.mxu0 %v7347_v13  ;;  %v7385_v13 = vld [vmem:[%s8663_s12 + $0x7b0] ss:$12 sps:$4 sm:$0xff]  }
 0x311   : > { %6773 = vmatpush3.bf16.msra.mxu1 %v7348_v61  ;;  %4013 = vmatprep.subr.bf16.mxu0 %v7577_v55  ;;  %v7388_v61 = vld [vmem:[%s8663_s12 + $0x758] ss:$12 sps:$4 sm:$0xff]  }
 0x312   : > { %6774 = vmatprep.subr.bf16.mxu1 %v7351_v52 }
 0x313   : > { %3920 = vmatmul.mubr.bf16.gmra.mxu0 %v8766_v28 }
 0x314   : > { %4733 = vmatmul.mubr.bf16.gmra.mxu1 %v8957_v53  ;;  %4014 = vmatpush1.bf16.msra.mxu0 %v7352_v37  ;;  %v7391_v37 = vld [vmem:[%s8663_s12 + $0x79c] ss:$12 sps:$4 sm:$0xff]  }
 0x315   : > { %6775 = vmatpush3.bf16.msra.mxu1 %v7353_v40  ;;  %4015 = vmatprep.subr.bf16.mxu0 %v7577_v55 }
 0x316   : > { %6776 = vmatprep.subr.bf16.mxu1 %v7354_v7  ;;  %6294 = vmatprep.mubr.msk.bf16.mxu0 %vm2979_vm9, %v8800_v18 }
 0x317   : > { %4742 = vmatprep.mubr.bf16.mxu1 %v8965_v11 }
 0x318   : > { %4016 = vmatpush1.bf16.msra.mxu0 %v7355_v2 }
 0x319   : > { %6777 = vmatpush3.bf16.msra.mxu1 %v7356_v50  ;;  %4017 = vmatprep.subr.bf16.mxu0 %v7577_v55  ;;  %v7389_v50 = vld [vmem:[%s8663_s12 + $0x798] ss:$12 sps:$4 sm:$0xff]  }
 0x31a   : > { %6778 = vmatprep.subr.bf16.mxu1 %v7359_v32  ;;  %v7392_v32 = vld [vmem:[%s8663_s12 + $0x740] ss:$12 sps:$4 sm:$0xff]  }
 0x31b   : > { %3930 = vmatmul.mubr.bf16.gmra.mxu0 %v8802_v29 }
 0x31c   : > { %4743 = vmatmul.mubr.bf16.gmra.mxu1 %v8975_v3  ;;  %4018 = vmatpush1.bf16.msra.mxu0 %v7360_v6 }
 0x31d   : > { %6779 = vmatpush3.bf16.msra.mxu1 %v7361_v49  ;;  %4019 = vmatprep.subr.bf16.mxu0 %v7577_v55  ;;  %v7395_v49 = vld [vmem:[%s8663_s12 + $0x784] ss:$12 sps:$4 sm:$0xff]  }
 0x31e   : > { %6780 = vmatprep.subr.bf16.mxu1 %v7362_v38  ;;  %4752 = vmatprep.mubr.bf16.mxu1 %v9117_v26 }
 0x31f   : > { %6295 = vmatprep.mubr.msk.bf16.mxu0 %vm2979_vm9, %v9038_v12  ;;  %v7372_v12 = vld [vmem:[%s8663_s12 + $0x5a8] ss:$12 sps:$4 sm:$0xff]  }
 0x320   : > { %4020 = vmatpush1.bf16.msra.mxu0 %v7363_v1 }
 0x321   : > { %6781 = vmatpush3.bf16.msra.mxu1 %v7364_v47  ;;  %4025 = vmatprep.subr.bf16.mxu0 %v7577_v55 }
 0x322   : > { %6782 = vmatprep.subr.bf16.mxu1 %v7366_v63 }
 0x324   : > { %4753 = vmatmul.mubr.bf16.gmra.mxu1 %v9127_v56  ;;  %4026 = vmatpush2.bf16.msra.mxu0 %v7367_v14 }
 0x325   : > { %6783 = vmatpush3.bf16.msra.mxu1 %v7369_v35  ;;  %4027 = vmatprep.subr.bf16.mxu0 %v7577_v55  ;;  %v7399_v35 = vld [vmem:[%s8663_s12 + $0x76c] ss:$12 sps:$4 sm:$0xff]  }
 0x326   : > { %6784 = vmatprep.subr.bf16.mxu1 %v7370_v33  ;;  %4868 = vmatprep.mubr.bf16.mxu1 %v8927_v27 }
 0x328   : > { %4028 = vmatpush2.bf16.msra.mxu0 %v7371_v45 }
 0x329   : > { %6785 = vmatpush3.bf16.msra.mxu1 %v7372_v12  ;;  %4029 = vmatprep.subr.bf16.mxu0 %v7577_v55  ;;  %v7397_v12 = vld [vmem:[%s8663_s12 + $0x768] ss:$12 sps:$4 sm:$0xff]  }
 0x32a   : > { %4901 = vmatprep.subr.bf16.mxu1 %v7577_v55 }
 0x32c   : > { %4869 = vmatmul.mubr.bf16.vlgmr.msra.gmra.mxu1 %v8939_v62  ;;  %v3099_v23 = vpop.f32.mrf.mxu1  ;;  %4030 = vmatpush2.bf16.msra.mxu0 %v7373_v16  ;;  %v7378_v62 = vld [vmem:[%s8663_s12 + $0x7a0] ss:$12 sps:$4 sm:$0xff]  }
 0x32d   : > { %4902 = vmatpush1.bf16.msra.mxu1 %v7374_v43  ;;  %4031 = vmatprep.subr.bf16.mxu0 %v7577_v55  ;;  %v7400_v16 = vld [vmem:[%s8663_s12 + $0x860] ss:$12 sps:$4 sm:$0xff]  }
 0x32e   : > { %4903 = vmatprep.subr.bf16.mxu1 %v7577_v55  ;;  %v3101_v27 = vpop.f32.mrf.mxu1  ;;  %4876 = vmatprep.mubr.bf16.mxu1 %v8947_v41  ;;  %v7379_v41 = vld [vmem:[%s8663_s12 + $0x248] ss:$12 sps:$4 sm:$0xff]  }
 0x330   : > { %v3103_v34 = vpop.f32.mrf.mxu1  ;;  %4032 = vmatpush2.bf16.msra.mxu0 %v7375_v39  ;;  %v7403_v39 = vld [vmem:[%s8663_s12 + $0x754] ss:$12 sps:$4 sm:$0xff]  }
 0x331   : > { %4904 = vmatpush1.bf16.msra.mxu1 %v7376_v51  ;;  %4033 = vmatprep.subr.bf16.mxu0 %v7577_v55 }
 0x332   : > { %4905 = vmatprep.subr.bf16.mxu1 %v7577_v55  ;;  %v3105_v19 = vpop.f32.mrf.mxu1 }
 0x333   : > { %v3026_v9 = vpop.f32.mrf.mxu0 }
 0x334   : > { %v3109_v15 = vpop.f32.mrf.mxu1  ;;  %4877 = vmatmul.mubr.bf16.gmra.mxu1 %v8957_v53  ;;  %v9150_v60 = vadd.f32 %v3099_v23, %v3026_v9  ;;  %4034 = vmatpush2.bf16.msra.mxu0 %v7377_v4  ;;  %v7401_v4 = vld [vmem:[%s8663_s12 + $0x750] ss:$12 sps:$4 sm:$0xff]  }
 0x335   : > { %4906 = vmatpush1.bf16.msra.mxu1 %v7378_v62  ;;  %v3028_v24 = vpop.f32.mrf.mxu0  ;;  %4035 = vmatprep.subr.bf16.mxu0 %v7577_v55  ;;  %v7404_v62 = vld [vmem:[%s8663_s12 + $0x848] ss:$12 sps:$4 sm:$0xff]  }
 0x336   : > { %4907 = vmatprep.subr.bf16.mxu1 %v7577_v55  ;;  %v3111_v22 = vpop.f32.mrf.mxu1  ;;  %v9157_v25 = vadd.f32 %v3101_v27, %v3028_v24  ;;  %4884 = vmatprep.mubr.bf16.mxu1 %v8965_v11 }
 0x337   : > { %v3030_v53 = vpop.f32.mrf.mxu0 }
 0x338   : > { %v3113_v0 = vpop.f32.mrf.mxu1  ;;  %v9160_v5 = vadd.f32 %v3103_v34, %v3030_v53  ;;  %4036 = vmatpush2.bf16.msra.mxu0 %v7379_v41 }
 0x339   : > { %4908 = vmatpush1.bf16.msra.mxu1 %v7380_v17  ;;  %v3032_v57 = vpop.f32.mrf.mxu0  ;;  %4763 = vmatprep.subr.bf16.mxu0 %v7383_v31  ;;  %v7405_v31 = vld [vmem:[%s8663_s12 + $0x738] ss:$12 sps:$4 sm:$0xff]  }
 0x33a   : > { %4909 = vmatprep.subr.bf16.mxu1 %v7577_v55  ;;  %v3115_v46 = vpop.f32.mrf.mxu1  ;;  %v9166_v30 = vadd.f32 %v3105_v19, %v3032_v57 }
 0x33b   : > { %v3036_v11 = vpop.f32.mrf.mxu0  ;;  %4038 = vmatmul.mubr.bf16.vlgmr.msra.gmra.mxu0 %v9070_v8 }
 0x33c   : > { %v3119_v36 = vpop.f32.mrf.mxu1  ;;  %4885 = vmatmul.mubr.bf16.gmra.mxu1 %v8975_v3  ;;  %v9170_v54 = vadd.f32 %v3109_v15, %v3036_v11  ;;  %4764 = vmatpush1.bf16.msra.mxu0 %v7381_v58  ;;  %v7407_v15 = vld [vmem:[%s8663_s12 + $0x73c] ss:$12 sps:$4 sm:$0xff]   ;;  %v7411_v58 = vld [vmem:[%s8663_s12 + $0x724] ss:$12 sps:$4 sm:$0xff]  }
 0x33d   : > { %4910 = vmatpush1.bf16.msra.mxu1 %v7384_v48  ;;  %v3038_v52 = vpop.f32.mrf.mxu0  ;;  %4765 = vmatprep.subr.bf16.mxu0 %v7387_v44  ;;  %v7409_v44 = vld [vmem:[%s8663_s12 + $0x720] ss:$12 sps:$4 sm:$0xff]  }
 0x33e   : > { %4911 = vmatprep.subr.bf16.mxu1 %v7577_v55  ;;  %v3121_v40 = vpop.f32.mrf.mxu1  ;;  %v9176_v7 = vadd.f32 %v3111_v22, %v3038_v52  ;;  %6296 = vmatprep.mubr.msk.bf16.mxu0 %vm2979_vm9, %v8745_v42  ;;  %v7408_v22 = vld [vmem:[%s8663_s12 + $0x830] ss:$12 sps:$4 sm:$0xff]   ;;  %v7413_v52 = vld [vmem:[%s8663_s12 + $0x858] ss:$12 sps:$4 sm:$0xff]  }
 0x33f   : > { %4892 = vmatprep.mubr.bf16.mxu1 %v9117_v26  ;;  %v3040_v3 = vpop.f32.mrf.mxu0  ;;  %v7396_v26 = vld [vmem:[%s8663_s12 + $0x728] ss:$12 sps:$4 sm:$0xff]  }
 0x340   : > { %v3123_v8 = vpop.f32.mrf.mxu1  ;;  %v9181_v2 = vadd.f32 %v3113_v0, %v3040_v3  ;;  %4766 = vmatpush1.bf16.msra.mxu0 %v7385_v13  ;;  %v7419_v3 = vld [vmem:[%s8663_s12 + $0x844] ss:$12 sps:$4 sm:$0xff]  }
 0x341   : > { %4912 = vmatpush1.bf16.msra.mxu1 %v7388_v61  ;;  %v3042_v6 = vpop.f32.mrf.mxu0  ;;  %4767 = vmatprep.subr.bf16.mxu0 %v7391_v37  ;;  %v7416_v37 = vld [vmem:[%s8663_s12 + $0x800] ss:$12 sps:$4 sm:$0xff]  }
 0x342   : > { %4913 = vmatprep.subr.bf16.mxu1 %v7577_v55  ;;  %v3125_v38 = vpop.f32.mrf.mxu1  ;;  %v9187_v20 = vadd.f32 %v3115_v46, %v3042_v6  ;;  %v7412_v46 = vld [vmem:[%s8663_s12 + $0x818] ss:$12 sps:$4 sm:$0xff]  }
 0x343   : > { %v3046_v1 = vpop.f32.mrf.mxu0  ;;  %4046 = vmatmul.mubr.bf16.gmra.mxu0 %v8747_v59  ;;  %v7423_v6 = vld [vmem:[%s8663_s12 + $0x82c] ss:$12 sps:$4 sm:$0xff]  }
 0x344   : > { %4893 = vmatmul.mubr.bf16.gmra.mxu1 %v9127_v56  ;;  %v9191_v47 = vadd.f32 %v3119_v36, %v3046_v1  ;;  %4768 = vmatpush1.bf16.msra.mxu0 %v7389_v50  ;;  %v3129_v14 = vpop.f32.mrf.mxu1  ;;  %v7415_v36 = vld [vmem:[%s8663_s12 + $0x85c] ss:$12 sps:$4 sm:$0xff]  }
 0x345   : > { %4914 = vmatpush1.bf16.msra.mxu1 %v7392_v32  ;;  %v3048_v63 = vpop.f32.mrf.mxu0  ;;  %4769 = vmatprep.subr.bf16.mxu0 %v7395_v49  ;;  %v7417_v32 = vld [vmem:[%s8663_s12 + $0x840] ss:$12 sps:$4 sm:$0xff]  }
 0x346   : > { %4915 = vmatprep.subr.bf16.mxu1 %v7577_v55  ;;  %v9197_v33 = vadd.f32 %v3121_v40, %v3048_v63  ;;  %6297 = vmatprep.mubr.msk.bf16.mxu0 %vm2979_vm9, %v8764_v21  ;;  %v3131_v23 = vpop.f32.mrf.mxu1 }
 0x347   : > { %6518 = vmatprep.mubr.msk.bf16.mxu1 %vm2979_vm9, %v8745_v42  ;;  %v3050_v56 = vpop.f32.mrf.mxu0 }
 0x348   : > { %v9203_v45 = vadd.f32 %v3123_v8, %v3050_v56  ;;  %4770 = vmatpush1.bf16.msra.mxu0 %v7393_v10  ;;  %v3133_v9 = vpop.f32.mrf.mxu1  ;;  %v7421_v10 = vld [vmem:[%s8663_s12 + $0x828] ss:$12 sps:$4 sm:$0xff]  }
 0x349   : > { %4916 = vmatpush1.bf16.msra.mxu1 %v7396_v26  ;;  %v3052_v43 = vpop.f32.mrf.mxu0  ;;  %4771 = vmatprep.subr.bf16.mxu0 %v7399_v35  ;;  %v7426_v26 = vld [vmem:[%s8663_s12 + $0x814] ss:$12 sps:$4 sm:$0xff]   ;;  %v7429_v56 = vld [vmem:[%s8663_s12 + $0x7fc] ss:$12 sps:$4 sm:$0xff]  }
 0x34a   : > { %4921 = vmatprep.subr.bf16.mxu1 %v7577_v55  ;;  %v9209_v51 = vadd.f32 %v3125_v38, %v3052_v43  ;;  %v3135_v0 = vpop.f32.mrf.mxu1 }
 0x34b   : > { %v3056_v27 = vpop.f32.mrf.mxu0  ;;  %4054 = vmatmul.mubr.bf16.gmra.mxu0 %v8766_v28 }
 0x34c   : > { %v9212_v34 = vadd.f32 %v3129_v14, %v3056_v27  ;;  %4772 = vmatpush1.bf16.msra.mxu0 %v7397_v12  ;;  %6298 = vmatprep.mubr.msk.bf16.mxu0 %vm2979_vm9, %v8800_v18 }
 0x34d   : > { %4922 = vmatpush2.bf16.msra.mxu1 %v7400_v16  ;;  %v3058_v19 = vpop.f32.mrf.mxu0  ;;  %4773 = vmatprep.subr.bf16.mxu0 %v7403_v39  ;;  %v7432_v39 = vld [vmem:[%s8663_s12 + $0x7e4] ss:$12 sps:$4 sm:$0xff]  }
 0x34e   : > { %4923 = vmatprep.subr.bf16.mxu1 %v7577_v55  ;;  %v9218_v41 = vadd.f32 %v3131_v23, %v3058_v19  ;;  %v7427_v23 = vld [vmem:[%s8663_s12 + $0x7f8] ss:$12 sps:$4 sm:$0xff]  }
 0x34f   : > { %v3060_v17 = vpop.f32.mrf.mxu0 }
 0x350   : > { %v9222_v24 = vadd.f32 %v3133_v9, %v3060_v17  ;;  %4774 = vmatpush1.bf16.msra.mxu0 %v7401_v4 }
 0x351   : > { %4924 = vmatpush2.bf16.msra.mxu1 %v7404_v62  ;;  %v3062_v53 = vpop.f32.mrf.mxu0  ;;  %4775 = vmatprep.subr.bf16.mxu0 %v7407_v15  ;;  %v7430_v15 = vld [vmem:[%s8663_s12 + $0x7e0] ss:$12 sps:$4 sm:$0xff]  }
 0x352   : > { %4925 = vmatprep.subr.bf16.mxu1 %v7577_v55  ;;  %v9228_v48 = vadd.f32 %v3135_v0, %v3062_v53 }
 0x353   : > { %v6706_v57 = vpop.f32.mrf.mxu0  ;;  %4062 = vmatmul.mubr.bf16.gmra.mxu0 %v8802_v29 }
 0x354   : > { %4776 = vmatpush1.bf16.msra.mxu0 %v7405_v31  ;;  %6514 = vmatprep.mubr.msk.bf16.mxu0 %vm2979_vm9, %v8745_v42  ;;  %v7420_v42 = vld [vmem:[%s8663_s12 + $0x7e8] ss:$12 sps:$4 sm:$0xff]  }
 0x355   : > { %4926 = vmatpush2.bf16.msra.mxu1 %v7408_v22  ;;  %v6707_v11 = vpop.f32.mrf.mxu0  ;;  %4777 = vmatprep.subr.bf16.mxu0 %v7411_v58  ;;  %v2174_v58 = vld [vmem:[%s8709_s18 + $0x98] sm:$0xff] }
 0x356   : > { %4927 = vmatprep.subr.bf16.mxu1 %v7577_v55  ;;  %v9235_v13 = vadd.f32 %v6707_v11, %v6706_v57 }
 0x357   : > { %v6709_v61 = vpop.f32.mrf.mxu0 }
 0x358   : > { %4778 = vmatpush1.bf16.msra.mxu0 %v7409_v44 }
 0x359   : > { %4928 = vmatpush2.bf16.msra.mxu1 %v7412_v46  ;;  %v6710_v40 = vpop.f32.mrf.mxu0  ;;  %4783 = vmatprep.subr.bf16.mxu0 %v7415_v36  ;;  %v7439_v36 = vld [vmem:[%s8709_s18 + $0x88] sm:$0xff] }
 0x35a   : > { %4929 = vmatprep.subr.bf16.mxu1 %v7577_v55  ;;  %v9243_v8 = vadd.f32 %v6710_v40, %v6709_v61  ;;  %v6423_v61 = vcombine.high %v7439_v36, %v2174_v58 }
 0x35b   : > { %v6712_v50 = vpop.f32.mrf.mxu0 }
 0x35c   : > { %4784 = vmatpush2.bf16.msra.mxu0 %v7413_v52 }
 0x35d   : > { %4930 = vmatpush2.bf16.msra.mxu1 %v7416_v37  ;;  %4785 = vmatprep.subr.bf16.mxu0 %v7419_v3  ;;  %v6713_v49 = vpop.f32.mrf.mxu0 }
 0x35e   : > { %4931 = vmatprep.subr.bf16.mxu1 %v7577_v55  ;;  %v9249_v38 = vadd.f32 %v6713_v49, %v6712_v50  ;;  %v7424_v55 = vld [vmem:[%s8663_s12 + $0x810] ss:$12 sps:$4 sm:$0xff]  }
 0x35f   : > { %v6715_v1 = vpop.f32.mrf.mxu0 }
 0x360   : > { %4786 = vmatpush2.bf16.msra.mxu0 %v7417_v32 }
 0x361   : > { %4932 = vmatpush2.bf16.msra.mxu1 %v7420_v42  ;;  %4787 = vmatprep.subr.bf16.mxu0 %v7423_v6  ;;  %v6716_v63 = vpop.f32.mrf.mxu0 }
 0x362   : > { %v9253_v14 = vadd.f32 %v6716_v63, %v6715_v1 }
 0x363   : > { %v6718_v35 = vpop.f32.mrf.mxu0 }
 0x364   : > { %4934 = vmatmul.mubr.bf16.vlgmr.msra.gmra.mxu1 %v8747_v59  ;;  %4788 = vmatpush2.bf16.msra.mxu0 %v7421_v10 }
 0x365   : > { %6519 = vmatprep.mubr.msk.bf16.mxu1 %vm2979_vm9, %v8764_v21  ;;  %4789 = vmatprep.subr.bf16.mxu0 %v7426_v26  ;;  %v6719_v12 = vpop.f32.mrf.mxu0 }
 0x366   : > { %v9260_v16 = vadd.f32 %v6719_v12, %v6718_v35 }
 0x367   : > { %v6721_v43 = vpop.f32.mrf.mxu0 }
 0x368   : > { %4790 = vmatpush2.bf16.msra.mxu0 %v7424_v55 }
 0x369   : > { %4791 = vmatprep.subr.bf16.mxu0 %v7429_v56  ;;  %v6722_v27 = vpop.f32.mrf.mxu0 }
 0x36a   : > { %v9264_v4 = vadd.f32 %v6722_v27, %v6721_v43 }
 0x36b   : > { %v6724_v19 = vpop.f32.mrf.mxu0 }
 0x36c   : > { %v3828_v62 = vpop.f32.mrf.mxu1  ;;  %4942 = vmatmul.mubr.bf16.gmra.mxu1 %v8766_v28  ;;  %4792 = vmatpush2.bf16.msra.mxu0 %v7427_v23 }
 0x36d   : > { %v9268_v9 = vadd.f32 %v3828_v62, %v9150_v60  ;;  %6520 = vmatprep.mubr.msk.bf16.mxu1 %vm2979_vm9, %v8800_v18  ;;  %4793 = vmatprep.subr.bf16.mxu0 %v7432_v39  ;;  %v6725_v31 = vpop.f32.mrf.mxu0 }
 0x36e   : > { %v3830_v17 = vpop.f32.mrf.mxu1  ;;  %v9276_v53 = vadd.f32 %v6725_v31, %v6724_v19 }
 0x36f   : > { %v9274_v22 = vadd.f32 %v3830_v17, %v9157_v25  ;;  %v6727_v57 = vpop.f32.mrf.mxu0 }
 0x370   : > { %v3832_v0 = vpop.f32.mrf.mxu1  ;;  %4794 = vmatpush2.bf16.msra.mxu0 %v7430_v15 }
 0x371   : > { %v9280_v60 = vadd.f32 %v3832_v0, %v9160_v5  ;;  %v6728_v46 = vpop.f32.mrf.mxu0 }
 0x372   : > { %v3834_v44 = vpop.f32.mrf.mxu1  ;;  %v9286_v52 = vadd.f32 %v6728_v46, %v6727_v57 }
 0x373   : > { %v9283_v11 = vadd.f32 %v3834_v44, %v9166_v30  ;;  %4796 = vmatmul.mubr.bf16.vlgmr.msra.gmra.mxu0 %v8747_v59  ;;  %v6422_v59 = vcombine.low %v7439_v36, %v2174_v58 }
 0x374   : > { %v3838_v25 = vpop.f32.mrf.mxu1  ;;  %4950 = vmatmul.mubr.bf16.gmra.mxu1 %v8802_v29  ;;  %6515 = vmatprep.mubr.msk.bf16.mxu0 %vm2979_vm9, %v8764_v21 }
 0x375   : > { %v9291_v37 = vadd.f32 %v3838_v25, %v9170_v54  ;;  %6521 = vmatprep.mubr.msk.bf16.mxu1 %vm2979_vm9, %v6423_v61 }
 0x376   : > { %v3840_v5 = vpop.f32.mrf.mxu1 }
 0x377   : > { %v9297_v30 = vadd.f32 %v3840_v5, %v9176_v7 }
 0x378   : > { %v3842_v40 = vpop.f32.mrf.mxu1 }
 0x379   : > { %v9300_v3 = vadd.f32 %v3842_v40, %v9181_v2 }
 0x37a   : > { %v3844_v50 = vpop.f32.mrf.mxu1 }
 0x37b   : > { %v9303_v32 = vadd.f32 %v3844_v50, %v9187_v20  ;;  %4806 = vmatmul.mubr.bf16.gmra.mxu0 %v8766_v28 }
 0x37c   : > { %v3848_v54 = vpop.f32.mrf.mxu1  ;;  %4958 = vmatmul.mubr.bf16.gmra.mxu1 %v6422_v59  ;;  %6516 = vmatprep.mubr.msk.bf16.mxu0 %vm2979_vm9, %v8800_v18 }
 0x37d   : > { %v9307_v21 = vadd.f32 %v3848_v54, %v9191_v47 }
 0x37e   : > { %v3850_v7 = vpop.f32.mrf.mxu1 }
 0x37f   : > { %v9312_v42 = vadd.f32 %v3850_v7, %v9197_v33 }
 0x380   : > { %v3852_v2 = vpop.f32.mrf.mxu1 }
 0x381   : > { %v9315_v6 = vadd.f32 %v3852_v2, %v9203_v45 }
 0x382   : > { %v3854_v20 = vpop.f32.mrf.mxu1 }
 0x383   : > { %v9318_v49 = vadd.f32 %v3854_v20, %v9209_v51  ;;  %4816 = vmatmul.mubr.bf16.gmra.mxu0 %v8802_v29 }
 0x384   : > { %v3858_v28 = vpop.f32.mrf.mxu1  ;;  %6517 = vmatprep.mubr.msk.bf16.mxu0 %vm2979_vm9, %v6423_v61 }
 0x385   : > { %v9322_v47 = vadd.f32 %v3858_v28, %v9212_v34 }
 0x386   : > { %v3860_v18 = vpop.f32.mrf.mxu1 }
 0x387   : > { %v9326_v33 = vadd.f32 %v3860_v18, %v9218_v41 }
 0x388   : > { %v3862_v1 = vpop.f32.mrf.mxu1 }
 0x389   : > { %v9329_v45 = vadd.f32 %v3862_v1, %v9222_v24 }
 0x38a   : > { %v3864_v10 = vpop.f32.mrf.mxu1 }
 0x38b   : > { %v9332_v51 = vadd.f32 %v3864_v10, %v9228_v48  ;;  %v3237_v26 = vpop.f32.mrf.mxu0  ;;  %4826 = vmatmul.mubr.bf16.gmra.mxu0 %v6422_v59 }
 0x38c   : > { %v6746_v63 = vpop.f32.mrf.mxu1  ;;  %v3238_v29 = vadd.f32 %v9235_v13, %v3237_v26 }
 0x38d   : > { %v3239_v34 = vpop.f32.mrf.mxu0 }
 0x38e   : > { %v6747_v35 = vpop.f32.mrf.mxu1 }
 0x38f   : > { %v6748_v55 = vadd.f32 %v6747_v35, %v6746_v63  ;;  %v3240_v56 = vpop.f32.mrf.mxu0 }
 0x390   : > { %v6749_v12 = vpop.f32.mrf.mxu1  ;;  %v3241_v41 = vadd.f32 %v9243_v8, %v3240_v56 }
 0x391   : > { %v9336_v43 = vadd.f32 %v6748_v55, %v3238_v29  ;;  %v3242_v24 = vpop.f32.mrf.mxu0 }
 0x392   : > { %v6750_v23 = vpop.f32.mrf.mxu1 }
 0x393   : > { %v6751_v39 = vadd.f32 %v6750_v23, %v6749_v12  ;;  %v3245_v27 = vpop.f32.mrf.mxu0 }
 0x394   : > { %v6752_v48 = vpop.f32.mrf.mxu1  ;;  %v3246_v62 = vadd.f32 %v9249_v38, %v3245_v27 }
 0x395   : > { %v9339_v19 = vadd.f32 %v6751_v39, %v3241_v41  ;;  %v3247_v15 = vpop.f32.mrf.mxu0 }
 0x396   : > { %v6753_v13 = vpop.f32.mrf.mxu1 }
 0x397   : > { %v6754_v17 = vadd.f32 %v6753_v13, %v6752_v48  ;;  %v3248_v31 = vpop.f32.mrf.mxu0 }
 0x398   : > { %v6755_v0 = vpop.f32.mrf.mxu1  ;;  %v3249_v58 = vadd.f32 %v9253_v14, %v3248_v31 }
 0x399   : > { %v9342_v57 = vadd.f32 %v6754_v17, %v3246_v62  ;;  %v3250_v8 = vpop.f32.mrf.mxu0 }
 0x39a   : > { %v6756_v44 = vpop.f32.mrf.mxu1 }
 0x39b   : > { %v6757_v46 = vadd.f32 %v6756_v44, %v6755_v0  ;;  %v3253_v36 = vpop.f32.mrf.mxu0 }
 0x39c   : > { %v6758_v61 = vpop.f32.mrf.mxu1  ;;  %v3254_v25 = vadd.f32 %v9260_v16, %v3253_v36 }
 0x39d   : > { %v9345_v5 = vadd.f32 %v6757_v46, %v3249_v58  ;;  %v3255_v38 = vpop.f32.mrf.mxu0 }
 0x39e   : > { %v6759_v40 = vpop.f32.mrf.mxu1 }
 0x39f   : > { %v6760_v50 = vadd.f32 %v6759_v40, %v6758_v61  ;;  %v3256_v59 = vpop.f32.mrf.mxu0 }
 0x3a0   : > { %v6761_v54 = vpop.f32.mrf.mxu1  ;;  %v3257_v7 = vadd.f32 %v9264_v4, %v3256_v59 }
 0x3a1   : > { %v9348_v2 = vadd.f32 %v6760_v50, %v3254_v25  ;;  %v3258_v14 = vpop.f32.mrf.mxu0 }
 0x3a2   : > { %v6762_v20 = vpop.f32.mrf.mxu1 }
 0x3a3   : > { %v6763_v28 = vadd.f32 %v6762_v20, %v6761_v54  ;;  %v3261_v18 = vpop.f32.mrf.mxu0 }
 0x3a4   : > { %v6764_v1 = vpop.f32.mrf.mxu1  ;;  %v3262_v10 = vadd.f32 %v9276_v53, %v3261_v18 }
 0x3a5   : > { %v9351_v26 = vadd.f32 %v6763_v28, %v3257_v7  ;;  %v3263_v16 = vpop.f32.mrf.mxu0 }
 0x3a6   : > { %v6765_v63 = vpop.f32.mrf.mxu1 }
 0x3a7   : > { %v6766_v29 = vadd.f32 %v6765_v63, %v6764_v1  ;;  %v3264_v34 = vpop.f32.mrf.mxu0 }
 0x3a8   : > { %v6767_v35 = vpop.f32.mrf.mxu1  ;;  %v3265_v55 = vadd.f32 %v9286_v52, %v3264_v34 }
 0x3a9   : > { %v9354_v56 = vadd.f32 %v6766_v29, %v3262_v10  ;;  %v3266_v12 = vpop.f32.mrf.mxu0 }
 0x3aa   : > { %v6768_v4 = vpop.f32.mrf.mxu1 }
 0x3ab   : > { %v6769_v41 = vadd.f32 %v6768_v4, %v6767_v35 }
 0x3ad   : > { %v9356_v24 = vadd.f32 %v6769_v41, %v3265_v55 }
 0x3c3   : > { %v3901_v23 = vpop.f32.mrf.mxu0 }
 0x3c4   : > { %v9359_v39 = vadd.f32 %v3901_v23, %v9268_v9 }
 0x3c5   : > { %v3903_v53 = vpop.f32.mrf.mxu0 }
 0x3c6   : > { %v9362_v27 = vadd.f32 %v3903_v53, %v9274_v22 }
 0x3c7   : > { %v3905_v48 = vpop.f32.mrf.mxu0 }
 0x3c8   : > { %v9365_v62 = vadd.f32 %v3905_v48, %v9280_v60 }
 0x3c9   : > { %v3907_v52 = vpop.f32.mrf.mxu0 }
 0x3ca   : > { %v9368_v15 = vadd.f32 %v3907_v52, %v9283_v11 }
 0x3cb   : > { %v3911_v13 = vpop.f32.mrf.mxu0 }
 0x3cc   : > { %v9370_v17 = vpop.f32.mrf.mxu1  ;;  %v9373_v31 = vadd.f32 %v3911_v13, %v9291_v37 }
 0x3cd   : > { %v3913_v9 = vpop.f32.mrf.mxu0 }
 0x3ce   : > { %v9375_v0 = vpop.f32.mrf.mxu1  ;;  %v9378_v22 = vadd.f32 %v3913_v9, %v9297_v30 }
 0x3cf   : > { %v3915_v58 = vpop.f32.mrf.mxu0 }
 0x3d0   : > { %v9380_v8 = vpop.f32.mrf.mxu1  ;;  %v9383_v60 = vadd.f32 %v3915_v58, %v9300_v3 }
 0x3d1   : > { %v3917_v11 = vpop.f32.mrf.mxu0 }
 0x3d2   : > { %v9385_v44 = vpop.f32.mrf.mxu1  ;;  %v9388_v46 = vadd.f32 %v3917_v11, %v9303_v32 }
 0x3d3   : > { %v3921_v37 = vpop.f32.mrf.mxu0 }
 0x3d4   : > { %v9390_v36 = vpop.f32.mrf.mxu1  ;;  %v9393_v61 = vadd.f32 %v3921_v37, %v9307_v21 }
 0x3d5   : > { %v3923_v30 = vpop.f32.mrf.mxu0 }
 0x3d6   : > { %9842 = vst [vmem:[#allocation18_spill] sm:$0xff] %v9393_v61  ;;  %v9395_v25 = vpop.f32.mrf.mxu1  ;;  %v9398_v38 = vadd.f32 %v3923_v30, %v9312_v42 }
 0x3d7   : > { %v3925_v3 = vpop.f32.mrf.mxu0 }
 0x3d8   : > { %9843 = vst [vmem:[#allocation19_spill] sm:$0xff] %v9398_v38  ;;  %v9400_v40 = vpop.f32.mrf.mxu1  ;;  %v9403_v50 = vadd.f32 %v3925_v3, %v9315_v6 }
 0x3d9   : > { %v3927_v32 = vpop.f32.mrf.mxu0 }
 0x3da   : > { %9844 = vst [vmem:[#allocation20_spill] sm:$0xff] %v9403_v50  ;;  %v9405_v59 = vpop.f32.mrf.mxu1  ;;  %v9408_v54 = vadd.f32 %v3927_v32, %v9318_v49 }
 0x3db   : > { %v3931_v21 = vpop.f32.mrf.mxu0 }
 0x3dc   : > { %9845 = vst [vmem:[#allocation21_spill] sm:$0xff] %v9408_v54  ;;  %v9410_v7 = vpop.f32.mrf.mxu1  ;;  %v9413_v14 = vadd.f32 %v3931_v21, %v9322_v47 }
 0x3dd   : > { %9846 = vst [vmem:[#allocation22_spill] sm:$0xff] %v9410_v7  ;;  %v3933_v42 = vpop.f32.mrf.mxu0 }
 0x3de   : > { %9847 = vst [vmem:[#allocation23_spill] sm:$0xff] %v9413_v14  ;;  %v9415_v20 = vpop.f32.mrf.mxu1  ;;  %v9418_v28 = vadd.f32 %v3933_v42, %v9326_v33  ;;  %v4992_v14 = vld [vmem:[#allocation2 + $0x10] sm:$0xff] }
 0x3df   : > { %9848 = vst [vmem:[#allocation24_spill] sm:$0xff] %v9415_v20  ;;  %v3935_v6 = vpop.f32.mrf.mxu0  ;;  %v4995_v20 = vld [vmem:[#allocation2 + $0x28] sm:$0xff] }
 0x3e0   : > { %9849 = vst [vmem:[#allocation25_spill] sm:$0xff] %v9418_v28  ;;  %v9420_v18 = vpop.f32.mrf.mxu1  ;;  %v9423_v1 = vadd.f32 %v3935_v6, %v9329_v45 }
 0x3e1   : > { %9850 = vst [vmem:[#allocation26_spill] sm:$0xff] %v9420_v18  ;;  %v3937_v49 = vpop.f32.mrf.mxu0 }
 0x3e2   : > { %9851 = vst [vmem:[#allocation27_spill] sm:$0xff] %v9423_v1  ;;  %v9425_v10 = vpop.f32.mrf.mxu1  ;;  %v9428_v16 = vadd.f32 %v3937_v49, %v9332_v51 }
 0x3e3   : > { %9852 = vst [vmem:[#allocation28_spill] sm:$0xff] %v9425_v10 }
 0x3e4   : > { %9853 = vst [vmem:[#allocation29_spill] sm:$0xff] %v9428_v16  ;;  %v9430_v47 = vpop.f32.mrf.mxu1 }
 0x3e5   : > { %9854 = vst [vmem:[#allocation30_spill] sm:$0xff] %v9430_v47 }
 0x3e6   : > { %v9432_v63 = vpop.f32.mrf.mxu1 }
 0x3e7   : > { %9855 = vst [vmem:[#allocation31_spill] sm:$0xff] %v9432_v63 }
 0x3e8   : > { %v9434_v29 = vpop.f32.mrf.mxu1 }
 0x3e9   : > { %9856 = vst [vmem:[#allocation32_spill] sm:$0xff] %v9434_v29 }
 0x3ea   : > { %v9436_v33 = vpop.f32.mrf.mxu1 }
 0x3eb   : > { %9857 = vst [vmem:[#allocation33_spill] sm:$0xff] %v9436_v33 }
 0x3ec   : > { %v6786_v34 = vpop.f32.mrf.mxu1 }
 0x3ee   : > { %v6787_v35 = vpop.f32.mrf.mxu1 }
 0x3f0   : > { %v6789_v55 = vpop.f32.mrf.mxu1 }
 0x3f2   : > { %v6790_v4 = vpop.f32.mrf.mxu1 }
 0x3f3   : > { %v6791_v54 = vadd.f32 %v6790_v4, %v6789_v55  ;;  %v5001_v4 = vld [vmem:[#allocation2 + $0x58] sm:$0xff] }
 0x3f4   : > { %v6792_v45 = vpop.f32.mrf.mxu1 }
 0x3f6   : > { %v6793_v12 = vpop.f32.mrf.mxu1 }
 0x3f7   : > { %v6794_v61 = vadd.f32 %v6793_v12, %v6792_v45 }
 0x3f8   : > { %v6795_v53 = vpop.f32.mrf.mxu1 }
 0x3fa   : > { %v6796_v52 = vpop.f32.mrf.mxu1 }
 0x3fb   : > { %v4039_v41 = vpop.f32.mrf.mxu0  ;;  %v6797_v55 = vadd.f32 %v6796_v52, %v6795_v53  ;;  %v4990_v53 = vld [vmem:[#allocation2] sm:$0xff] }
 0x3fc   : > { %v6798_v58 = vpop.f32.mrf.mxu1  ;;  %v4040_v63 = vadd.f32 %v4039_v41, %v9336_v43  ;;  %v4998_v41 = vld [vmem:[#allocation2 + $0x40] sm:$0xff] }
 0x3fd   : > { %v4041_v23 = vpop.f32.mrf.mxu0 }
 0x3fe   : > { %v6799_v30 = vpop.f32.mrf.mxu1 }
 0x3ff   : > { %v4042_v48 = vpop.f32.mrf.mxu0 }
 0x400   : > { %v6801_v21 = vpop.f32.mrf.mxu1  ;;  %v4043_v50 = vadd.f32 %v4042_v48, %v9339_v19  ;;  %v5004_v48 = vld [vmem:[#allocation2 + $0x70] sm:$0xff] }
 0x401   : > { %v4044_v51 = vpop.f32.mrf.mxu0 }
 0x402   : > { %v6802_v49 = vpop.f32.mrf.mxu1 }
 0x403   : > { %v4047_v13 = vpop.f32.mrf.mxu0 }
 0x404   : > { %v9442_v33 = vpop.f32.mrf.mxu1 }
 0x405   : > { %v4049_v9 = vpop.f32.mrf.mxu0 }
 0x406   : > { %v9446_v1 = vpop.f32.mrf.mxu1 }
 0x407   : > { %v4050_v11 = vpop.f32.mrf.mxu0 }
 0x408   : > { %v9448_v29 = vpop.f32.mrf.mxu1 }
 0x409   : > { %v4052_v37 = vpop.f32.mrf.mxu0 }
 0x40a   : > { %v9450_v37 = vpop.f32.mrf.mxu1 }
 0x40b   : > { %v4055_v3 = vpop.f32.mrf.mxu0 }
 0x40d   : > { %v4057_v32 = vpop.f32.mrf.mxu0 }
 0x40e   : > { %v6788_v32 = vadd.f32 %v6787_v35, %v6786_v34  ;;  %v4048_v35 = vadd.f32 %v4047_v13, %v9342_v57 }
 0x40f   : > { %v9438_v42 = vpop.f32.mrf.mxu0 }
 0x411   : > { %v4060_v6 = vpop.f32.mrf.mxu0 }
 0x413   : > { %v9440_v16 = vpop.f32.mrf.mxu0 }
 0x415   : > { %v4065_v23 = vpop.f32.mrf.mxu0 }
 0x417   : > { %v9444_v51 = vpop.f32.mrf.mxu0 }
 0x419   : > { %v4068_v9 = vpop.f32.mrf.mxu0 }
 0x424   : > { %v4935_v28 = vpop.f32.mrf.mxu1 }
 0x425   : > { %v4936_v6 = vadd.f32 %v6788_v32, %v4935_v28  ;;  %v4991_v32 = vld [vmem:[#allocation2 + $0x8] sm:$0xff] }
 0x426   : > { %v4937_v47 = vpop.f32.mrf.mxu1 }
 0x427   : > { %v4968_v23 = vadd.f32 %v4936_v6, %v4040_v63 }
 0x428   : > { %v4938_v10 = vpop.f32.mrf.mxu1 }
 0x429   : > { %v5016_v18 = vadd.f32 %v4992_v14, %v4968_v23  ;;  %v4939_v38 = vadd.f32 %v6791_v54, %v4938_v10  ;;  %v4051_v54 = vadd.f32 %v4050_v11, %v9345_v5 }
 0x42a   : > { %v4940_v9 = vpop.f32.mrf.mxu1 }
 0x42b   : > { %5040 = vst.msk [vmem:[#allocation2 + $0x10] sm:$0xff] %vm2979_vm9, %v5016_v18  ;;  %v4971_v7 = vadd.f32 %v4939_v38, %v4043_v50  ;;  %v6800_v18 = vadd.f32 %v6799_v30, %v6798_v58  ;;  %v6803_v30 = vadd.f32 %v6802_v49, %v6801_v21 }
 0x42c   : > { %v4943_v34 = vpop.f32.mrf.mxu1 }
 0x42d   : > { %v5019_v43 = vadd.f32 %v4995_v20, %v4971_v7  ;;  %v4944_v28 = vadd.f32 %v6794_v61, %v4943_v34  ;;  %v4056_v61 = vadd.f32 %v4055_v3, %v9348_v2  ;;  %v4059_v34 = vadd.f32 %v9438_v42, %v9351_v26  ;;  %v4994_v42 = vld [vmem:[#allocation2 + $0x20] sm:$0xff] }
 0x42e   : > { %v4945_v47 = vpop.f32.mrf.mxu1 }
 0x42f   : > { %5043 = vst.msk [vmem:[#allocation2 + $0x28] sm:$0xff] %vm2979_vm9, %v5019_v43  ;;  %v4974_v63 = vadd.f32 %v4944_v28, %v4048_v35  ;;  %v4993_v35 = vld [vmem:[#allocation2 + $0x18] sm:$0xff] }
 0x430   : > { %v4946_v19 = vpop.f32.mrf.mxu1 }
 0x431   : > { %v5022_v14 = vadd.f32 %v4998_v41, %v4974_v63  ;;  %v4947_v10 = vadd.f32 %v6797_v55, %v4946_v19  ;;  %v5007_v41 = vld [vmem:[#allocation2 + $0x88] sm:$0xff] }
 0x432   : > { %v4948_v45 = vpop.f32.mrf.mxu1 }
 0x433   : > { %5046 = vst.msk [vmem:[#allocation2 + $0x40] sm:$0xff] %vm2979_vm9, %v5022_v14  ;;  %v4977_v38 = vadd.f32 %v4947_v10, %v4051_v54  ;;  %v4797_v57 = vpop.f32.mrf.mxu0  ;;  %v4996_v14 = vld [vmem:[#allocation2 + $0x30] sm:$0xff] }
 0x434   : > { %v4951_v50 = vpop.f32.mrf.mxu1  ;;  %v4798_v20 = vadd.f32 %v4797_v57, %v9370_v17 }
 0x435   : > { %v5025_v7 = vadd.f32 %v5001_v4, %v4977_v38  ;;  %v4952_v12 = vadd.f32 %v6800_v18, %v4951_v50  ;;  %v4799_v52 = vpop.f32.mrf.mxu0  ;;  %v6809_v18 = vadd.f32 %v9450_v37, %v9448_v29 }
 0x436   : > { %v4953_v5 = vpop.f32.mrf.mxu1  ;;  %v4966_v13 = vadd.f32 %v4798_v20, %v9359_v39  ;;  %v4800_v11 = vadd.f32 %v4799_v52, %v9375_v0  ;;  %v6806_v0 = vadd.f32 %v9446_v1, %v9442_v33  ;;  %v4999_v20 = vld [vmem:[#allocation2 + $0x48] sm:$0xff] }
 0x437   : > { %5049 = vst.msk [vmem:[#allocation2 + $0x58] sm:$0xff] %vm2979_vm9, %v5025_v7  ;;  %v4980_v58 = vadd.f32 %v4952_v12, %v4056_v61  ;;  %v4801_v6 = vpop.f32.mrf.mxu0 }
 0x438   : > { %v4954_v23 = vpop.f32.mrf.mxu1  ;;  %v5014_v2 = vadd.f32 %v4990_v53, %v4966_v13  ;;  %v4967_v17 = vadd.f32 %v4800_v11, %v9362_v27  ;;  %v4802_v9 = vadd.f32 %v4801_v6, %v9380_v8  ;;  %v4064_v8 = vadd.f32 %v9440_v16, %v9354_v56 }
 0x439   : > { %v5028_v3 = vadd.f32 %v5004_v48, %v4980_v58  ;;  %v4955_v43 = vadd.f32 %v6803_v30, %v4954_v23  ;;  %v4803_v28 = vpop.f32.mrf.mxu0  ;;  %v5013_v48 = vld [vmem:[#allocation2 + $0xb8] sm:$0xff]  ;;  %v5002_v30 = vld [vmem:[#allocation2 + $0x60] sm:$0xff] }
 0x43a   : > { %v4956_v39 = vpop.f32.mrf.mxu1  ;;  %5038 = vst [vmem:[#allocation2] sm:$0xff] %v5014_v2  ;;  %v5015_v21 = vadd.f32 %v4991_v32, %v4967_v17  ;;  %v4969_v49 = vadd.f32 %v4802_v9, %v9365_v62  ;;  %v4804_v27 = vadd.f32 %v4803_v28, %v9385_v44  ;;  %v5010_v62 = vld [vmem:[#allocation2 + $0xa0] sm:$0xff]  ;;  %v5005_v28 = vld [vmem:[#allocation2 + $0x78] sm:$0xff] }
 0x43b   : > { %5052 = vst.msk [vmem:[#allocation2 + $0x70] sm:$0xff] %vm2979_vm9, %v5028_v3  ;;  %v4983_v26 = vadd.f32 %v4955_v43, %v4059_v34  ;;  %v4807_v47 = vpop.f32.mrf.mxu0  ;;  %v9859_v23 = vld [vmem:[#allocation18_spill] sm:$0xff]  ;;  %v9861_v34 = vld [vmem:[#allocation19_spill] sm:$0xff] }
 0x43c   : > { %v4959_v55 = vpop.f32.mrf.mxu1  ;;  %5039 = vst [vmem:[#allocation2 + $0x8] sm:$0xff] %v5015_v21  ;;  %v5017_v63 = vadd.f32 %v4993_v35, %v4969_v49  ;;  %v4970_v1 = vadd.f32 %v4804_v27, %v9368_v15  ;;  %v4808_v33 = vadd.f32 %v4807_v47, %v9390_v36  ;;  %v4997_v15 = vld [vmem:[#allocation2 + $0x38] sm:$0xff]  ;;  %v9863_v21 = vld [vmem:[#allocation20_spill] sm:$0xff] }
 0x43d   : > { %v4960_v19 = vadd.f32 %v6806_v0, %v4959_v55  ;;  %v5031_v54 = vadd.f32 %v5007_v41, %v4983_v26  ;;  %v4809_v10 = vpop.f32.mrf.mxu0  ;;  %v9864_v41 = vld [vmem:[#allocation28_spill] sm:$0xff]  ;;  %v9865_v47 = vld [vmem:[#allocation21_spill] sm:$0xff] }
 0x43e   : > { %v4961_v4 = vpop.f32.mrf.mxu1  ;;  %5041 = vst [vmem:[#allocation2 + $0x18] sm:$0xff] %v5017_v63  ;;  %v5018_v44 = vadd.f32 %v4994_v42, %v4970_v1  ;;  %v4972_v56 = vadd.f32 %v4808_v33, %v9373_v31  ;;  %v4810_v45 = vadd.f32 %v4809_v10, %v9395_v25  ;;  %v4067_v31 = vadd.f32 %v9444_v51, %v9356_v24  ;;  %v9858_v51 = vld [vmem:[#allocation22_spill] sm:$0xff]  ;;  %v5008_v33 = vld [vmem:[#allocation2 + $0x90] sm:$0xff]  ;;  %v9868_v10 = vld [vmem:[#allocation31_spill] sm:$0xff] }
 0x43f   : > { %v4986_v16 = vadd.f32 %v4960_v19, %v4064_v8  ;;  %5055 = vst.msk [vmem:[#allocation2 + $0x88] sm:$0xff] %vm2979_vm9, %v5031_v54  ;;  %v4811_v36 = vpop.f32.mrf.mxu0  ;;  %v5006_v8 = vld [vmem:[#allocation2 + $0x80] sm:$0xff] }
 0x440   : > { %v4962_v38 = vpop.f32.mrf.mxu1  ;;  %5042 = vst [vmem:[#allocation2 + $0x20] sm:$0xff] %v5018_v44  ;;  %v5020_v57 = vadd.f32 %v4996_v14, %v4972_v56  ;;  %v4973_v61 = vadd.f32 %v4810_v45, %v9378_v22  ;;  %v4812_v7 = vadd.f32 %v4811_v36, %v9400_v40  ;;  %v5000_v22 = vld [vmem:[#allocation2 + $0x50] sm:$0xff]  ;;  %v9866_v63 = vld [vmem:[#allocation30_spill] sm:$0xff]  ;;  %v9867_v14 = vld [vmem:[#allocation23_spill] sm:$0xff] }
 0x441   : > { %v5034_v50 = vadd.f32 %v5010_v62, %v4986_v16  ;;  %v4963_v25 = vadd.f32 %v6809_v18, %v4962_v38  ;;  %v4813_v12 = vpop.f32.mrf.mxu0  ;;  %v5009_v44 = vld [vmem:[#allocation2 + $0x98] sm:$0xff]  ;;  %v5011_v38 = vld [vmem:[#allocation2 + $0xa8] sm:$0xff] }
 0x442   : > { %v4964_v53 = vpop.f32.mrf.mxu1  ;;  %5044 = vst [vmem:[#allocation2 + $0x30] sm:$0xff] %v5020_v57  ;;  %v5021_v29 = vadd.f32 %v4997_v15, %v4973_v61  ;;  %v4975_v37 = vadd.f32 %v4812_v7, %v9383_v60  ;;  %v4814_v52 = vadd.f32 %v4813_v12, %v9405_v59  ;;  %v9860_v60 = vld [vmem:[#allocation24_spill] sm:$0xff]  ;;  %v5003_v59 = vld [vmem:[#allocation2 + $0x68] sm:$0xff]  ;;  %v9869_v45 = vld [vmem:[#allocation25_spill] sm:$0xff] }
 0x443   : > { %5058 = vst.msk [vmem:[#allocation2 + $0xa0] sm:$0xff] %vm2979_vm9, %v5034_v50  ;;  %v4989_v5 = vadd.f32 %v4963_v25, %v4067_v31  ;;  %v4817_v13 = vpop.f32.mrf.mxu0  ;;  %v9870_v15 = vld [vmem:[#allocation32_spill] sm:$0xff]  ;;  %v9871_v61 = vld [vmem:[#allocation27_spill] sm:$0xff]  ;;  %v9872_v31 = vld [vmem:[#allocation33_spill] sm:$0xff] }
 0x444   : > { %5045 = vst [vmem:[#allocation2 + $0x38] sm:$0xff] %v5021_v29  ;;  %v5023_v40 = vadd.f32 %v4999_v20, %v4975_v37  ;;  %v4976_v24 = vadd.f32 %v4814_v52, %v9388_v46  ;;  %v4818_v58 = vadd.f32 %v4817_v13, %v9858_v51  ;;  %v9862_v46 = vld [vmem:[#allocation26_spill] sm:$0xff]  ;;  %v5012_v25 = vld [vmem:[#allocation2 + $0xb0] sm:$0xff]  ;;  %v9873_v53 = vld [vmem:[#allocation29_spill] sm:$0xff] }
 0x445   : > { %v5037_v11 = vadd.f32 %v5013_v48, %v4989_v5  ;;  %v4819_v32 = vpop.f32.mrf.mxu0 }
 0x446   : > { %5047 = vst [vmem:[#allocation2 + $0x48] sm:$0xff] %v5023_v40  ;;  %v5024_v6 = vadd.f32 %v5000_v22, %v4976_v24  ;;  %v4978_v2 = vadd.f32 %v4818_v58, %v9859_v23  ;;  %v4820_v3 = vadd.f32 %v4819_v32, %v9860_v60 }
 0x447   : > { %5061 = vst.msk [vmem:[#allocation2 + $0xb8] sm:$0xff] %vm2979_vm9, %v5037_v11  ;;  %v4821_v17 = vpop.f32.mrf.mxu0 }
 0x448   : > { %5048 = vst [vmem:[#allocation2 + $0x50] sm:$0xff] %v5024_v6  ;;  %v5026_v9 = vadd.f32 %v5002_v30, %v4978_v2  ;;  %v4979_v35 = vadd.f32 %v4820_v3, %v9861_v34  ;;  %v4822_v43 = vadd.f32 %v4821_v17, %v9862_v46 }
 0x449   : > { %v4823_v39 = vpop.f32.mrf.mxu0 }
 0x44a   : > { %5050 = vst [vmem:[#allocation2 + $0x60] sm:$0xff] %v5026_v9  ;;  %v5027_v0 = vadd.f32 %v5003_v59, %v4979_v35  ;;  %v4981_v49 = vadd.f32 %v4822_v43, %v9863_v21  ;;  %v4824_v27 = vadd.f32 %v4823_v39, %v9864_v41 }
 0x44b   : > { %v4827_v26 = vpop.f32.mrf.mxu0 }
 0x44c   : > { %5051 = vst [vmem:[#allocation2 + $0x68] sm:$0xff] %v5027_v0  ;;  %v5029_v42 = vadd.f32 %v5005_v28, %v4981_v49  ;;  %v4982_v55 = vadd.f32 %v4824_v27, %v9865_v47  ;;  %v4828_v1 = vadd.f32 %v4827_v26, %v9866_v63 }
 0x44d   : > { %v4829_v19 = vpop.f32.mrf.mxu0 }
 0x44e   : > { %5053 = vst [vmem:[#allocation2 + $0x78] sm:$0xff] %v5029_v42  ;;  %v5030_v54 = vadd.f32 %v5006_v8, %v4982_v55  ;;  %v4984_v62 = vadd.f32 %v4828_v1, %v9867_v14  ;;  %v4830_v4 = vadd.f32 %v4829_v19, %v9868_v10 }
 0x44f   : > { %v4831_v56 = vpop.f32.mrf.mxu0 }
 0x450   : > { %5054 = vst [vmem:[#allocation2 + $0x80] sm:$0xff] %v5030_v54  ;;  %v5032_v16 = vadd.f32 %v5008_v33, %v4984_v62  ;;  %v4985_v18 = vadd.f32 %v4830_v4, %v9869_v45  ;;  %v4832_v36 = vadd.f32 %v4831_v56, %v9870_v15 }
 0x451   : > { %v4833_v57 = vpop.f32.mrf.mxu0 }
 0x452   : > { %5056 = vst [vmem:[#allocation2 + $0x90] sm:$0xff] %v5032_v16  ;;  %v5033_v50 = vadd.f32 %v5009_v44, %v4985_v18  ;;  %v4987_v7 = vadd.f32 %v4832_v36, %v9871_v61  ;;  %v4834_v20 = vadd.f32 %v4833_v57, %v9872_v31 }
 0x454   : > { %5057 = vst [vmem:[#allocation2 + $0x98] sm:$0xff] %v5033_v50  ;;  %v5035_v12 = vadd.f32 %v5011_v38, %v4987_v7  ;;  %v4988_v29 = vadd.f32 %v4834_v20, %v9873_v53 }
 0x456   : > { %5059 = vst [vmem:[#allocation2 + $0xa8] sm:$0xff] %v5035_v12  ;;  %v5036_v37 = vadd.f32 %v5012_v25, %v4988_v29 }
 0x458   : > { %5060 = vst [vmem:[#allocation2 + $0xb0] sm:$0xff] %v5036_v37 }
 0x459 PF: > { %p6522_p9 = scmp.ne.s32.totalorder %s7546_s30, 2 }
 0x45a   : > { %s5066_s12 = ssub.s32 (!%p6522_p9), 0, %s7550_s9  ;;  %s9526_s19 = sadd.s32 (!%p6522_p9), 2, %s7550_s9 }
 0x45b   : > { %5064 = sbr.rel (%p6522_p9) target bundleno = 1499 (0x5db), region = 72  ;;  %s6523_s30 = smin.u32 (!%p6522_p9), %s7550_s9, %s5066_s12 }
 0x45c   : > { %7456 = sdivrem.u32 (!%p6522_p9), %s6523_s30, 3  ;;  %s5100_s15 = ssub.s32 (!%p6522_p9), 0, %s9526_s19 }
 0x45d   : > { %s6528_s12 = smin.u32 (!%p6522_p9), %s5100_s15, %s9526_s19  ;;  %s5135_s30 = ssub.s32 (!%p6522_p9), 0, %s7714_s16 }
 0x45e   : > { %7458 = sdivrem.u32 (!%p6522_p9), %s6528_s12, 3  ;;  %s6533_s13 = smin.u32 (!%p6522_p9), %s5135_s30, %s7714_s16 }
 0x45f   : > { %p5065_p11 = scmp.lt.s32.totalorder (!%p6522_p9), %s7550_s9, 0  ;;  %7460 = sdivrem.u32 (!%p6522_p9), %s6533_s13, 3 }
 0x460   : > { %v7440_v48 = vld [vmem:[%s9788_s5 + $0x78] sm:$0xff]   ;;  %v7442_v5 = vld [vmem:[%s9788_s5 + $0x70] sm:$0xff]   ;;  %v7444_v13 = vld [vmem:[%s9788_s5 + $0x68] sm:$0xff]   ;;  %p5097_p12 = scmp.ge.s32.totalorder %s7550_s9, 1  ;;  %p5099_p13 = scmp.lt.s32.totalorder %s9526_s19, 0  ;;  %vm5461_vm0 = vcmask 785664  }
 0x461   : > { %v7441_v52 = vld [vmem:[%s9788_s5 + $0x38] sm:$0xff]   ;;  %6810 = vmatprep.subr.bf16.mxu0 %v7440_v48  ;;  %6850 = vmatprep.subr.bf16.mxu1 %v7440_v48  ;;  %v7443_v22 = vld [vmem:[%s9788_s5 + $0x30] sm:$0xff]   ;;  %v7445_v40 = vld [vmem:[%s9788_s5 + $0x28] sm:$0xff]   ;;  %p5134_p2 = scmp.lt.s32.totalorder %s7714_s16, 0  ;;  %s7578_s18 = smov 32   ;;  %vm5681_vm2 = vcmask 781312  }
 0x462   : > { %6811 = vmatpush3.bf16.msra.mxu0 %v7441_v52  ;;  %6858 = vmatpush3.bf16.msra.mxu1 %v7441_v52  ;;  %v7446_v24 = vld [vmem:[%s9788_s5 + $0x60] sm:$0xff]   ;;  %v7448_v58 = vld [vmem:[%s9788_s5 + $0x58] sm:$0xff]   ;;  %v7450_v30 = vld [vmem:[%s9788_s5 + $0x50] sm:$0xff]   ;;  %s5123_s1 = scalar_select %p5097_p12, 1, 0 }
 0x463   : > { %6812 = vmatprep.subr.bf16.mxu0 %v7442_v5  ;;  %6851 = vmatprep.subr.bf16.mxu1 %v7442_v5  ;;  %v7447_v51 = vld [vmem:[%s9788_s5 + $0x20] sm:$0xff]   ;;  %v7449_v11 = vld [vmem:[%s9788_s5 + $0x18] sm:$0xff]   ;;  %v7451_v32 = vld [vmem:[%s9788_s5 + $0x10] sm:$0xff]  }
 0x464   : > { %v7452_v6 = vld [vmem:[%s9788_s5 + $0x48] sm:$0xff]   ;;  %v7454_v2 = vld [vmem:[%s9788_s5 + $0x40] sm:$0xff]   ;;  %v5124_v28 = vstv %s5123_s1 }
 0x465   : > { %s7457_s22 = spop.drf %7456  ;;  %v7453_v23 = vld [vmem:[%s9788_s5 + $0x8] sm:$0xff]   ;;  %v7455_v43 = vld [vmem:[%s9788_s5] sm:$0xff]   ;;  %vm9591_vm12 = vcmp.eq.s32.totalorder %v5124_v28, 1 }
 0x466   : > { %6813 = vmatpush3.bf16.msra.mxu0 %v7443_v22  ;;  %6859 = vmatpush3.bf16.msra.mxu1 %v7443_v22  ;;  %s5070_s23 = ssub.s32 0, %s7457_s22 }
 0x467   : > { %6814 = vmatprep.subr.bf16.mxu0 %v7444_v13  ;;  %6852 = vmatprep.subr.bf16.mxu1 %v7444_v13  ;;  %s9914_s23 = smov (!%p5065_p11, %s5070_s23), %s7457_s22  ;;  %s7459_s24 = spop.drf %7458 }
 0x468   : > { %p6525_p0 = scmp.lt.s32.totalorder %s9914_s23, 0  ;;  %s5076_s13 = sadd.s32 3, %s9914_s23 }
 0x469   : > { %s5104_s15 = ssub.s32 0, %s7459_s24  ;;  %s7461_s22 = spop.drf %7460 }
 0x46a   : > { %6815 = vmatpush3.bf16.msra.mxu0 %v7445_v40  ;;  %6860 = vmatpush3.bf16.msra.mxu1 %v7445_v40  ;;  %s9916_s13 = smov (!%p6525_p0, %s5076_s13), %s9914_s23  ;;  %s5139_s25 = ssub.s32 0, %s7461_s22 }
 0x46b   : > { %6816 = vmatprep.subr.bf16.mxu0 %v7446_v24  ;;  %6853 = vmatprep.subr.bf16.mxu1 %v7446_v24  ;;  %s6607_s23 = sshll.u32 %s9916_s13, 5  ;;  %s6610_s17 = sshll.u32 %s9916_s13, 6 }
 0x46c   : > { %s5080_s2 = scalar_lea.vmem [#allocation4], %s6607_s23  ;;  %s9918_s15 = smov (!%p5099_p13, %s5104_s15), %s7459_s24 }
 0x46d   : > { %v5081_v60 = vld [vmem:[%s5080_s2] sm:$0xf]  ;;  %v5082_v3 = vld [vmem:[%s5080_s2 + $0x4] sm:$0xf]  ;;  %v5083_v59 = vld [vmem:[%s5080_s2 + $0x8] sm:$0xf]  ;;  %s9920_s25 = smov (!%p5134_p2, %s5139_s25), %s7461_s22 }
 0x46e   : > { %6817 = vmatpush3.bf16.msra.mxu0 %v7447_v51  ;;  %6861 = vmatpush3.bf16.msra.mxu1 %v7447_v51  ;;  %v5084_v17 = vld [vmem:[%s5080_s2 + $0xc] sm:$0xf]  ;;  %v5085_v9 = vld [vmem:[%s5080_s2 + $0x10] sm:$0xf]  ;;  %v5086_v34 = vld [vmem:[%s5080_s2 + $0x14] sm:$0xf] }
 0x46f   : > { %6818 = vmatprep.subr.bf16.mxu0 %v7448_v58  ;;  %6854 = vmatprep.subr.bf16.mxu1 %v7448_v58  ;;  %5089 = vst [vmem:[%s7739_s26] sm:$0xf] %v5081_v60  ;;  %5090 = vst [vmem:[%s7739_s26 + $0x10] sm:$0xf] %v5082_v3  ;;  %v5087_v35 = vld [vmem:[%s5080_s2 + $0x18] sm:$0xf]  ;;  %p6530_p1 = scmp.lt.s32.totalorder %s9918_s15, 0 }
 0x470   : > { %5091 = vst [vmem:[%s7739_s26 + $0x20] sm:$0xf] %v5083_v59  ;;  %v5088_v46 = vld [vmem:[%s5080_s2 + $0x1c] sm:$0xf]  ;;  %5092 = vst [vmem:[%s7739_s26 + $0x30] sm:$0xf] %v5084_v17 }
 0x471   : > { %5093 = vst [vmem:[%s7739_s26 + $0x40] sm:$0xf] %v5085_v9  ;;  %5094 = vst [vmem:[%s7739_s26 + $0x50] sm:$0xf] %v5086_v34  ;;  %s5110_s0 = sadd.s32 3, %s9918_s15  ;;  %p6535_p3 = scmp.lt.s32.totalorder %s9920_s25, 0 }
 0x472   : > { %6819 = vmatpush3.bf16.msra.mxu0 %v7449_v11  ;;  %6862 = vmatpush3.bf16.msra.mxu1 %v7449_v11  ;;  %5095 = vst [vmem:[%s7739_s26 + $0x60] sm:$0xf] %v5087_v35  ;;  %5096 = vst [vmem:[%s7739_s26 + $0x70] sm:$0xf] %v5088_v46  ;;  %s9922_s0 = smov (!%p6530_p1, %s5110_s0), %s9918_s15  ;;  %s5145_s2 = sadd.s32 3, %s9920_s25 }
 0x473   : > { %6820 = vmatprep.subr.bf16.mxu0 %v7450_v30  ;;  %6855 = vmatprep.subr.bf16.mxu1 %v7450_v30  ;;  %s6608_s22 = sshll.u32 %s9922_s0, 6  ;;  %s9597_s15 = scalar_lea.vmem [#allocation5], %s6610_s17 }
 0x474   : > { %v5172_v0 = vld [vmem:[%s9597_s15] sm:$0xff]  ;;  %v5173_v21 = vld [vmem:[%s9597_s15 + $0x8] sm:$0xff]  ;;  %s9602_s12 = scalar_lea.vmem [#allocation5], %s6608_s22  ;;  %s9924_s2 = smov (!%p6535_p3, %s5145_s2), %s9920_s25  ;;  %v5174_v12 = vld [vmem:[%s9597_s15 + $0x10] sm:$0xff] }
 0x475   : > { %v5176_v49 = vld [vmem:[%s9597_s15 + $0x20] sm:$0xff]  ;;  %v5116_v27 = vld [vmem:[%s9602_s12 + $0x8] sm:$0xff]  ;;  %s5158_s13 = scalar_select %p479_p10, 1, 0  ;;  %v5117_v19 = vld [vmem:[%s9602_s12 + $0x10] sm:$0xff] }
 0x476   : > { %6821 = vmatpush3.bf16.msra.mxu0 %v7451_v32  ;;  %6863 = vmatpush3.bf16.msra.mxu1 %v7451_v32  ;;  %v5115_v41 = vld [vmem:[%s9602_s12] sm:$0xff]  ;;  %v5127_v42 = vsel %vm9591_vm12, %v5116_v27, 4286644096  ;;  %s6609_s11 = sshll.u32 %s9924_s2, 6  ;;  %v5120_v63 = vld [vmem:[%s9602_s12 + $0x28] sm:$0xff]  ;;  %v5118_v10 = vld [vmem:[%s9602_s12 + $0x18] sm:$0xff] }
 0x477   : > { %6822 = vmatprep.subr.bf16.mxu0 %v7452_v6  ;;  %6856 = vmatprep.subr.bf16.mxu1 %v7452_v6  ;;  %v5119_v8 = vld [vmem:[%s9602_s12 + $0x20] sm:$0xff]  ;;  %v5126_v26 = vsel %vm9591_vm12, %v5115_v41, 4286644096  ;;  %v5181_v55 = vmax.bf16 %v5173_v21, %v5127_v42  ;;  %v5177_v33 = vld [vmem:[%s9597_s15 + $0x28] sm:$0xff]  ;;  %v5159_v54 = vstv %s5158_s13  ;;  %v5131_v14 = vsel %vm9591_vm12, %v5120_v63, 4286644096 }
 0x478   : > { %v5180_v47 = vmax.bf16 %v5172_v0, %v5126_v26  ;;  %v5130_v1 = vsel %vm9591_vm12, %v5119_v8, 4286644096  ;;  %v5128_v4 = vsel %vm9591_vm12, %v5117_v19, 4286644096  ;;  %s5149_s16 = scalar_lea.vmem [#allocation5], %s6609_s11  ;;  %vm9624_vm15 = vcmp.eq.s32.totalorder %v5159_v54, 1 }
 0x479   : > { %v5184_v62 = vmax.bf16 %v5176_v49, %v5130_v1  ;;  %v5150_v44 = vld [vmem:[%s5149_s16] sm:$0xff]  ;;  %v5151_v56 = vld [vmem:[%s5149_s16 + $0x8] sm:$0xff]  ;;  %v5185_v18 = vmax.bf16 %v5177_v33, %v5131_v14  ;;  %v5129_v15 = vsel %vm9591_vm12, %v5118_v10, 4286644096  ;;  %v5152_v50 = vld [vmem:[%s5149_s16 + $0x10] sm:$0xff]  ;;  %v5182_v40 = vmax.bf16 %v5174_v12, %v5128_v4 }
 0x47a   : > { %6823 = vmatpush3.bf16.msra.mxu0 %v7453_v23  ;;  %6864 = vmatpush3.bf16.msra.mxu1 %v7453_v23  ;;  %v5154_v45 = vld [vmem:[%s5149_s16 + $0x20] sm:$0xff]  ;;  %v5161_v36 = vsel %vm9624_vm15, %v5150_v44, 4286644096  ;;  %v5162_v38 = vsel %vm9624_vm15, %v5151_v56, 4286644096  ;;  %v5155_v57 = vld [vmem:[%s5149_s16 + $0x28] sm:$0xff]  ;;  %v5496_v49 = vlaneseq }
 0x47b   : > { %6824 = vmatprep.subr.bf16.mxu0 %v7454_v2  ;;  %6857 = vmatprep.subr.bf16.mxu1 %v7454_v2  ;;  %v5188_v61 = vmax.bf16 %v5180_v47, %v5161_v36  ;;  %v5189_v7 = vmax.bf16 %v5181_v55, %v5162_v38  ;;  %v5165_v31 = vsel %vm9624_vm15, %v5154_v45, 4286644096  ;;  %v5166_v20 = vsel %vm9624_vm15, %v5155_v57, 4286644096  ;;  %v5153_v25 = vld [vmem:[%s5149_s16 + $0x18] sm:$0xff]  ;;  %v5121_v5 = vld [vmem:[%s9602_s12 + $0x30] sm:$0xff] }
 0x47c   : > { %v5192_v53 = vmax.bf16 %v5184_v62, %v5165_v31  ;;  %v5193_v29 = vmax.bf16 %v5185_v18, %v5166_v20  ;;  %v5163_v37 = vsel %vm9624_vm15, %v5152_v50, 4286644096  ;;  %v5164_v48 = vsel %vm9624_vm15, %v5153_v25, 4286644096  ;;  %v5175_v52 = vld [vmem:[%s9597_s15 + $0x18] sm:$0xff]  ;;  %v5156_v58 = vld [vmem:[%s5149_s16 + $0x30] sm:$0xff] }
 0x47d   : > { %v6541_v22 = vcombine.high %v5188_v61, %v5189_v7  ;;  %v6540_v13 = vcombine.low %v5188_v61, %v5189_v7  ;;  %v5183_v24 = vmax.bf16 %v5175_v52, %v5129_v15  ;;  %v5122_v51 = vld [vmem:[%s9602_s12 + $0x38] sm:$0xff]  ;;  %v5132_v6 = vsel %vm9591_vm12, %v5121_v5, 4286644096  ;;  %v5178_v2 = vld [vmem:[%s9597_s15 + $0x30] sm:$0xff]  ;;  %v5470_v27 = vld [vmem:[#allocation2] sm:$0xff] }
 0x47e   : > { %6825 = vmatpush3.bf16.msra.mxu0 %v7455_v43  ;;  %6865 = vmatpush3.bf16.msra.mxu1 %v7455_v43  ;;  %v5157_v11 = vld [vmem:[%s5149_s16 + $0x38] sm:$0xff]  ;;  %v6545_v30 = vcombine.high %v5192_v53, %v5193_v29  ;;  %v6544_v32 = vcombine.low %v5192_v53, %v5193_v29  ;;  %v5133_v23 = vsel %vm9591_vm12, %v5122_v51, 4286644096  ;;  %v5190_v3 = vmax.bf16 %v5182_v40, %v5163_v37  ;;  %v5471_v8 = vld [vmem:[#allocation2 + $0x8] sm:$0xff]  ;;  %v5474_v42 = vld [vmem:[#allocation2 + $0x20] sm:$0xff] }
 0x47f   : > { %v5179_v60 = vld [vmem:[%s9597_s15 + $0x38] sm:$0xff]  ;;  %5396 = vmatprep.mubr.bf16.mxu0 %v6541_v22  ;;  %v5191_v59 = vmax.bf16 %v5183_v24, %v5164_v48  ;;  %v5167_v17 = vsel %vm9624_vm15, %v5156_v58, 4286644096  ;;  %v5168_v9 = vsel %vm9624_vm15, %v5157_v11, 4286644096  ;;  %v5186_v34 = vmax.bf16 %v5178_v2, %v5132_v6  ;;  %v5476_v47 = vld [vmem:[#allocation2 + $0x30] sm:$0xff] }
 0x480   : > { %5412 = vmatprep.mubr.bf16.mxu1 %v6545_v30  ;;  %v5187_v35 = vmax.bf16 %v5179_v60, %v5133_v23  ;;  %v5497_v41 = vshrl.u32 %v5496_v49, 7  ;;  %v5473_v26 = vld [vmem:[#allocation2 + $0x18] sm:$0xff]  ;;  %v5479_v19 = vld [vmem:[#allocation2 + $0x48] sm:$0xff]  ;;  %v5494_v54 = vld [vmem:[%s9789_s6] sm:$0x7] }
 0x481   : > { %5397 = vmatmul.mubr.bf16.vlgmr.msra.gmra.mxu0 %v6540_v13  ;;  %5413 = vmatmul.mubr.bf16.vlgmr.msra.gmra.mxu1 %v6544_v32  ;;  %v6543_v46 = vcombine.high %v5190_v3, %v5191_v59  ;;  %v5194_v43 = vmax.bf16 %v5186_v34, %v5167_v17  ;;  %v6542_v0 = vcombine.low %v5190_v3, %v5191_v59  ;;  %v5477_v55 = vld [vmem:[#allocation2 + $0x38] sm:$0xff]  ;;  %v5535_v14 = vld [vmem:[%s9790_s7] sm:$0x7]  ;;  %v5480_v62 = vld [vmem:[#allocation2 + $0x50] sm:$0xff] }
 0x482   : > { %v5195_v28 = vmax.bf16 %v5187_v35, %v5168_v9  ;;  %v5498_v63 = vsub.s32 0, %v5497_v41  ;;  %v5502_v1 = vsub.s32 1, %v5497_v41  ;;  %v5506_v33 = vsub.s32 2, %v5497_v41  ;;  %v5482_v10 = vld [vmem:[#allocation2 + $0x60] sm:$0xff]  ;;  %v5483_v4 = vld [vmem:[#allocation2 + $0x68] sm:$0xff]  ;;  %v5485_v45 = vld [vmem:[#allocation2 + $0x78] sm:$0xff] }
 0x483   : > { %5404 = vmatprep.mubr.bf16.mxu0 %v6543_v46  ;;  %v5486_v18 = vld [vmem:[#allocation2 + $0x80] sm:$0xff]  ;;  %v5488_v15 = vld [vmem:[#allocation2 + $0x90] sm:$0xff]  ;;  %v5489_v50 = vld [vmem:[#allocation2 + $0x98] sm:$0xff] }
 0x484   : > { %v6547_v39 = vcombine.high %v5194_v43, %v5195_v28  ;;  %v6546_v21 = vcombine.low %v5194_v43, %v5195_v28  ;;  %v5499_v44 = vrot.slane %v5494_v54, %v5498_v63  ;;  %v5503_v56 = vrot.slane %v5494_v54, %v5502_v1  ;;  %v5491_v61 = vld [vmem:[#allocation2 + $0xa8] sm:$0xff]  ;;  %v5492_v7 = vld [vmem:[#allocation2 + $0xb0] sm:$0xff] }
 0x485   : > { %v9662_v16 = vrot.slane %v5494_v54, %v5506_v33  ;;  %v5540_v36 = vrot.slane %v5535_v14, %v5498_v63  ;;  %v5544_v38 = vrot.slane %v5535_v14, %v5502_v1  ;;  %v9664_v57 = vrot.slane %v5535_v14, %v5506_v33 }
 0x486   : > { %5420 = vmatprep.mubr.bf16.mxu1 %v6547_v39  ;;  %v5511_v31 = vmul.f32 %v5499_v44, %v5470_v27  ;;  %v5512_v20 = vmul.f32 %v5503_v56, %v5471_v8  ;;  %v5514_v25 = vmul.f32 %v5499_v44, %v5473_v26  ;;  %v5515_v12 = vmul.f32 %v5503_v56, %v5474_v42 }
 0x487   : > { %v5517_v53 = vmul.f32 %v5499_v44, %v5476_v47  ;;  %v5518_v29 = vmul.f32 %v5503_v56, %v5477_v55  ;;  %v5520_v37 = vmul.f32 %v5499_v44, %v5479_v19  ;;  %v5521_v48 = vmul.f32 %v5503_v56, %v5480_v62 }
 0x488   : > { %v5523_v52 = vmul.f32 %v5499_v44, %v5482_v10  ;;  %v5524_v5 = vmul.f32 %v5503_v56, %v5483_v4  ;;  %v5526_v22 = vmul.f32 %v5499_v44, %v5485_v45  ;;  %v5527_v13 = vmul.f32 %v5503_v56, %v5486_v18 }
 0x489   : > { %5405 = vmatmul.mubr.bf16.gmra.mxu0 %v6542_v0  ;;  %5421 = vmatmul.mubr.bf16.gmra.mxu1 %v6546_v21  ;;  %v5529_v40 = vmul.f32 %v5499_v44, %v5488_v15  ;;  %v5530_v24 = vmul.f32 %v5503_v56, %v5489_v50  ;;  %v5532_v51 = vmul.f32 %v5499_v44, %v5491_v61 }
 0x48a   : > { %v5533_v58 = vmul.f32 %v5503_v56, %v5492_v7  ;;  %v5552_v11 = vadd.f32 %v5540_v36, %v5511_v31  ;;  %v5553_v30 = vadd.f32 %v5544_v38, %v5512_v20  ;;  %v5555_v32 = vadd.f32 %v5540_v36, %v5514_v25 }
 0x48b   : > { %v5556_v6 = vadd.f32 %v5544_v38, %v5515_v12  ;;  %v5558_v23 = vadd.f32 %v5540_v36, %v5517_v53  ;;  %v5559_v2 = vadd.f32 %v5544_v38, %v5518_v29  ;;  %v5561_v60 = vadd.f32 %v5540_v36, %v5520_v37 }
 0x48c   : > { %v5562_v3 = vadd.f32 %v5544_v38, %v5521_v48  ;;  %v5564_v59 = vadd.f32 %v5540_v36, %v5523_v52  ;;  %v5565_v17 = vadd.f32 %v5544_v38, %v5524_v5  ;;  %v5567_v9 = vadd.f32 %v5540_v36, %v5526_v22 }
 0x48d   : > { %v5568_v34 = vadd.f32 %v5544_v38, %v5527_v13  ;;  %v5570_v35 = vadd.f32 %v5540_v36, %v5529_v40  ;;  %v5571_v46 = vadd.f32 %v5544_v38, %v5530_v24  ;;  %v5573_v43 = vadd.f32 %v5540_v36, %v5532_v51 }
 0x48e   : > { %v5574_v28 = vadd.f32 %v5544_v38, %v5533_v58  ;;  %v5576_v39 = vmax.f32 %v5552_v11, 0.0  ;;  %v5577_v0 = vmax.f32 %v5553_v30, 0.0  ;;  %v5579_v21 = vmax.f32 %v5555_v32, 0.0 }
 0x48f   : > { %v5580_v49 = vmax.f32 %v5556_v6, 0.0  ;;  %v5582_v41 = vmax.f32 %v5558_v23, 0.0  ;;  %v5583_v27 = vmax.f32 %v5559_v2, 0.0  ;;  %v5585_v8 = vmax.f32 %v5561_v60, 0.0 }
 0x490   : > { %v5586_v26 = vmax.f32 %v5562_v3, 0.0  ;;  %v5588_v42 = vmax.f32 %v5564_v59, 0.0  ;;  %v5589_v47 = vmax.f32 %v5565_v17, 0.0  ;;  %v5591_v55 = vmax.f32 %v5567_v9, 0.0 }
 0x491   : > { %v5592_v63 = vmax.f32 %v5568_v34, 0.0  ;;  %v5594_v1 = vmax.f32 %v5570_v35, 0.0  ;;  %v5595_v33 = vmax.f32 %v5571_v46, 0.0  ;;  %v5597_v19 = vmax.f32 %v5573_v43, 0.0 }
 0x492   : > { %v5598_v54 = vmax.f32 %v5574_v28, 0.0  ;;  %v6611_v14 = vpack.c.bf16 %v5577_v0, %v5576_v39  ;;  %v6613_v62 = vpack.c.bf16 %v5580_v49, %v5579_v21  ;;  %v6615_v10 = vpack.c.bf16 %v5583_v27, %v5582_v41 }
 0x493   : > { %v6617_v4 = vpack.c.bf16 %v5586_v26, %v5585_v8  ;;  %v6619_v44 = vpack.c.bf16 %v5589_v47, %v5588_v42  ;;  %v6621_v56 = vpack.c.bf16 %v5592_v63, %v5591_v55  ;;  %v6623_v45 = vpack.c.bf16 %v5595_v33, %v5594_v1 }
 0x494   : > { %v6625_v18 = vpack.c.bf16 %v5598_v54, %v5597_v19  ;;  %5680 = vst [vmem:[%s7739_s26 + $0x4] sm:$0xff] %v6611_v14  ;;  %5683 = vst [vmem:[%s7739_s26 + $0x14] sm:$0xff] %v6613_v62 }
 0x495   : > { %5685 = vst [vmem:[%s7739_s26 + $0x24] sm:$0xff] %v6615_v10  ;;  %5687 = vst [vmem:[%s7739_s26 + $0x34] sm:$0xff] %v6617_v4 }
 0x496   : > { %5689 = vst [vmem:[%s7739_s26 + $0x44] sm:$0xff] %v6619_v44  ;;  %5691 = vst [vmem:[%s7739_s26 + $0x54] sm:$0xff] %v6621_v56 }
 0x497   : > { %5693 = vst [vmem:[%s7739_s26 + $0x64] sm:$0xff] %v6623_v45  ;;  %5695 = vst [vmem:[%s7739_s26 + $0x74] sm:$0xff] %v6625_v18 }
 0x541   : > { %v6826_v15 = vpop.f32.mrf.mxu0  ;;  %v6838_v36 = vpop.f32.mrf.mxu1 }
 0x543   : > { %v6827_v38 = vpop.f32.mrf.mxu0  ;;  %v6839_v61 = vpop.f32.mrf.mxu1 }
 0x544   : > { %v6828_v50 = vadd.f32 %v6827_v38, %v6826_v15  ;;  %v6840_v25 = vadd.f32 %v6839_v61, %v6838_v36 }
 0x545   : > { %v6829_v7 = vpop.f32.mrf.mxu0  ;;  %v6841_v31 = vpop.f32.mrf.mxu1 }
 0x546   : > { %5437 = vrot.lane.b32.xlu0 %v6828_v50, %s7578_s18 }
 0x547   : > { %v6830_v20 = vpop.f32.mrf.mxu0  ;;  %v6842_v12 = vpop.f32.mrf.mxu1 }
 0x548   : > { %v6843_v53 = vadd.f32 %v6842_v12, %v6841_v31  ;;  %v6831_v52 = vadd.f32 %v6830_v20, %v6829_v7 }
 0x549   : > { %v6832_v29 = vpop.f32.mrf.mxu0  ;;  %v6844_v37 = vpop.f32.mrf.mxu1 }
 0x54a   : > { %5445 = vrot.lane.b32.xlu0 %v6840_v25, %s7578_s18  ;;  %5447 = vrot.lane.b32.xlu1 %v6843_v53, %s7578_s18 }
 0x54b   : > { %v6833_v48 = vpop.f32.mrf.mxu0  ;;  %v6845_v22 = vpop.f32.mrf.mxu1 }
 0x54c   : > { %v6834_v5 = vadd.f32 %v6833_v48, %v6832_v29  ;;  %v6846_v51 = vadd.f32 %v6845_v22, %v6844_v37 }
 0x54d   : > { %v6835_v13 = vpop.f32.mrf.mxu0  ;;  %v6847_v40 = vpop.f32.mrf.mxu1 }
 0x54e   : > { %5439 = vrot.lane.b32.xlu0 %v6831_v52, %s7578_s18  ;;  %5441 = vrot.lane.b32.xlu1 %v6834_v5, %s7578_s18 }
 0x54f   : > { %v6836_v24 = vpop.f32.mrf.mxu0  ;;  %v6848_v11 = vpop.f32.mrf.mxu1 }
 0x550   : > { %v6837_v58 = vadd.f32 %v6836_v24, %v6835_v13  ;;  %v6849_v30 = vadd.f32 %v6848_v11, %v6847_v40 }
 0x552   : > { %5449 = vrot.lane.b32.xlu0 %v6846_v51, %s7578_s18  ;;  %5443 = vrot.lane.b32.xlu1 %v6837_v58, %s7578_s18 }
 0x556   : > { %5451 = vrot.lane.b32.xlu1 %v6849_v30, %s7578_s18 }
 0x5b8   : > { %v5438_v32 = vpop.permute.xlu0 %5437 }
 0x5b9   : > { %5462 = vst.msk [vmem:[#allocation2 + $0x10] sm:$0xff] %vm5461_vm0, %v5438_v32 }
 0x5bc   : > { %v5446_v6 = vpop.permute.xlu0 %5445  ;;  %v5448_v23 = vpop.permute.xlu1 %5447 }
 0x5bd   : > { %5466 = vst.msk [vmem:[#allocation2 + $0x70] sm:$0xff] %vm5461_vm0, %v5446_v6  ;;  %5467 = vst.msk [vmem:[#allocation2 + $0x88] sm:$0xff] %vm5461_vm0, %v5448_v23 }
 0x5c0   : > { %v5472_v2 = vld [vmem:[#allocation2 + $0x10] sm:$0xff]  ;;  %v5440_v60 = vpop.permute.xlu0 %5439  ;;  %v5442_v59 = vpop.permute.xlu1 %5441 }
 0x5c1   : > { %v5513_v3 = vmul.f32 %v9662_v16, %v5472_v2  ;;  %5463 = vst.msk [vmem:[#allocation2 + $0x28] sm:$0xff] %vm5461_vm0, %v5440_v60  ;;  %5464 = vst.msk [vmem:[#allocation2 + $0x40] sm:$0xff] %vm5461_vm0, %v5442_v59 }
 0x5c3   : > { %v5554_v17 = vadd.f32 %v9664_v57, %v5513_v3 }
 0x5c4   : > { %v5484_v9 = vld [vmem:[#allocation2 + $0x70] sm:$0xff]  ;;  %v5450_v34 = vpop.permute.xlu0 %5449  ;;  %v5487_v46 = vld [vmem:[#allocation2 + $0x88] sm:$0xff]  ;;  %v5444_v28 = vpop.permute.xlu1 %5443 }
 0x5c5   : > { %v5578_v35 = vmax.f32 %v5554_v17, 0.0  ;;  %v5525_v43 = vmul.f32 %v9662_v16, %v5484_v9  ;;  %5468 = vst.msk [vmem:[#allocation2 + $0xa0] sm:$0xff] %vm5461_vm0, %v5450_v34  ;;  %v5528_v39 = vmul.f32 %v9662_v16, %v5487_v46  ;;  %5465 = vst.msk [vmem:[#allocation2 + $0x58] sm:$0xff] %vm5461_vm0, %v5444_v28 }
 0x5c7   : > { %v6612_v0 = vpack.c.bf16 %v5578_v35, %v5578_v35  ;;  %v5566_v21 = vadd.f32 %v9664_v57, %v5525_v43  ;;  %v5569_v49 = vadd.f32 %v9664_v57, %v5528_v39 }
 0x5c8   : > { %v5475_v41 = vld [vmem:[#allocation2 + $0x28] sm:$0xff]  ;;  %v5478_v8 = vld [vmem:[#allocation2 + $0x40] sm:$0xff]  ;;  %v5452_v42 = vpop.permute.xlu1 %5451 }
 0x5c9   : > { %5682 = vst.msk [vmem:[%s7739_s26 + $0xc] sm:$0xf] %vm5681_vm2, %v6612_v0  ;;  %v5590_v27 = vmax.f32 %v5566_v21, 0.0  ;;  %v5516_v26 = vmul.f32 %v9662_v16, %v5475_v41  ;;  %v5593_v47 = vmax.f32 %v5569_v49, 0.0  ;;  %v5519_v55 = vmul.f32 %v9662_v16, %v5478_v8 }
 0x5ca   : > { %5469 = vst.msk [vmem:[#allocation2 + $0xb8] sm:$0xff] %vm5461_vm0, %v5452_v42 }
 0x5cb   : > { %v6620_v63 = vpack.c.bf16 %v5590_v27, %v5590_v27  ;;  %v5557_v1 = vadd.f32 %v9664_v57, %v5516_v26  ;;  %v6622_v33 = vpack.c.bf16 %v5593_v47, %v5593_v47  ;;  %v5560_v19 = vadd.f32 %v9664_v57, %v5519_v55 }
 0x5cc   : > { %v5490_v54 = vld [vmem:[#allocation2 + $0xa0] sm:$0xff]  ;;  %v5481_v62 = vld [vmem:[#allocation2 + $0x58] sm:$0xff] }
 0x5cd   : > { %5690 = vst.msk [vmem:[%s7739_s26 + $0x4c] sm:$0xf] %vm5681_vm2, %v6620_v63  ;;  %v5581_v14 = vmax.f32 %v5557_v1, 0.0  ;;  %v5531_v10 = vmul.f32 %v9662_v16, %v5490_v54  ;;  %5692 = vst.msk [vmem:[%s7739_s26 + $0x5c] sm:$0xf] %vm5681_vm2, %v6622_v33  ;;  %v5584_v4 = vmax.f32 %v5560_v19, 0.0  ;;  %v5522_v44 = vmul.f32 %v9662_v16, %v5481_v62 }
 0x5cf   : > { %v6614_v56 = vpack.c.bf16 %v5581_v14, %v5581_v14  ;;  %v5572_v45 = vadd.f32 %v9664_v57, %v5531_v10  ;;  %v6616_v18 = vpack.c.bf16 %v5584_v4, %v5584_v4  ;;  %v5563_v15 = vadd.f32 %v9664_v57, %v5522_v44 }
 0x5d1   : > { %5684 = vst.msk [vmem:[%s7739_s26 + $0x1c] sm:$0xf] %vm5681_vm2, %v6614_v56  ;;  %v5596_v36 = vmax.f32 %v5572_v45, 0.0  ;;  %v5493_v38 = vld [vmem:[#allocation2 + $0xb8] sm:$0xff]  ;;  %5686 = vst.msk [vmem:[%s7739_s26 + $0x2c] sm:$0xf] %vm5681_vm2, %v6616_v18 }
 0x5d2   : > { %v5587_v50 = vmax.f32 %v5563_v15, 0.0  ;;  %v5534_v61 = vmul.f32 %v9662_v16, %v5493_v38 }
 0x5d3   : > { %v6624_v7 = vpack.c.bf16 %v5596_v36, %v5596_v36 }
 0x5d4   : > { %v6618_v31 = vpack.c.bf16 %v5587_v50, %v5587_v50  ;;  %v5575_v20 = vadd.f32 %v9664_v57, %v5534_v61 }
 0x5d5   : > { %5694 = vst.msk [vmem:[%s7739_s26 + $0x6c] sm:$0xf] %vm5681_vm2, %v6624_v7 }
 0x5d6   : > { %5688 = vst.msk [vmem:[%s7739_s26 + $0x3c] sm:$0xf] %vm5681_vm2, %v6618_v31  ;;  %v5599_v25 = vmax.f32 %v5575_v20, 0.0 }
 0x5d8   : > { %v6626_v12 = vpack.c.bf16 %v5599_v25, %v5599_v25 }
 0x5da   : > { %5696 = vst.msk [vmem:[%s7739_s26 + $0x7c] sm:$0xf] %vm5681_vm2, %v6626_v12 }
 0x5db PF: > { %s6581_s0 = sshll.u32 %s7550_s9, 5  ;;  %s6582_s1 = sshll.u32 %s7554_s10, 7 }
 0x5dc   : > { %s5713_s19 = sshll.u32 %s7739_s26, 4  ;;  %s5710_s24 = sadd.s32 %s6582_s1, %s6581_s0  ;;  %s9717_s19 = int_to_ptr.vmem [resolvable:$true] %s5713_s19 }
 0x5dd   : > { %s6583_s2 = sshll.u32 %s5710_s24, 6  ;;  %s9878_s13 = sand.u32 1, %s7538_s28  }
 0x5de   : > { %s9722_s12 = scalar_lea.hbm %s9791_s8, %s6583_s2  ;;  %s9726_s11 = scalar_lea.sflag [#allocation9], %s9878_s13 }
 0x5df   : > { %s7462_s16 = scalar_lea.vmem %s9717_s19, 2048  ;;  %s7579_s9 = smov [#allocation8]  }
 0x5e0   : > { %p7463_p10 = scmp.ne.s32.totalorder %s9717_s19, %s7462_s16  ;;  %s7466_s10 = sshll.u32 %s7579_s9, 4  ;;  %s7467_s10 = int_to_ptr.vmem [resolvable:$false] %s7466_s10 }
 0x5e1   : > { %s7468_s26 = scalar_lea.vmem %s7467_s10, 4096  ;;  %p7469_p8 = scmp.lt.s32.totalorder %s9717_s19, %s7467_s10 }
 0x5e2   : > { %p7464_p4 = pnand %p7463_p10, %p7689_p6  ;;  %p7470_p9 = scmp.lt.s32.totalorder %s7468_s26, %s7462_s16 }
 0x5e4   : > { %p7465_p5 = pneg %p7464_p4  ;;  %p7471_p11 = por %p7470_p9, %p7469_p8 }
 0x5e6   : > { %p7472_p12 = pnand %p7471_p11, %p7465_p5 }
 0x5e8   : > { %7475 = shalt.err (!%p7472_p12)
}
 0x5e9   : > { %s7476_s23 = scalar_lea.hbm %s9722_s12, 2048  ;;  %s7480_s17 = scalar_lea.hbm %s9791_s8, 16384 }
 0x5ea   : > { %p7477_p13 = scmp.ne.s32.totalorder %s9722_s12, %s7476_s23  ;;  %p7481_p1 = scmp.lt.s32.totalorder %s9722_s12, %s9791_s8 }
 0x5eb   : > { %p7482_p3 = scmp.lt.s32.totalorder %s7480_s17, %s7476_s23 }
 0x5ec   : > { %p7478_p0 = pnand %p7477_p13, %p7689_p6 }
 0x5ed   : > { %p7483_p10 = por %p7482_p3, %p7481_p1 }
 0x5ee   : > { %p7479_p2 = pneg %p7478_p0 }
 0x5f0   : > { %p7484_p4 = pnand %p7483_p10, %p7479_p2 }
 0x5f2   : > { %7487 = shalt.err (!%p7484_p4)
}
 0x5f3   : > { %s7580_s1 = smov 256   ;;  %s7581_s24 = smov 16  }
 0x5f4   : > { %6866 = dma.vmem_to_hbm [thread:$0]  (%p7689_p6), %s9717_s19, 2048, %s9722_s12, %s9726_s11, %s7580_s1, %s7580_s1, %s7581_s24  }
 0x5f5 PF: > { %p6872_p5 = scmp.ge.s32.totalorder %s7570_s14, 2  ;;  %s5728_s2 = sand.u32 1, %s7534_s27  }
 0x5f6   : > { %s5729_s22 = scalar_lea.sflag [#allocation9], %s5728_s2 }
 0x5f7   : > { %p6869_p8 = pnand %p6872_p5, %p7696_p7 }
 0x5f9   : > { %p6870_p9 = pneg %p6869_p8 }
 0x5fb   : > { %7529 = dma.done.wait (%p6870_p9), %s5729_s22, 2048  }
 0x5fc   : > { %7531 = vsyncadd (%p6870_p9), %s5729_s22, 4294965248  ;;  %s21_s14 = sadd.s32 1, %s7570_s14   ;;  %s9879_s15 = sld [smem:[#allocation17_spill]] }
 0x5fd   : > { %p18_p11 = scmp.ge.s32.totalorder %s21_s14, 26   ;;  %s9880_s30 = sld [smem:[#allocation11_spill]] }
 0x5fe   : > { %s9881_s9 = sld [smem:[#allocation12_spill]]  ;;  %s9886_s27 = smov %s7538_s28 }
 0x5ff   : > { %s9882_s10 = sld [smem:[#allocation13_spill]]  ;;  %s9887_s28 = smov %s7542_s29 }
 0x600   : > { %s9883_s11 = sld [smem:[#allocation14_spill]]  ;;  %20 = sbr.rel (!%p18_p11) target bundleno = 10 (0xa), region = 120 }
 0x601   : > { %s9884_s12 = sld [smem:[#allocation15_spill]] }
 0x602   : > { %s9885_s13 = sld [smem:[#allocation16_spill]]  ;;  %s9888_s29 = smov %s9879_s15 }
 0x605   :  { %5734 = vsyncpa [#allocation9], 1 }
 0x606   :  { %5736 = vsyncpa [#allocation9 + $0x1], 1 }

</bundles_post_ra>
